<compile_context>
chip_gen: v5e
topology: v5e:2x2
jax: 0.10.0
libtpu: 0.0.40
codegen_flags: <defaults>
</compile_context>

<pallas_src>
import functools

import jax
import jax.numpy as jnp
from jax.experimental import pallas as pl
from jax.experimental.pallas import tpu as pltpu


def bottleneck_kernel(x_ref, mask_ref, w1_ref, b1_ref, w2_ref, b2_ref,
                      w3_ref, b3_ref, o_ref, *, H, W):
    HW = H * W

    # --- conv1x1 + (folded) bn1 + relu --------------------------------------
    x_bf = x_ref[...].astype(jnp.bfloat16)                         # (HW, Cin)
    h1 = jnp.dot(x_bf, w1_ref[...], preferred_element_type=jnp.float32)
    h1 = jnp.maximum(h1 + b1_ref[...], 0.0)                        # (HW, Cmid) f32

    # --- conv3x3 (stride=1, pad=1) as one im2col matmul, K = 9*Cmid ---------
    # tap (dy, dx): patch[p] = h1[p + dy*W + dx], zero outside the image.
    # pltpu.roll handles the shift on the XLU; wrap-around rows are killed by
    # the precomputed boundary masks.
    taps = []
    t = 0
    for dy in (-1, 0, 1):
        for dx in (-1, 0, 1):
            shift = (-(dy * W + dx)) % HW
            tap = pltpu.roll(h1, shift=shift, axis=0) if shift else h1
            if not (dy == 0 and dx == 0):          # center tap mask is all-ones
                tap = tap * mask_ref[:, t:t + 1]
            taps.append(tap)
            t += 1
    patches = jnp.concatenate(taps, axis=1).astype(jnp.bfloat16)   # (HW, 9*Cmid)
    h2 = jnp.dot(patches, w2_ref[...], preferred_element_type=jnp.float32)
    h2 = jnp.maximum(h2 + b2_ref[...], 0.0)                        # (HW, Cmid)

    # --- conv1x1 expansion + (folded) bn3 -----------------------------------
    h3 = jnp.dot(h2.astype(jnp.bfloat16), w3_ref[...],
                 preferred_element_type=jnp.float32)
    h3 = h3 + b3_ref[...]                                          # (HW, Cout)

    # --- residual (identity) + relu; re-read x to keep live ranges short ----
    out = jnp.maximum(h3 + x_ref[...].astype(jnp.float32), 0.0)
    o_ref[...] = out.astype(o_ref.dtype)


def _bn_fold(gamma, beta, mean, var, eps=1e-5):
    scale = gamma / jnp.sqrt(var + eps)
    bias = beta - mean * scale
    return scale, bias


def _boundary_masks(H, W):
    """(H*W, 9) float32: mask[p, t]=1 iff tap t of pixel p lies inside image."""
    pos = jnp.arange(H * W)
    row = pos // W
    col = pos % W
    cols = []
    for dy in (-1, 0, 1):
        for dx in (-1, 0, 1):
            ok = ((row + dy >= 0) & (row + dy < H) &
                  (col + dx >= 0) & (col + dx < W))
            cols.append(ok)
    return jnp.stack(cols, axis=1).astype(jnp.float32)


def bottleneck_forward_nhwc(x_nhwc, params):
    """x_nhwc: (N, H, W, Cin) channels-last. Returns (N, H, W, Cout)."""
    N, H, W, Cin = x_nhwc.shape
    w1, w2, w3 = params["w1"], params["w2"], params["w3"]
    Cmid = w1.shape[1]
    Cout = w3.shape[1]
    assert Cin == Cout, "identity residual requires inplanes == planes*expansion"

    s1, b1 = _bn_fold(*params["bn1"])
    s2, b2 = _bn_fold(*params["bn2"])
    s3, b3 = _bn_fold(*params["bn3"])

    # Fold BN scales into the conv weights (output-channel axis); bf16 weights.
    w1f = (w1 * s1[None, :]).astype(jnp.bfloat16)                       # (Cin, Cmid)
    w2f = (w2 * s2[None, None, None, :]).reshape(9 * Cmid, Cmid)        # (9*Cmid, Cmid)
    w2f = w2f.astype(jnp.bfloat16)
    w3f = (w3 * s3[None, :]).astype(jnp.bfloat16)                       # (Cmid, Cout)
    b1 = b1.reshape(1, Cmid).astype(jnp.float32)
    b2 = b2.reshape(1, Cmid).astype(jnp.float32)
    b3 = b3.reshape(1, Cout).astype(jnp.float32)

    mask = _boundary_masks(H, W)                                        # (HW, 9)

    HW = H * W
    x_flat = x_nhwc.reshape(N, HW, Cin)

    def rep(shape):
        return pl.BlockSpec(shape, lambda n: (0,) * len(shape))

    out = pl.pallas_call(
        functools.partial(bottleneck_kernel, H=H, W=W),
        out_shape=jax.ShapeDtypeStruct((N, HW, Cout), x_nhwc.dtype),
        grid_spec=pltpu.PrefetchScalarGridSpec(
            num_scalar_prefetch=0,
            grid=(N,),
            in_specs=[
                pl.BlockSpec((pl.Squeezed(), HW, Cin), lambda n: (n, 0, 0)),
                rep((HW, 9)),
                rep((Cin, Cmid)), rep((1, Cmid)),
                rep((9 * Cmid, Cmid)), rep((1, Cmid)),
                rep((Cmid, Cout)), rep((1, Cout)),
            ],
            out_specs=pl.BlockSpec((pl.Squeezed(), HW, Cout),
                                   lambda n: (n, 0, 0)),
        ),
        compiler_params=pltpu.CompilerParams(
            dimension_semantics=("parallel",),
            vmem_limit_bytes=48 * 1024 * 1024),
    )(x_flat, mask, w1f, b1, w2f, b2, w3f, b3)

    return out.reshape(N, H, W, Cout)


def bottleneck_forward(x_nchw, params):
    # NOTE: in a full NHWC model these transposes disappear; they exist only to
    # match the PyTorch NCHW interface of the reference module.
    x = jnp.transpose(x_nchw, (0, 2, 3, 1))          # NCHW -> NHWC
    out = bottleneck_forward_nhwc(x, params)
    return jnp.transpose(out, (0, 3, 1, 2))          # NHWC -> NCHW


# ------------------------- pure-JAX f32 reference ---------------------------
def bottleneck_reference(x, params, eps=1e-5):
    def conv(x, w_hwio, pad):
        w = jnp.transpose(w_hwio, (3, 2, 0, 1))      # HWIO -> OIHW
        return jax.lax.conv_general_dilated(
            x, w, (1, 1), [(pad, pad), (pad, pad)],
            dimension_numbers=("NCHW", "OIHW", "NCHW"))

    def bn(x, gamma, beta, mean, var):
        g = gamma[None, :, None, None]
        b = beta[None, :, None, None]
        m = mean[None, :, None, None]
        v = var[None, :, None, None]
        return g * (x - m) / jnp.sqrt(v + eps) + b

    w1 = params["w1"][None, None, :, :]              # (1,1,Cin,Cmid)
    w2 = params["w2"]                                # (3,3,Cmid,Cmid)
    w3 = params["w3"][None, None, :, :]              # (1,1,Cmid,Cout)

    out = jax.nn.relu(bn(conv(x, w1, 0), *params["bn1"]))
    out = jax.nn.relu(bn(conv(out, w2, 1), *params["bn2"]))
    out = bn(conv(out, w3, 0), *params["bn3"])
    return jax.nn.relu(out + x)


if __name__ == "__main__":
    # Bottleneck(inplanes=128, planes=32, stride=1, downsample=None)
    N, inplanes, planes, H, W = 2, 128, 32, 16, 16
    Cout = planes * 4                                # expansion = 4 -> 128 == inplanes

    key = jax.random.PRNGKey(0)
    ks = jax.random.split(key, 16)

    def bn_params(k0, k1, k2, k3, c):
        return (jax.random.uniform(k0, (c,), jnp.float32, 0.9, 1.1),   # gamma
                0.1 * jax.random.normal(k1, (c,), jnp.float32),        # beta
                0.1 * jax.random.normal(k2, (c,), jnp.float32),        # running mean
                jax.random.uniform(k3, (c,), jnp.float32, 0.9, 1.1))   # running var

    params = {
        "w1": 0.1 * jax.random.normal(ks[0], (inplanes, planes), jnp.float32),
        "w2": 0.1 * jax.random.normal(ks[1], (3, 3, planes, planes), jnp.float32),
        "w3": 0.1 * jax.random.normal(ks[2], (planes, Cout), jnp.float32),
        "bn1": bn_params(ks[3], ks[4], ks[5], ks[6], planes),
        "bn2": bn_params(ks[7], ks[8], ks[9], ks[10], planes),
        "bn3": bn_params(ks[11], ks[12], ks[13], ks[14], Cout),
    }

    x = jax.random.normal(ks[15], (N, inplanes, H, W), jnp.float32)

    out = jax.block_until_ready(bottleneck_forward(x, params))
    ref = jax.block_until_ready(bottleneck_reference(x, params))

    assert out.shape == (N, Cout, H, W)
    # bf16 matmul operands with f32 accumulation -> loosened tolerance vs the
    # full-f32 reference.
    max_err = float(jnp.max(jnp.abs(out - ref)))
    assert jnp.allclose(out, ref, atol=5e-2, rtol=2e-2), max_err

    print("KERNEL_OK")
</pallas_src>

<mosaic_0001>
module attributes {stable_mosaic.version = 11 : i64} {
  func.func @bottleneck_kernel(%arg0: i32, %arg1: memref<1x256x128xf32, #tpu.memory_space<vmem>>, %arg2: memref<256x9xf32, #tpu.memory_space<vmem>>, %arg3: memref<128x32xbf16, #tpu.memory_space<vmem>>, %arg4: memref<1x32xf32, #tpu.memory_space<vmem>>, %arg5: memref<288x32xbf16, #tpu.memory_space<vmem>>, %arg6: memref<1x32xf32, #tpu.memory_space<vmem>>, %arg7: memref<32x128xbf16, #tpu.memory_space<vmem>>, %arg8: memref<1x128xf32, #tpu.memory_space<vmem>>, %arg9: memref<1x256x128xf32, #tpu.memory_space<vmem>>) attributes {dimension_semantics = [#tpu.dimension_semantics<parallel>], iteration_bounds = array<i64: 2>, scalar_prefetch = 0 : i64, scratch_operands = 0 : i64, tpu.core_type = #tpu.core_type<tc>, window_params = [{transform_indices = @transform_0, window_bounds = array<i64: 1, 256, 128>}, {pipeline_mode = #tpu.pipeline_mode<synchronous>, transform_indices = @transform_1, window_bounds = array<i64: 256, 9>}, {pipeline_mode = #tpu.pipeline_mode<synchronous>, transform_indices = @transform_2, window_bounds = array<i64: 128, 32>}, {pipeline_mode = #tpu.pipeline_mode<synchronous>, transform_indices = @transform_3, window_bounds = array<i64: 1, 32>}, {pipeline_mode = #tpu.pipeline_mode<synchronous>, transform_indices = @transform_4, window_bounds = array<i64: 288, 32>}, {pipeline_mode = #tpu.pipeline_mode<synchronous>, transform_indices = @transform_5, window_bounds = array<i64: 1, 32>}, {pipeline_mode = #tpu.pipeline_mode<synchronous>, transform_indices = @transform_6, window_bounds = array<i64: 32, 128>}, {pipeline_mode = #tpu.pipeline_mode<synchronous>, transform_indices = @transform_7, window_bounds = array<i64: 1, 128>}, {transform_indices = @transform_8, window_bounds = array<i64: 1, 256, 128>}]} {
    %c0 = arith.constant 0 : index
    %c0_0 = arith.constant 0 : index
    %c0_1 = arith.constant 0 : index
    %0 = vector.load %arg1[%c0, %c0_0, %c0_1] : memref<1x256x128xf32, #tpu.memory_space<vmem>>, vector<1x256x128xf32>
    %1 = vector.shape_cast %0 : vector<1x256x128xf32> to vector<256x128xf32>
    %2 = arith.truncf %1 : vector<256x128xf32> to vector<256x128xbf16>
    %c0_2 = arith.constant 0 : index
    %c0_3 = arith.constant 0 : index
    %3 = vector.load %arg3[%c0_2, %c0_3] : memref<128x32xbf16, #tpu.memory_space<vmem>>, vector<128x32xbf16>
    %cst = arith.constant dense<0.000000e+00> : vector<256x32xf32>
    %4 = tpu.matmul %2, %3, %cst {dimension_numbers = #tpu.dot_dimension_numbers<[1], [0], [0], [1], [0, 0, 1, 1], [], []>} : vector<256x128xbf16>, vector<128x32xbf16>, vector<256x32xf32> -> vector<256x32xf32>
    %c0_4 = arith.constant 0 : index
    %c0_5 = arith.constant 0 : index
    %5 = vector.load %arg4[%c0_4, %c0_5] : memref<1x32xf32, #tpu.memory_space<vmem>>, vector<1x32xf32>
    %6 = vector.broadcast %5 : vector<1x32xf32> to vector<256x32xf32>
    %7 = arith.addf %4, %6 : vector<256x32xf32>
    %cst_6 = arith.constant 0.000000e+00 : f32
    %8 = vector.broadcast %cst_6 : f32 to vector<256x32xf32>
    %9 = arith.maximumf %7, %8 : vector<256x32xf32>
    %c17_i32 = arith.constant 17 : i32
    %10 = tpu.dynamic_rotate %9 by %c17_i32 dim 0 : vector<256x32xf32>, i32 -> vector<256x32xf32>
    %c0_7 = arith.constant 0 : index
    %c0_8 = arith.constant 0 : index
    %11 = vector.load %arg2[%c0_7, %c0_8] : memref<256x9xf32, #tpu.memory_space<vmem>>, vector<256x1xf32>
    %12 = vector.broadcast %11 : vector<256x1xf32> to vector<256x32xf32>
    %13 = arith.mulf %10, %12 : vector<256x32xf32>
    %c16_i32 = arith.constant 16 : i32
    %14 = tpu.dynamic_rotate %9 by %c16_i32 dim 0 : vector<256x32xf32>, i32 -> vector<256x32xf32>
    %c0_9 = arith.constant 0 : index
    %c1 = arith.constant 1 : index
    %15 = vector.load %arg2[%c0_9, %c1] : memref<256x9xf32, #tpu.memory_space<vmem>>, vector<256x1xf32>
    %16 = vector.broadcast %15 : vector<256x1xf32> to vector<256x32xf32>
    %17 = arith.mulf %14, %16 : vector<256x32xf32>
    %c15_i32 = arith.constant 15 : i32
    %18 = tpu.dynamic_rotate %9 by %c15_i32 dim 0 : vector<256x32xf32>, i32 -> vector<256x32xf32>
    %c0_10 = arith.constant 0 : index
    %c2 = arith.constant 2 : index
    %19 = vector.load %arg2[%c0_10, %c2] : memref<256x9xf32, #tpu.memory_space<vmem>>, vector<256x1xf32>
    %20 = vector.broadcast %19 : vector<256x1xf32> to vector<256x32xf32>
    %21 = arith.mulf %18, %20 : vector<256x32xf32>
    %c1_i32 = arith.constant 1 : i32
    %22 = tpu.dynamic_rotate %9 by %c1_i32 dim 0 : vector<256x32xf32>, i32 -> vector<256x32xf32>
    %c0_11 = arith.constant 0 : index
    %c3 = arith.constant 3 : index
    %23 = vector.load %arg2[%c0_11, %c3] : memref<256x9xf32, #tpu.memory_space<vmem>>, vector<256x1xf32>
    %24 = vector.broadcast %23 : vector<256x1xf32> to vector<256x32xf32>
    %25 = arith.mulf %22, %24 : vector<256x32xf32>
    %c255_i32 = arith.constant 255 : i32
    %26 = tpu.dynamic_rotate %9 by %c255_i32 dim 0 : vector<256x32xf32>, i32 -> vector<256x32xf32>
    %c0_12 = arith.constant 0 : index
    %c5 = arith.constant 5 : index
    %27 = vector.load %arg2[%c0_12, %c5] : memref<256x9xf32, #tpu.memory_space<vmem>>, vector<256x1xf32>
    %28 = vector.broadcast %27 : vector<256x1xf32> to vector<256x32xf32>
    %29 = arith.mulf %26, %28 : vector<256x32xf32>
    %c241_i32 = arith.constant 241 : i32
    %30 = tpu.dynamic_rotate %9 by %c241_i32 dim 0 : vector<256x32xf32>, i32 -> vector<256x32xf32>
    %c0_13 = arith.constant 0 : index
    %c6 = arith.constant 6 : index
    %31 = vector.load %arg2[%c0_13, %c6] : memref<256x9xf32, #tpu.memory_space<vmem>>, vector<256x1xf32>
    %32 = vector.broadcast %31 : vector<256x1xf32> to vector<256x32xf32>
    %33 = arith.mulf %30, %32 : vector<256x32xf32>
    %c240_i32 = arith.constant 240 : i32
    %34 = tpu.dynamic_rotate %9 by %c240_i32 dim 0 : vector<256x32xf32>, i32 -> vector<256x32xf32>
    %c0_14 = arith.constant 0 : index
    %c7 = arith.constant 7 : index
    %35 = vector.load %arg2[%c0_14, %c7] : memref<256x9xf32, #tpu.memory_space<vmem>>, vector<256x1xf32>
    %36 = vector.broadcast %35 : vector<256x1xf32> to vector<256x32xf32>
    %37 = arith.mulf %34, %36 : vector<256x32xf32>
    %c239_i32 = arith.constant 239 : i32
    %38 = tpu.dynamic_rotate %9 by %c239_i32 dim 0 : vector<256x32xf32>, i32 -> vector<256x32xf32>
    %c0_15 = arith.constant 0 : index
    %c8 = arith.constant 8 : index
    %39 = vector.load %arg2[%c0_15, %c8] : memref<256x9xf32, #tpu.memory_space<vmem>>, vector<256x1xf32>
    %40 = vector.broadcast %39 : vector<256x1xf32> to vector<256x32xf32>
    %41 = arith.mulf %38, %40 : vector<256x32xf32>
    %42 = tpu.concatenate %13, %17, %21, %25, %9, %29, %33, %37, %41 in 1 : vector<256x32xf32>, vector<256x32xf32>, vector<256x32xf32>, vector<256x32xf32>, vector<256x32xf32>, vector<256x32xf32>, vector<256x32xf32>, vector<256x32xf32>, vector<256x32xf32> -> vector<256x288xf32>
    %43 = arith.truncf %42 : vector<256x288xf32> to vector<256x288xbf16>
    %c0_16 = arith.constant 0 : index
    %c0_17 = arith.constant 0 : index
    %44 = vector.load %arg5[%c0_16, %c0_17] : memref<288x32xbf16, #tpu.memory_space<vmem>>, vector<288x32xbf16>
    %cst_18 = arith.constant dense<0.000000e+00> : vector<256x32xf32>
    %45 = tpu.matmul %43, %44, %cst_18 {dimension_numbers = #tpu.dot_dimension_numbers<[1], [0], [0], [1], [0, 0, 1, 1], [], []>} : vector<256x288xbf16>, vector<288x32xbf16>, vector<256x32xf32> -> vector<256x32xf32>
    %c0_19 = arith.constant 0 : index
    %c0_20 = arith.constant 0 : index
    %46 = vector.load %arg6[%c0_19, %c0_20] : memref<1x32xf32, #tpu.memory_space<vmem>>, vector<1x32xf32>
    %47 = vector.broadcast %46 : vector<1x32xf32> to vector<256x32xf32>
    %48 = arith.addf %45, %47 : vector<256x32xf32>
    %cst_21 = arith.constant 0.000000e+00 : f32
    %49 = vector.broadcast %cst_21 : f32 to vector<256x32xf32>
    %50 = arith.maximumf %48, %49 : vector<256x32xf32>
    %51 = arith.truncf %50 : vector<256x32xf32> to vector<256x32xbf16>
    %c0_22 = arith.constant 0 : index
    %c0_23 = arith.constant 0 : index
    %52 = vector.load %arg7[%c0_22, %c0_23] : memref<32x128xbf16, #tpu.memory_space<vmem>>, vector<32x128xbf16>
    %cst_24 = arith.constant dense<0.000000e+00> : vector<256x128xf32>
    %53 = tpu.matmul %51, %52, %cst_24 {dimension_numbers = #tpu.dot_dimension_numbers<[1], [0], [0], [1], [0, 0, 1, 1], [], []>} : vector<256x32xbf16>, vector<32x128xbf16>, vector<256x128xf32> -> vector<256x128xf32>
    %c0_25 = arith.constant 0 : index
    %c0_26 = arith.constant 0 : index
    %54 = vector.load %arg8[%c0_25, %c0_26] : memref<1x128xf32, #tpu.memory_space<vmem>>, vector<1x128xf32>
    %55 = vector.broadcast %54 : vector<1x128xf32> to vector<256x128xf32>
    %56 = arith.addf %53, %55 : vector<256x128xf32>
    %c0_27 = arith.constant 0 : index
    %c0_28 = arith.constant 0 : index
    %c0_29 = arith.constant 0 : index
    %57 = vector.load %arg1[%c0_27, %c0_28, %c0_29] : memref<1x256x128xf32, #tpu.memory_space<vmem>>, vector<1x256x128xf32>
    %58 = vector.shape_cast %57 : vector<1x256x128xf32> to vector<256x128xf32>
    %59 = arith.addf %56, %58 : vector<256x128xf32>
    %cst_30 = arith.constant 0.000000e+00 : f32
    %60 = vector.broadcast %cst_30 : f32 to vector<256x128xf32>
    %61 = arith.maximumf %59, %60 : vector<256x128xf32>
    %c0_31 = arith.constant 0 : index
    %c0_32 = arith.constant 0 : index
    %c0_33 = arith.constant 0 : index
    %62 = vector.load %arg9[%c0_31, %c0_32, %c0_33] : memref<1x256x128xf32, #tpu.memory_space<vmem>>, vector<1x256x128xf32>
    %63 = vector.shape_cast %62 : vector<1x256x128xf32> to vector<256x128xf32>
    %64 = vector.shape_cast %61 : vector<256x128xf32> to vector<1x256x128xf32>
    tpu.vector_store %arg9[%c0_31, %c0_32, %c0_33], %64 {strides = array<i32>} : memref<1x256x128xf32, #tpu.memory_space<vmem>>, vector<1x256x128xf32>,
    return
  }
  func.func @transform_0(%arg0: i32) -> (i32, i32, i32) {
    %c0_i32 = arith.constant 0 : i32
    %c0_i32_0 = arith.constant 0 : i32
    %c0_i32_1 = arith.constant 0 : i32
    return %arg0, %c0_i32, %c0_i32_0 : i32, i32, i32
  }
  func.func @transform_1(%arg0: i32) -> (i32, i32) {
    %c0_i32 = arith.constant 0 : i32
    %c0_i32_0 = arith.constant 0 : i32
    %c0_i32_1 = arith.constant 0 : i32
    return %c0_i32, %c0_i32_0 : i32, i32
  }
  func.func @transform_2(%arg0: i32) -> (i32, i32) {
    %c0_i32 = arith.constant 0 : i32
    %c0_i32_0 = arith.constant 0 : i32
    %c0_i32_1 = arith.constant 0 : i32
    return %c0_i32, %c0_i32_0 : i32, i32
  }
  func.func @transform_3(%arg0: i32) -> (i32, i32) {
    %c0_i32 = arith.constant 0 : i32
    %c0_i32_0 = arith.constant 0 : i32
    %c0_i32_1 = arith.constant 0 : i32
    return %c0_i32, %c0_i32_0 : i32, i32
  }
  func.func @transform_4(%arg0: i32) -> (i32, i32) {
    %c0_i32 = arith.constant 0 : i32
    %c0_i32_0 = arith.constant 0 : i32
    %c0_i32_1 = arith.constant 0 : i32
    return %c0_i32, %c0_i32_0 : i32, i32
  }
  func.func @transform_5(%arg0: i32) -> (i32, i32) {
    %c0_i32 = arith.constant 0 : i32
    %c0_i32_0 = arith.constant 0 : i32
    %c0_i32_1 = arith.constant 0 : i32
    return %c0_i32, %c0_i32_0 : i32, i32
  }
  func.func @transform_6(%arg0: i32) -> (i32, i32) {
    %c0_i32 = arith.constant 0 : i32
    %c0_i32_0 = arith.constant 0 : i32
    %c0_i32_1 = arith.constant 0 : i32
    return %c0_i32, %c0_i32_0 : i32, i32
  }
  func.func @transform_7(%arg0: i32) -> (i32, i32) {
    %c0_i32 = arith.constant 0 : i32
    %c0_i32_0 = arith.constant 0 : i32
    %c0_i32_1 = arith.constant 0 : i32
    return %c0_i32, %c0_i32_0 : i32, i32
  }
  func.func @transform_8(%arg0: i32) -> (i32, i32, i32) {
    %c0_i32 = arith.constant 0 : i32
    %c0_i32_0 = arith.constant 0 : i32
    %c0_i32_1 = arith.constant 0 : i32
    return %arg0, %c0_i32, %c0_i32_0 : i32, i32, i32
  }
}

</mosaic_0001>

<bundles_post_ra>
// kernel: tpu_custom_call.1
= control target key start
LH: loop header
LB: loop body
LE: loop exit
PB: predicated region body
PF: predicated region fallthrough
CT: control target
= control target key end

     0   :  { %13 = vsyncpa [#allocation3], 0  ;;  %s8044_s0 = inlined_call_operand.hbm [shape: f32[2,256,128], index: 0, kind: input, shape index: {}]   ;;  %s8045_s1 = inlined_call_operand.vmem [shape: f32[256,9], index: 1, kind: input, shape index: {}]   ;;  %s8046_s2 = inlined_call_operand.vmem [shape: bf16[128,32], index: 2, kind: input, shape index: {}]   ;;  %s8047_s3 = inlined_call_operand.vmem [shape: f32[1,32], index: 3, kind: input, shape index: {}]   ;;  %s8048_s4 = inlined_call_operand.vmem [shape: bf16[288,32], index: 4, kind: input, shape index: {}]   ;;  %s8049_s5 = inlined_call_operand.vmem [shape: f32[1,32], index: 5, kind: input, shape index: {}]   ;;  %s8050_s6 = inlined_call_operand.vmem [shape: bf16[32,128], index: 6, kind: input, shape index: {}]   ;;  %s8051_s7 = inlined_call_operand.vmem [shape: f32[1,128], index: 7, kind: input, shape index: {}]   ;;  %s8052_s8 = inlined_call_operand.hbm [shape: f32[2,256,128], index: 8, kind: output, shape index: {}]  }
   0x1   :  { %15 = vsyncpa [#allocation3 + $0x1], 0 }
   0x2   :  { %16 = vsyncpa [#allocation4], 0 }
   0x3   :  { %18 = vsyncpa [#allocation4 + $0x1], 0  ;;  %s4896_s27 = smov 0   ;;  %s4898_s28 = smov 0  }
   0x4   :  { %s4900_s29 = smov 0   ;;  %s4902_s30 = smov 0  }
   0x5 LB: > { %8188 = sst [smem:[#allocation8_spill]] %s4830_s29  ;;  %s4917_s9 = sadd.s32 4294967295, %s4834_s30   ;;  %s4834_s30 = sphi %s4902_s30, %s8792_s30   ;;  %s4830_s29 = sphi %s4900_s29, %s8789_s29   ;;  %s4826_s28 = sphi %s4898_s28, %s8791_s28   ;;  %s4822_s27 = sphi %s4896_s27, %s8790_s27  }
   0x6   : > { %s3904_s10 = sadd.s32 4294967294, %s4834_s30   ;;  %s4921_s11 = sadd.s32 1, %s4834_s30  }
   0x7   : > { %s31_s12 = sadd.s32 1, %s4830_s29  ;;  %s28_s13 = ssub.s32 %s4834_s30, %s4921_s11 }
   0x8   : > { %p38_p0 = scmp.ne.s32.totalorder %s4830_s29, %s4826_s28  ;;  %p29_p1 = scmp.eq.s32.totalorder %s28_s13, 0 }
   0x9   : > { %p39_p2 = scmp.eq.s32.totalorder %s4834_s30, 0  ;;  %p44_p3 = scmp.ne.s32.totalorder %s4826_s28, %s4822_s27 }
   0xa   : > { %p45_p4 = scmp.eq.s32.totalorder %s4917_s9, 0  ;;  %p215_p7 = scmp.eq.s32.totalorder %s4917_s9, 1 }
   0xb   : > { %s4933_s14 = scalar_select %p29_p1, %s4830_s29, %s31_s12  }
   0xc   : > { %p4935_p5 = por %p39_p2, %p38_p0  ;;  %p4939_p6 = por %p45_p4, %p44_p3 }
   0xd   : > { %8189 = sst [smem:[#allocation9_spill]] %s4933_s14  ;;  %p221_p8 = scmp.eq.s32.totalorder %s3904_s10, 1 }
   0xe   : > { %p4122_p10 = scmp.lt.s32.totalorder %s4834_s30, 2  ;;  %p4946_p11 = por %p215_p7, %p38_p0 }
   0xf   : > { %p4950_p12 = por %p221_p8, %p44_p3  ;;  %s262_s19 = sand.u32 1, %s4830_s29  }
  0x10   : > { %s4062_s20 = sshll.u32 %s4834_s30, 8  ;;  %s3907_s21 = sshll.u32 %s262_s19, 8 }
  0x11   : > { %s271_s24 = scalar_lea.hbm %s8044_s0, %s4062_s20  ;;  %s266_s26 = scalar_lea.vmem [#allocation2], %s3907_s21 }
  0x12   : > { %s272_s25 = sshll.u32 %s271_s24, 4  ;;  %s274_s10 = sshll.u32 %s266_s26, 4  ;;  %s273_s25 = int_to_ptr.hbm [resolvable:$true] %s272_s25  ;;  %s275_s10 = int_to_ptr.vmem [resolvable:$true] %s274_s10 }
  0x13   : > { %p4961_p13 = pnand %p4122_p10, %p4935_p5  ;;  %p3910_p0 = scmp.ge.s32.totalorder %s4834_s30, 1 }
  0x14   : > { %p282_p1 = scmp.lt.s32.totalorder %s4834_s30, 3  ;;  %s263_s13 = scalar_lea.sflag [#allocation3], %s262_s19 }
  0x15   : > { %s4738_s14 = sshra.s32 %s273_s25, 4  ;;  %p4742_p3 = pneg %p4961_p13  ;;  %s4739_s14 = int_to_ptr.hbm [resolvable:$true] %s4738_s14 }
  0x16   : > { %s4740_s29 = scalar_lea.hbm %s4739_s14, 256  ;;  %s4745_s15 = scalar_lea.hbm %s8044_s0, 512 }
  0x17   : > { %p4741_p2 = scmp.ne.s32.totalorder %s4739_s14, %s4740_s29  ;;  %p4746_p5 = scmp.lt.s32.totalorder %s4739_s14, %s8044_s0 }
  0x18   : > { %p4747_p8 = scmp.lt.s32.totalorder %s4745_s15, %s4740_s29 }
  0x19   : > { %p4743_p4 = pnand %p4742_p3, %p4741_p2 }
  0x1a   : > { %p4748_p10 = por %p4747_p8, %p4746_p5 }
  0x1b   : > { %p4744_p7 = pneg %p4743_p4 }
  0x1d   : > { %p4749_p9 = pnand %p4748_p10, %p4744_p7 }
  0x1f   : > { %4752 = shalt.err (!%p4749_p9)
}
  0x20   : > { %s4836_s19 = smov 128   ;;  %s4837_s24 = smov 8  }
  0x21   : > { %4117 = dma.hbm_to_vmem [thread:$0]  (!%p4961_p13), %s273_s25, 4096, %s275_s10, %s263_s13, %s4836_s19, %s4836_s19, %s4837_s24  }
  0x22   : > { %p283_p2 = pnand %p3910_p0, %p282_p1 }
  0x24   : > { %286 = sbr.rel (%p283_p2) target bundleno = 1421 (0x58d), region = 52 }
  0x29   : > { %s4982_s26 = sand.u32 1, %s4826_s28  }
  0x2a   : > { %s3911_s29 = sshll.u32 %s4982_s26, 8  ;;  %s289_s14 = scalar_lea.sflag [#allocation3], %s4982_s26 }
  0x2b   : > { %s4988_s20 = scalar_lea.vmem [#allocation2], %s3911_s29 }
  0x2c   : > { %4813 = dma.done.wait (%p4939_p6), %s289_s14, 4096  }
  0x2d   : > { %4815 = vsyncadd (%p4939_p6), %s289_s14, 4294963200  ;;  %v4838_v0 = vmov 0   ;;  %v4997_v1 = vld [vmem:[%s8045_s1 + $0x20] sm:$0xff]  ;;  %v5002_v2 = vld [vmem:[%s8045_s1 + $0x10] sm:$0xff]  ;;  %s4846_s23 = smov 64   ;;  %s4847_s14 = smov 32  }
  0x2e   : > { %4173 = vset.pattern.permute.xlu2 %v4838_v0  ;;  %4172 = vset.pattern.permute.xlu1 %v4838_v0  ;;  %v5007_v3 = vld [vmem:[%s8045_s1] sm:$0xff]  ;;  %v4070_v4 = vld [vmem:[%s8046_s2 + $0x38] sm:$0xff]  ;;  %v4069_v5 = vld [vmem:[%s8046_s2 + $0x30] sm:$0xff]  ;;  %vm2808_vm2 = vcmask 261120   ;;  %s4848_s25 = smov 96   ;;  %vm2841_vm3 = vcmask 523264  }
  0x2f   : > { %4171 = vset.pattern.permute.xlu0 %v4838_v0  ;;  %685 = vperm.xlu2 %4173, %v4997_v1   ;;  %v5021_v6 = vld [vmem:[%s8045_s1 + $0x28] sm:$0xff]  ;;  %v5026_v7 = vld [vmem:[%s8045_s1 + $0x18] sm:$0xff]  ;;  %v4067_v10 = vld [vmem:[%s8046_s2 + $0x20] sm:$0xff]  ;;  %vm2874_vm4 = vcmask 785408   ;;  %s7884_s12 = scalar_lea.vmem [#allocation5], %s3911_s29  ;;  %s4091_s21 = sshll.u32 %s4917_s9, 8 }
  0x30   : > { %675 = vperm.xlu1 %4172, %v5002_v2   ;;  %665 = vperm.xlu0 %4171, %v5007_v3   ;;  %v5031_v8 = vld [vmem:[%s8045_s1 + $0x8] sm:$0xff]  ;;  %v5045_v11 = vld [vmem:[%s8045_s1 + $0x40] sm:$0xff]  ;;  %v5050_v12 = vld [vmem:[%s8045_s1 + $0x38] sm:$0xff]  ;;  %s3827_s22 = scalar_lea.hbm %s8052_s8, %s4091_s21  ;;  %s3828_s19 = sshll.u32 %s7884_s12, 4  ;;  %s3829_s19 = int_to_ptr.vmem [resolvable:$true] %s3828_s19 }
  0x31   : > { %443 = vmatpush.bf16.msra.mxu0 %v4070_v4  ;;  %4092 = vmatpush.bf16.msra.mxu1 %v4070_v4  ;;  %v4068_v9 = vld [vmem:[%s8046_s2 + $0x28] sm:$0xff]  ;;  %v5055_v13 = vld [vmem:[%s8045_s1 + $0x30] sm:$0xff]  ;;  %v4066_v14 = vld [vmem:[%s8046_s2 + $0x18] sm:$0xff]  ;;  %s3830_s24 = sshll.u32 %s3827_s22, 4  ;;  %s4788_s29 = scalar_lea.hbm %s8052_s8, 512  ;;  %s3831_s24 = int_to_ptr.hbm [resolvable:$true] %s3830_s24 }
  0x32   : > { %4093 = vmatpush.bf16.msra.mxu2 %v4070_v4  ;;  %v4065_v15 = vld [vmem:[%s8046_s2 + $0x10] sm:$0xff]  ;;  %v5069_v16 = vld [vmem:[%s8045_s1 + $0x58] sm:$0xff]  ;;  %v5079_v18 = vld [vmem:[%s8045_s1 + $0x48] sm:$0xff]  ;;  %s4782_s9 = sshra.s32 %s3831_s24, 4  ;;  %s4783_s9 = int_to_ptr.hbm [resolvable:$true] %s4782_s9 }
  0x33   : > { %v5074_v17 = vld [vmem:[%s8045_s1 + $0x50] sm:$0xff]  ;;  %v4064_v19 = vld [vmem:[%s8046_s2 + $0x8] sm:$0xff]  ;;  %v4063_v20 = vld [vmem:[%s8046_s2] sm:$0xff]  ;;  %p4789_p0 = scmp.lt.s32.totalorder %s4783_s9, %s8052_s8 }
  0x34   : > { %v327_v21 = vld [vmem:[%s4988_s20] sm:$0xff]  ;;  %v328_v22 = vld [vmem:[%s4988_s20 + $0x8] sm:$0xff]  ;;  %v5099_v27 = vld [vmem:[%s8045_s1 + $0x70] sm:$0xff] }
  0x35   : > { %444 = vmatpush.bf16.msra.mxu0 %v4069_v5  ;;  %4094 = vmatpush.bf16.msra.mxu1 %v4069_v5  ;;  %v347_v23 = vld [vmem:[%s4988_s20 + $0xa0] sm:$0xff]  ;;  %v348_v24 = vld [vmem:[%s4988_s20 + $0xa8] sm:$0xff]  ;;  %v359_v29 = vpack.c.bf16 %v328_v22, %v327_v21  ;;  %v5127_v35 = vld [vmem:[%s8045_s1 + $0x78] sm:$0xff] }
  0x36   : > { %4095 = vmatpush.bf16.msra.mxu2 %v4069_v5  ;;  %v351_v25 = vld [vmem:[%s4988_s20 + $0xc0] sm:$0xff]  ;;  %v352_v26 = vld [vmem:[%s4988_s20 + $0xc8] sm:$0xff]  ;;  %v369_v31 = vpack.c.bf16 %v348_v24, %v347_v23  ;;  %v329_v36 = vld [vmem:[%s4988_s20 + $0x10] sm:$0xff] }
  0x37   : > { %690 = vperm.xlu2 %4173, %v5021_v6   ;;  %v5104_v28 = vld [vmem:[%s8045_s1 + $0x68] sm:$0xff]  ;;  %v5109_v30 = vld [vmem:[%s8045_s1 + $0x60] sm:$0xff]  ;;  %v371_v32 = vpack.c.bf16 %v352_v26, %v351_v25  ;;  %v330_v37 = vld [vmem:[%s4988_s20 + $0x18] sm:$0xff] }
  0x38   : > { %680 = vperm.xlu1 %4172, %v5026_v7   ;;  %670 = vperm.xlu0 %4171, %v5031_v8   ;;  %v5117_v33 = vld [vmem:[%s8045_s1 + $0x88] sm:$0xff]  ;;  %v5122_v34 = vld [vmem:[%s8045_s1 + $0x80] sm:$0xff]  ;;  %v349_v38 = vld [vmem:[%s4988_s20 + $0xb0] sm:$0xff]  ;;  %v360_v44 = vpack.c.bf16 %v330_v37, %v329_v36 }
  0x39   : > { %445 = vmatpush.bf16.msra.mxu0 %v4068_v9  ;;  %4096 = vmatpush.bf16.msra.mxu1 %v4068_v9  ;;  %v350_v39 = vld [vmem:[%s4988_s20 + $0xb8] sm:$0xff]  ;;  %v353_v40 = vld [vmem:[%s4988_s20 + $0xd0] sm:$0xff]  ;;  %v5141_v42 = vld [vmem:[%s8045_s1 + $0xa0] sm:$0xff] }
  0x3a   : > { %4097 = vmatpush.bf16.msra.mxu2 %v4068_v9  ;;  %v354_v41 = vld [vmem:[%s4988_s20 + $0xd8] sm:$0xff]  ;;  %v5151_v45 = vld [vmem:[%s8045_s1 + $0x90] sm:$0xff]  ;;  %v370_v46 = vpack.c.bf16 %v350_v39, %v349_v38  ;;  %v5169_v50 = vld [vmem:[%s8045_s1 + $0xa8] sm:$0xff] }
  0x3b   : > { %v5146_v43 = vld [vmem:[%s8045_s1 + $0x98] sm:$0xff]  ;;  %v372_v47 = vpack.c.bf16 %v354_v41, %v353_v40  ;;  %v5164_v49 = vld [vmem:[%s8045_s1 + $0xb0] sm:$0xff]  ;;  %v331_v51 = vld [vmem:[%s4988_s20 + $0x20] sm:$0xff] }
  0x3c   : > { %v5159_v48 = vld [vmem:[%s8045_s1 + $0xb8] sm:$0xff]  ;;  %v332_v52 = vld [vmem:[%s4988_s20 + $0x28] sm:$0xff]  ;;  %v355_v53 = vld [vmem:[%s4988_s20 + $0xe0] sm:$0xff] }
  0x3d   : > { %446 = vmatpush.bf16.msra.mxu0 %v4067_v10  ;;  %4098 = vmatpush.bf16.msra.mxu1 %v4067_v10  ;;  %v356_v54 = vld [vmem:[%s4988_s20 + $0xe8] sm:$0xff]  ;;  %v5181_v55 = vld [vmem:[%s8045_s1 + $0xd0] sm:$0xff]  ;;  %v361_v57 = vpack.c.bf16 %v332_v52, %v331_v51  ;;  %v5191_v58 = vld [vmem:[%s8045_s1 + $0xc0] sm:$0xff] }
  0x3e   : > { %4099 = vmatpush.bf16.msra.mxu2 %v4067_v10  ;;  %v5186_v56 = vld [vmem:[%s8045_s1 + $0xc8] sm:$0xff]  ;;  %v373_v59 = vpack.c.bf16 %v356_v54, %v355_v53  ;;  %v5204_v61 = vld [vmem:[%s8045_s1 + $0xe0] sm:$0xff]  ;;  %v5209_v62 = vld [vmem:[%s8045_s1 + $0xd8] sm:$0xff] }
  0x3f   : > { %705 = vperm.xlu2 %4173, %v5045_v11   ;;  %v5199_v60 = vld [vmem:[%s8045_s1 + $0xe8] sm:$0xff]  ;;  %v333_v63 = vld [vmem:[%s4988_s20 + $0x30] sm:$0xff]  ;;  %v334_v0 = vld [vmem:[%s4988_s20 + $0x38] sm:$0xff] }
  0x40   : > { %700 = vperm.xlu1 %4172, %v5050_v12   ;;  %695 = vperm.xlu0 %4171, %v5055_v13   ;;  %v357_v4 = vld [vmem:[%s4988_s20 + $0xf0] sm:$0xff]  ;;  %v358_v5 = vld [vmem:[%s4988_s20 + $0xf8] sm:$0xff]  ;;  %v335_v21 = vld [vmem:[%s4988_s20 + $0x40] sm:$0xff] }
  0x41   : > { %447 = vmatpush.bf16.msra.mxu0 %v4066_v14  ;;  %4100 = vmatpush.bf16.msra.mxu1 %v4066_v14  ;;  %v5221_v9 = vld [vmem:[%s8045_s1 + $0xf8] sm:$0xff]  ;;  %v5226_v10 = vld [vmem:[%s8045_s1 + $0xf0] sm:$0xff]  ;;  %v336_v22 = vld [vmem:[%s4988_s20 + $0x48] sm:$0xff] }
  0x42   : > { %4101 = vmatpush.bf16.msra.mxu2 %v4066_v14  ;;  %v362_v14 = vpack.c.bf16 %v334_v0, %v333_v63  ;;  %v363_v23 = vpack.c.bf16 %v336_v22, %v335_v21  ;;  %v337_v26 = vld [vmem:[%s4988_s20 + $0x50] sm:$0xff]  ;;  %v339_v41 = vld [vmem:[%s4988_s20 + $0x60] sm:$0xff]  ;;  %v342_v63 = vld [vmem:[%s4988_s20 + $0x78] sm:$0xff] }
  0x43   : > { %v343_v22 = vld [vmem:[%s4988_s20 + $0x80] sm:$0xff] }
  0x45   : > { %448 = vmatpush.bf16.msra.mxu0 %v4065_v15  ;;  %4102 = vmatpush.bf16.msra.mxu1 %v4065_v15 }
  0x46   : > { %4103 = vmatpush.bf16.msra.mxu2 %v4065_v15  ;;  %v374_v15 = vpack.c.bf16 %v358_v5, %v357_v4 }
  0x47   : > { %720 = vperm.xlu2 %4173, %v5069_v16  }
  0x48   : > { %715 = vperm.xlu1 %4172, %v5074_v17   ;;  %710 = vperm.xlu0 %4171, %v5079_v18  }
  0x49   : > { %449 = vmatpush.bf16.msra.mxu0 %v4064_v19  ;;  %4104 = vmatpush.bf16.msra.mxu1 %v4064_v19 }
  0x4a   : > { %4105 = vmatpush.bf16.msra.mxu2 %v4064_v19  ;;  %v4839_v19 = vmov 1  }
  0x4d   : > { %450 = vmatpush.bf16.msra.mxu0 %v4063_v20  ;;  %4106 = vmatpush.bf16.msra.mxu1 %v4063_v20 }
  0x4e   : > { %4107 = vmatpush.bf16.msra.mxu2 %v4063_v20 }
  0x4f   : > { %735 = vperm.xlu2 %4173, %v5099_v27  }
  0x50   : > { %730 = vperm.xlu1 %4172, %v5104_v28   ;;  %725 = vperm.xlu0 %4171, %v5109_v30  }
  0x51   : > { %451 = vmatmul.bf16.vlgmr.msra.gmra.mxu0 %v359_v29  ;;  %501 = vmatmul.bf16.vlgmr.msra.gmra.mxu1 %v369_v31  ;;  %v338_v29 = vld [vmem:[%s4988_s20 + $0x58] sm:$0xff] }
  0x52   : > { %511 = vmatmul.bf16.vlgmr.msra.gmra.mxu2 %v371_v32  ;;  %v364_v31 = vpack.c.bf16 %v338_v29, %v337_v26 }
  0x57   : > { %750 = vperm.xlu2 %4173, %v5117_v33  }
  0x58   : > { %745 = vperm.xlu1 %4172, %v5122_v34   ;;  %740 = vperm.xlu0 %4171, %v5127_v35  }
  0x5f   : > { %765 = vperm.xlu2 %4173, %v5141_v42  }
  0x60   : > { %760 = vperm.xlu1 %4172, %v5146_v43   ;;  %755 = vperm.xlu0 %4171, %v5151_v45  }
  0x61   : > { %456 = vmatmul.bf16.gmra.mxu0 %v360_v44  ;;  %506 = vmatmul.bf16.gmra.mxu1 %v370_v46  ;;  %v340_v44 = vld [vmem:[%s4988_s20 + $0x68] sm:$0xff] }
  0x62   : > { %516 = vmatmul.bf16.gmra.mxu2 %v372_v47  ;;  %v365_v46 = vpack.c.bf16 %v340_v44, %v339_v41  ;;  %v4840_v44 = vmov 2  }
  0x67   : > { %780 = vperm.xlu2 %4173, %v5159_v48  }
  0x68   : > { %775 = vperm.xlu1 %4172, %v5164_v49   ;;  %770 = vperm.xlu0 %4171, %v5169_v50  }
  0x6f   : > { %795 = vperm.xlu2 %4173, %v5181_v55  }
  0x70   : > { %790 = vperm.xlu1 %4172, %v5186_v56   ;;  %785 = vperm.xlu0 %4171, %v5191_v58  }
  0x71   : > { %461 = vmatmul.bf16.gmra.mxu0 %v361_v57 }
  0x72   : > { %521 = vmatmul.bf16.gmra.mxu2 %v373_v59  ;;  %v341_v59 = vld [vmem:[%s4988_s20 + $0x70] sm:$0xff] }
  0x73   : > { %v366_v0 = vpack.c.bf16 %v342_v63, %v341_v59 }
  0x77   : > { %810 = vperm.xlu2 %4173, %v5199_v60  }
  0x78   : > { %805 = vperm.xlu1 %4172, %v5204_v61   ;;  %800 = vperm.xlu0 %4171, %v5209_v62  }
  0x7f   : > { %4174 = vset.pattern.permute.xlu2 %v4839_v19 }
  0x80   : > { %820 = vperm.xlu1 %4172, %v5221_v9   ;;  %815 = vperm.xlu0 %4171, %v5226_v10  }
  0x81   : > { %856 = vperm.xlu2 %4174, %v5007_v3   ;;  %466 = vmatmul.bf16.gmra.mxu0 %v362_v14 }
  0x82   : > { %526 = vmatmul.bf16.gmra.mxu2 %v374_v15 }
  0x88   : > { %4176 = vset.pattern.permute.xlu1 %v4839_v19  ;;  %4175 = vset.pattern.permute.xlu0 %v4839_v19 }
  0x89   : > { %864 = vperm.xlu1 %4176, %v5002_v2   ;;  %868 = vperm.xlu2 %4174, %v5026_v7   ;;  %v5234_v20 = vpop.permute.xlu2 %685 }
  0x8a   : > { %860 = vperm.xlu0 %4175, %v5031_v8   ;;  %8195 = vst [vmem:[#allocation10_spill] sm:$0xff] %v5234_v20 }
  0x91   : > { %872 = vperm.xlu1 %4176, %v4997_v1   ;;  %876 = vperm.xlu2 %4174, %v5021_v6   ;;  %v5241_v24 = vpop.permute.xlu2 %690 }
  0x92   : > { %880 = vperm.xlu0 %4175, %v5055_v13   ;;  %8196 = vst [vmem:[#allocation11_spill] sm:$0xff] %v5241_v24  ;;  %471 = vmatmul.bf16.gmra.mxu0 %v363_v23  ;;  %v344_v23 = vld [vmem:[%s4988_s20 + $0x88] sm:$0xff] }
  0x93   : > { %v367_v26 = vpack.c.bf16 %v344_v23, %v343_v22  ;;  %v346_v22 = vld [vmem:[%s4988_s20 + $0x98] sm:$0xff] }
  0x99   : > { %884 = vperm.xlu1 %4176, %v5050_v12   ;;  %888 = vperm.xlu2 %4174, %v5045_v11   ;;  %v5246_v25 = vpop.permute.xlu2 %705 }
  0x9a   : > { %892 = vperm.xlu0 %4175, %v5079_v18   ;;  %8197 = vst [vmem:[#allocation12_spill] sm:$0xff] %v5246_v25  ;;  %v4841_v25 = vmov 3  }
  0xa1   : > { %896 = vperm.xlu1 %4176, %v5074_v17   ;;  %900 = vperm.xlu2 %4174, %v5069_v16   ;;  %v5253_v32 = vpop.permute.xlu2 %720 }
  0xa2   : > { %904 = vperm.xlu0 %4175, %v5109_v30   ;;  %8198 = vst [vmem:[#allocation13_spill] sm:$0xff] %v5253_v32  ;;  %v5255_v36 = vpop.permute.xlu1 %675  ;;  %476 = vmatmul.bf16.gmra.mxu0 %v364_v31  ;;  %v5257_v37 = vpop.permute.xlu0 %665 }
  0xa3   : > { %8199 = vst [vmem:[#allocation14_spill] sm:$0xff] %v5255_v36 }
  0xa4   : > { %8200 = vst [vmem:[#allocation15_spill] sm:$0xff] %v5257_v37 }
  0xa9   : > { %908 = vperm.xlu1 %4176, %v5104_v28   ;;  %912 = vperm.xlu2 %4174, %v5099_v27   ;;  %v5262_v38 = vpop.permute.xlu2 %735 }
  0xaa   : > { %916 = vperm.xlu0 %4175, %v5127_v35   ;;  %8201 = vst [vmem:[#allocation16_spill] sm:$0xff] %v5262_v38  ;;  %v5264_v39 = vpop.permute.xlu1 %680  ;;  %v5266_v40 = vpop.permute.xlu0 %670 }
  0xab   : > { %8202 = vst [vmem:[#allocation17_spill] sm:$0xff] %v5264_v39 }
  0xac   : > { %8203 = vst [vmem:[#allocation18_spill] sm:$0xff] %v5266_v40 }
  0xb1   : > { %920 = vperm.xlu1 %4176, %v5122_v34   ;;  %924 = vperm.xlu2 %4174, %v5117_v33   ;;  %v5273_v47 = vpop.permute.xlu2 %750 }
  0xb2   : > { %928 = vperm.xlu0 %4175, %v5151_v45   ;;  %8204 = vst [vmem:[#allocation19_spill] sm:$0xff] %v5273_v47  ;;  %v5275_v51 = vpop.permute.xlu1 %700  ;;  %481 = vmatmul.bf16.gmra.mxu0 %v365_v46  ;;  %v5277_v52 = vpop.permute.xlu0 %695 }
  0xb3   : > { %8205 = vst [vmem:[#allocation20_spill] sm:$0xff] %v5275_v51 }
  0xb4   : > { %8206 = vst [vmem:[#allocation21_spill] sm:$0xff] %v5277_v52 }
  0xb9   : > { %932 = vperm.xlu1 %4176, %v5146_v43   ;;  %936 = vperm.xlu2 %4174, %v5141_v42   ;;  %v5282_v53 = vpop.permute.xlu2 %765 }
  0xba   : > { %940 = vperm.xlu0 %4175, %v5169_v50   ;;  %8207 = vst [vmem:[#allocation22_spill] sm:$0xff] %v5282_v53  ;;  %v5284_v54 = vpop.permute.xlu1 %715  ;;  %v5286_v57 = vpop.permute.xlu0 %710 }
  0xbb   : > { %8208 = vst [vmem:[#allocation23_spill] sm:$0xff] %v5284_v54 }
  0xbc   : > { %8209 = vst [vmem:[#allocation24_spill] sm:$0xff] %v5286_v57 }
  0xc1   : > { %944 = vperm.xlu1 %4176, %v5164_v49   ;;  %948 = vperm.xlu2 %4174, %v5159_v48   ;;  %v5293_v4 = vpop.permute.xlu2 %780 }
  0xc2   : > { %952 = vperm.xlu0 %4175, %v5191_v58   ;;  %8210 = vst [vmem:[#allocation25_spill] sm:$0xff] %v5293_v4  ;;  %v5295_v5 = vpop.permute.xlu1 %730  ;;  %486 = vmatmul.bf16.gmra.mxu0 %v366_v0  ;;  %v5297_v14 = vpop.permute.xlu0 %725  ;;  %v345_v0 = vld [vmem:[%s4988_s20 + $0x90] sm:$0xff] }
  0xc3   : > { %8211 = vst [vmem:[#allocation26_spill] sm:$0xff] %v5295_v5  ;;  %v368_v23 = vpack.c.bf16 %v346_v22, %v345_v0 }
  0xc4   : > { %8212 = vst [vmem:[#allocation27_spill] sm:$0xff] %v5297_v14 }
  0xc9   : > { %956 = vperm.xlu1 %4176, %v5186_v56   ;;  %960 = vperm.xlu2 %4174, %v5181_v55   ;;  %v5302_v15 = vpop.permute.xlu2 %795 }
  0xca   : > { %964 = vperm.xlu0 %4175, %v5209_v62   ;;  %8213 = vst [vmem:[#allocation28_spill] sm:$0xff] %v5302_v15  ;;  %v5304_v19 = vpop.permute.xlu1 %745  ;;  %v5306_v21 = vpop.permute.xlu0 %740 }
  0xcb   : > { %8214 = vst [vmem:[#allocation29_spill] sm:$0xff] %v5304_v19 }
  0xcc   : > { %8215 = vst [vmem:[#allocation30_spill] sm:$0xff] %v5306_v21 }
  0xd1   : > { %968 = vperm.xlu1 %4176, %v5204_v61   ;;  %972 = vperm.xlu2 %4174, %v5199_v60   ;;  %v5313_v29 = vpop.permute.xlu2 %810 }
  0xd2   : > { %976 = vperm.xlu0 %4175, %v5226_v10   ;;  %8216 = vst [vmem:[#allocation31_spill] sm:$0xff] %v5313_v29  ;;  %v5315_v31 = vpop.permute.xlu1 %760  ;;  %491 = vmatmul.bf16.gmra.mxu0 %v367_v26  ;;  %v5317_v41 = vpop.permute.xlu0 %755 }
  0xd3   : > { %8217 = vst [vmem:[#allocation32_spill] sm:$0xff] %v5315_v31 }
  0xd4   : > { %8218 = vst [vmem:[#allocation33_spill] sm:$0xff] %v5317_v41 }
  0xd9   : > { %980 = vperm.xlu1 %4176, %v5221_v9   ;;  %4177 = vset.pattern.permute.xlu2 %v4840_v44 }
  0xda   : > { %4178 = vset.pattern.permute.xlu0 %v4840_v44  ;;  %v5320_v46 = vpop.permute.xlu1 %775  ;;  %1081 = vperm.xlu2 %4177, %v5007_v3   ;;  %v5324_v59 = vpop.permute.xlu0 %770 }
  0xdb   : > { %8219 = vst [vmem:[#allocation34_spill] sm:$0xff] %v5320_v46  ;;  %1085 = vperm.xlu0 %4178, %v5031_v8   ;;  %v5326_v63 = vpop.permute.xlu2 %856 }
  0xdc   : > { %8220 = vst [vmem:[#allocation35_spill] sm:$0xff] %v5324_v59 }
  0xe1   : > { %4179 = vset.pattern.permute.xlu1 %v4840_v44 }
  0xe2   : > { %1089 = vperm.xlu1 %4179, %v5002_v2   ;;  %v5331_v26 = vpop.permute.xlu1 %790  ;;  %496 = vmatmul.bf16.gmra.mxu0 %v368_v23  ;;  %v5334_v29 = vpop.permute.xlu0 %785 }
  0xe3   : > { %8221 = vst [vmem:[#allocation36_spill] sm:$0xff] %v5331_v26  ;;  %1093 = vperm.xlu2 %4177, %v5026_v7   ;;  %1105 = vperm.xlu0 %4178, %v5055_v13   ;;  %v5337_v15 = vpop.permute.xlu2 %868 }
  0xe4   : > { %8222 = vst [vmem:[#allocation37_spill] sm:$0xff] %v5334_v29 }
  0xe5   : > { %8223 = vst [vmem:[#allocation38_spill] sm:$0xff] %v5337_v15  ;;  %v5806_v15 = vpop.f32.mrf.mxu2 }
  0xea   : > { %1097 = vperm.xlu1 %4179, %v4997_v1   ;;  %v5340_v4 = vpop.permute.xlu1 %805  ;;  %v5343_v44 = vpop.permute.xlu0 %800 }
  0xeb   : > { %8224 = vst [vmem:[#allocation39_spill] sm:$0xff] %v5340_v4  ;;  %1101 = vperm.xlu2 %4177, %v5021_v6   ;;  %1117 = vperm.xlu0 %4178, %v5079_v18   ;;  %v5346_v0 = vpop.permute.xlu2 %876 }
  0xec   : > { %8225 = vst [vmem:[#allocation40_spill] sm:$0xff] %v5343_v44 }
  0xed   : > { %8226 = vst [vmem:[#allocation41_spill] sm:$0xff] %v5346_v0 }
  0xf2   : > { %1109 = vperm.xlu1 %4179, %v5050_v12   ;;  %v5349_v22 = vpop.permute.xlu1 %820  ;;  %v5352_v23 = vpop.permute.xlu0 %815 }
  0xf3   : > { %8227 = vst [vmem:[#allocation42_spill] sm:$0xff] %v5349_v22  ;;  %1113 = vperm.xlu2 %4177, %v5045_v11   ;;  %1129 = vperm.xlu0 %4178, %v5109_v30   ;;  %v5355_v26 = vpop.permute.xlu2 %888 }
  0xf4   : > { %8228 = vst [vmem:[#allocation43_spill] sm:$0xff] %v5352_v23 }
  0xf5   : > { %8229 = vst [vmem:[#allocation44_spill] sm:$0xff] %v5355_v26 }
  0xfa   : > { %1121 = vperm.xlu1 %4179, %v5074_v17  }
  0xfb   : > { %1125 = vperm.xlu2 %4177, %v5069_v16   ;;  %v5359_v4 = vpop.permute.xlu1 %864  ;;  %1141 = vperm.xlu0 %4178, %v5127_v35   ;;  %v5362_v44 = vpop.permute.xlu2 %900 }
  0xfc   : > { %8230 = vst [vmem:[#allocation45_spill] sm:$0xff] %v5359_v4  ;;  %v5364_v29 = vpop.permute.xlu0 %860 }
  0xfd   : > { %8231 = vst [vmem:[#allocation46_spill] sm:$0xff] %v5362_v44 }
 0x102   : > { %1133 = vperm.xlu1 %4179, %v5104_v28  }
 0x103   : > { %1137 = vperm.xlu2 %4177, %v5099_v27   ;;  %v5368_v23 = vpop.permute.xlu1 %872  ;;  %1153 = vperm.xlu0 %4178, %v5151_v45   ;;  %v5371_v22 = vpop.permute.xlu2 %912 }
 0x104   : > { %8232 = vst [vmem:[#allocation47_spill] sm:$0xff] %v5368_v23  ;;  %v5373_v46 = vpop.permute.xlu0 %880 }
 0x105   : > { %8233 = vst [vmem:[#allocation48_spill] sm:$0xff] %v5371_v22 }
 0x106   : > { %8234 = vst [vmem:[#allocation49_spill] sm:$0xff] %v5373_v46 }
 0x10a   : > { %1145 = vperm.xlu1 %4179, %v5122_v34  }
 0x10b   : > { %1149 = vperm.xlu2 %4177, %v5117_v33   ;;  %v5377_v59 = vpop.permute.xlu1 %884  ;;  %1165 = vperm.xlu0 %4178, %v5169_v50   ;;  %v5380_v53 = vpop.permute.xlu2 %924 }
 0x10c   : > { %8235 = vst [vmem:[#allocation50_spill] sm:$0xff] %v5377_v59  ;;  %v5382_v41 = vpop.permute.xlu0 %892 }
 0x10d   : > { %8236 = vst [vmem:[#allocation51_spill] sm:$0xff] %v5380_v53 }
 0x10e   : > { %8237 = vst [vmem:[#allocation52_spill] sm:$0xff] %v5382_v41 }
 0x112   : > { %1157 = vperm.xlu1 %4179, %v5146_v43  }
 0x113   : > { %1161 = vperm.xlu2 %4177, %v5141_v42   ;;  %v5386_v31 = vpop.permute.xlu1 %896  ;;  %1177 = vperm.xlu0 %4178, %v5191_v58   ;;  %v5389_v47 = vpop.permute.xlu2 %936 }
 0x114   : > { %8238 = vst [vmem:[#allocation53_spill] sm:$0xff] %v5386_v31  ;;  %v5391_v19 = vpop.permute.xlu0 %904 }
 0x115   : > { %8239 = vst [vmem:[#allocation54_spill] sm:$0xff] %v5389_v47 }
 0x116   : > { %8240 = vst [vmem:[#allocation55_spill] sm:$0xff] %v5391_v19 }
 0x11a   : > { %1169 = vperm.xlu1 %4179, %v5164_v49  }
 0x11b   : > { %1173 = vperm.xlu2 %4177, %v5159_v48   ;;  %v5395_v21 = vpop.permute.xlu1 %908  ;;  %1189 = vperm.xlu0 %4178, %v5209_v62   ;;  %v5398_v38 = vpop.permute.xlu2 %948 }
 0x11c   : > { %8241 = vst [vmem:[#allocation56_spill] sm:$0xff] %v5395_v21  ;;  %v5400_v14 = vpop.permute.xlu0 %916 }
 0x11d   : > { %8242 = vst [vmem:[#allocation57_spill] sm:$0xff] %v5398_v38 }
 0x11e   : > { %8243 = vst [vmem:[#allocation58_spill] sm:$0xff] %v5400_v14 }
 0x122   : > { %1181 = vperm.xlu1 %4179, %v5186_v56  }
 0x123   : > { %1185 = vperm.xlu2 %4177, %v5181_v55   ;;  %v5404_v5 = vpop.permute.xlu1 %920  ;;  %1201 = vperm.xlu0 %4178, %v5226_v10   ;;  %v5407_v32 = vpop.permute.xlu2 %960 }
 0x124   : > { %8244 = vst [vmem:[#allocation59_spill] sm:$0xff] %v5404_v5  ;;  %v5409_v54 = vpop.permute.xlu0 %928 }
 0x125   : > { %8245 = vst [vmem:[#allocation60_spill] sm:$0xff] %v5407_v32 }
 0x126   : > { %8246 = vst [vmem:[#allocation61_spill] sm:$0xff] %v5409_v54 }
 0x12a   : > { %1193 = vperm.xlu1 %4179, %v5204_v61  }
 0x12b   : > { %1197 = vperm.xlu2 %4177, %v5199_v60   ;;  %v5413_v57 = vpop.permute.xlu1 %932  ;;  %4181 = vset.pattern.permute.xlu0 %v4841_v25  ;;  %v5415_v38 = vpop.permute.xlu2 %972 }
 0x12c   : > { %8247 = vst [vmem:[#allocation62_spill] sm:$0xff] %v5413_v57  ;;  %v5417_v52 = vpop.permute.xlu0 %940  ;;  %1245 = vperm.xlu0 %4181, %v5031_v8  }
 0x12d   : > { %8248 = vst [vmem:[#allocation63_spill] sm:$0xff] %v5415_v38 }
 0x12e   : > { %8249 = vst [vmem:[#allocation64_spill] sm:$0xff] %v5417_v52 }
 0x132   : > { %1205 = vperm.xlu1 %4179, %v5221_v9  }
 0x133   : > { %4180 = vset.pattern.permute.xlu2 %v4841_v25  ;;  %v5421_v32 = vpop.permute.xlu1 %944 }
 0x134   : > { %8250 = vst [vmem:[#allocation65_spill] sm:$0xff] %v5421_v32  ;;  %1241 = vperm.xlu2 %4180, %v5007_v3   ;;  %v5424_v51 = vpop.permute.xlu0 %952  ;;  %1265 = vperm.xlu0 %4181, %v5055_v13   ;;  %v5427_v47 = vpop.permute.xlu2 %1081 }
 0x135   : > { %8251 = vst [vmem:[#allocation66_spill] sm:$0xff] %v5424_v51 }
 0x13a   : > { %4182 = vset.pattern.permute.xlu1 %v4841_v25 }
 0x13b   : > { %1249 = vperm.xlu1 %4182, %v5002_v2   ;;  %v5430_v38 = vpop.permute.xlu1 %956 }
 0x13c   : > { %8252 = vst [vmem:[#allocation67_spill] sm:$0xff] %v5430_v38  ;;  %1253 = vperm.xlu2 %4180, %v5026_v7   ;;  %v5433_v52 = vpop.permute.xlu0 %964  ;;  %1277 = vperm.xlu0 %4181, %v5079_v18  }
 0x13d   : > { %8253 = vst [vmem:[#allocation68_spill] sm:$0xff] %v5433_v52  ;;  %v5436_v32 = vpop.permute.xlu2 %1093 }
 0x143   : > { %1257 = vperm.xlu1 %4182, %v4997_v1   ;;  %v5439_v51 = vpop.permute.xlu1 %968 }
 0x144   : > { %8254 = vst [vmem:[#allocation69_spill] sm:$0xff] %v5439_v51  ;;  %1261 = vperm.xlu2 %4180, %v5021_v6   ;;  %v5442_v20 = vpop.permute.xlu0 %976  ;;  %1289 = vperm.xlu0 %4181, %v5109_v30  }
 0x145   : > { %8255 = vst [vmem:[#allocation70_spill] sm:$0xff] %v5442_v20  ;;  %v5445_v25 = vpop.permute.xlu2 %1101 }
 0x14b   : > { %1269 = vperm.xlu1 %4182, %v5050_v12   ;;  %v5448_v38 = vpop.permute.xlu1 %980 }
 0x14c   : > { %8256 = vst [vmem:[#allocation71_spill] sm:$0xff] %v5448_v38  ;;  %1273 = vperm.xlu2 %4180, %v5045_v11   ;;  %1301 = vperm.xlu0 %4181, %v5127_v35  }
 0x14d   : > { %v5452_v52 = vpop.permute.xlu2 %1113  ;;  %v5454_v24 = vpop.permute.xlu0 %1085 }
 0x14e   : > { %8257 = vst [vmem:[#allocation72_spill] sm:$0xff] %v5452_v52 }
 0x153   : > { %1281 = vperm.xlu1 %4182, %v5074_v17  }
 0x154   : > { %1285 = vperm.xlu2 %4180, %v5069_v16   ;;  %v5458_v20 = vpop.permute.xlu1 %1089  ;;  %1313 = vperm.xlu0 %4181, %v5151_v45  }
 0x155   : > { %v5461_v51 = vpop.permute.xlu2 %1125  ;;  %v5463_v54 = vpop.permute.xlu0 %1105 }
 0x156   : > { %8258 = vst [vmem:[#allocation73_spill] sm:$0xff] %v5461_v51 }
 0x15b   : > { %1293 = vperm.xlu1 %4182, %v5104_v28  }
 0x15c   : > { %1297 = vperm.xlu2 %4180, %v5099_v27   ;;  %v5467_v38 = vpop.permute.xlu1 %1097  ;;  %1325 = vperm.xlu0 %4181, %v5169_v50  }
 0x15d   : > { %v5470_v57 = vpop.permute.xlu2 %1137  ;;  %v5472_v39 = vpop.permute.xlu0 %1117 }
 0x15e   : > { %8259 = vst [vmem:[#allocation74_spill] sm:$0xff] %v5470_v57 }
 0x15f   : > { %8260 = vst [vmem:[#allocation75_spill] sm:$0xff] %v5472_v39 }
 0x163   : > { %1305 = vperm.xlu1 %4182, %v5122_v34  }
 0x164   : > { %1309 = vperm.xlu2 %4180, %v5117_v33   ;;  %v5476_v36 = vpop.permute.xlu1 %1109  ;;  %1337 = vperm.xlu0 %4181, %v5191_v58  }
 0x165   : > { %v5479_v5 = vpop.permute.xlu2 %1149  ;;  %v5481_v53 = vpop.permute.xlu0 %1129 }
 0x166   : > { %8261 = vst [vmem:[#allocation76_spill] sm:$0xff] %v5479_v5 }
 0x167   : > { %8262 = vst [vmem:[#allocation77_spill] sm:$0xff] %v5481_v53 }
 0x16b   : > { %1317 = vperm.xlu1 %4182, %v5146_v43  }
 0x16c   : > { %1321 = vperm.xlu2 %4180, %v5141_v42   ;;  %v5485_v40 = vpop.permute.xlu1 %1121  ;;  %1349 = vperm.xlu0 %4181, %v5209_v62  }
 0x16d   : > { %8263 = vst [vmem:[#allocation78_spill] sm:$0xff] %v5485_v40  ;;  %v5488_v37 = vpop.permute.xlu2 %1161  ;;  %v5490_v22 = vpop.permute.xlu0 %1141 }
 0x16e   : > { %8264 = vst [vmem:[#allocation79_spill] sm:$0xff] %v5488_v37  ;;  %v4842_v37 = vmov 5  }
 0x16f   : > { %8265 = vst [vmem:[#allocation80_spill] sm:$0xff] %v5490_v22 }
 0x173   : > { %1329 = vperm.xlu1 %4182, %v5164_v49  }
 0x174   : > { %1333 = vperm.xlu2 %4180, %v5159_v48   ;;  %v5494_v14 = vpop.permute.xlu1 %1133  ;;  %1361 = vperm.xlu0 %4181, %v5226_v10  }
 0x175   : > { %8266 = vst [vmem:[#allocation81_spill] sm:$0xff] %v5494_v14  ;;  %v5497_v21 = vpop.permute.xlu2 %1173  ;;  %v5499_v19 = vpop.permute.xlu0 %1153 }
 0x176   : > { %8267 = vst [vmem:[#allocation82_spill] sm:$0xff] %v5497_v21 }
 0x177   : > { %8268 = vst [vmem:[#allocation83_spill] sm:$0xff] %v5499_v19 }
 0x17b   : > { %1341 = vperm.xlu1 %4182, %v5186_v56  }
 0x17c   : > { %1345 = vperm.xlu2 %4180, %v5181_v55   ;;  %v5503_v5 = vpop.permute.xlu1 %1145  ;;  %4184 = vset.pattern.permute.xlu0 %v4842_v37 }
 0x17d   : > { %8269 = vst [vmem:[#allocation84_spill] sm:$0xff] %v5503_v5  ;;  %v5505_v31 = vpop.permute.xlu2 %1185  ;;  %1405 = vperm.xlu0 %4184, %v5031_v8   ;;  %v5508_v44 = vpop.permute.xlu0 %1165 }
 0x17e   : > { %8270 = vst [vmem:[#allocation85_spill] sm:$0xff] %v5505_v31 }
 0x17f   : > { %8271 = vst [vmem:[#allocation86_spill] sm:$0xff] %v5508_v44 }
 0x183   : > { %1353 = vperm.xlu1 %4182, %v5204_v61  }
 0x184   : > { %1357 = vperm.xlu2 %4180, %v5199_v60   ;;  %v5512_v21 = vpop.permute.xlu1 %1157 }
 0x185   : > { %8272 = vst [vmem:[#allocation87_spill] sm:$0xff] %v5512_v21  ;;  %v5514_v19 = vpop.permute.xlu2 %1197  ;;  %1425 = vperm.xlu0 %4184, %v5055_v13   ;;  %v5517_v57 = vpop.permute.xlu0 %1177 }
 0x186   : > { %8273 = vst [vmem:[#allocation88_spill] sm:$0xff] %v5514_v19 }
 0x187   : > { %8274 = vst [vmem:[#allocation89_spill] sm:$0xff] %v5517_v57 }
 0x18b   : > { %1365 = vperm.xlu1 %4182, %v5221_v9  }
 0x18c   : > { %4183 = vset.pattern.permute.xlu2 %v4842_v37  ;;  %v5520_v31 = vpop.permute.xlu1 %1169 }
 0x18d   : > { %8275 = vst [vmem:[#allocation90_spill] sm:$0xff] %v5520_v31  ;;  %1401 = vperm.xlu2 %4183, %v5007_v3   ;;  %1437 = vperm.xlu0 %4184, %v5079_v18   ;;  %v5524_v44 = vpop.permute.xlu0 %1189 }
 0x18e   : > { %8276 = vst [vmem:[#allocation91_spill] sm:$0xff] %v5524_v44  ;;  %v5526_v5 = vpop.permute.xlu2 %1241 }
 0x193   : > { %4185 = vset.pattern.permute.xlu1 %v4842_v37 }
 0x194   : > { %1409 = vperm.xlu1 %4185, %v5002_v2   ;;  %v5529_v19 = vpop.permute.xlu1 %1181 }
 0x195   : > { %8277 = vst [vmem:[#allocation92_spill] sm:$0xff] %v5529_v19  ;;  %1413 = vperm.xlu2 %4183, %v5026_v7   ;;  %1449 = vperm.xlu0 %4184, %v5109_v30   ;;  %v5533_v57 = vpop.permute.xlu0 %1201 }
 0x196   : > { %8278 = vst [vmem:[#allocation93_spill] sm:$0xff] %v5533_v57  ;;  %v5535_v31 = vpop.permute.xlu2 %1253 }
 0x197   : > { %8279 = vst [vmem:[#allocation94_spill] sm:$0xff] %v5535_v31 }
 0x19c   : > { %1417 = vperm.xlu1 %4185, %v4997_v1   ;;  %v5538_v21 = vpop.permute.xlu1 %1193 }
 0x19d   : > { %8280 = vst [vmem:[#allocation95_spill] sm:$0xff] %v5538_v21  ;;  %1421 = vperm.xlu2 %4183, %v5021_v6   ;;  %1461 = vperm.xlu0 %4184, %v5127_v35  }
 0x19e   : > { %v5542_v37 = vpop.permute.xlu2 %1261  ;;  %v5544_v44 = vpop.permute.xlu0 %1245 }
 0x19f   : > { %8281 = vst [vmem:[#allocation96_spill] sm:$0xff] %v5542_v37 }
 0x1a4   : > { %1429 = vperm.xlu1 %4185, %v5050_v12   ;;  %v5547_v19 = vpop.permute.xlu1 %1205 }
 0x1a5   : > { %8282 = vst [vmem:[#allocation97_spill] sm:$0xff] %v5547_v19  ;;  %1433 = vperm.xlu2 %4183, %v5045_v11   ;;  %1473 = vperm.xlu0 %4184, %v5151_v45  }
 0x1a6   : > { %v5551_v57 = vpop.permute.xlu2 %1273  ;;  %v5553_v26 = vpop.permute.xlu0 %1265 }
 0x1a7   : > { %8283 = vst [vmem:[#allocation98_spill] sm:$0xff] %v5551_v57 }
 0x1a8   : > { %8284 = vst [vmem:[#allocation99_spill] sm:$0xff] %v5553_v26 }
 0x1ac   : > { %1441 = vperm.xlu1 %4185, %v5074_v17  }
 0x1ad   : > { %1445 = vperm.xlu2 %4183, %v5069_v16   ;;  %v5557_v21 = vpop.permute.xlu1 %1249  ;;  %1485 = vperm.xlu0 %4184, %v5169_v50  }
 0x1ae   : > { %8285 = vst [vmem:[#allocation100_spill] sm:$0xff] %v5557_v21  ;;  %v5560_v22 = vpop.permute.xlu2 %1285  ;;  %v5562_v41 = vpop.permute.xlu0 %1277 }
 0x1af   : > { %8286 = vst [vmem:[#allocation101_spill] sm:$0xff] %v5560_v22 }
 0x1b0   : > { %8287 = vst [vmem:[#allocation102_spill] sm:$0xff] %v5562_v41 }
 0x1b4   : > { %1453 = vperm.xlu1 %4185, %v5104_v28  }
 0x1b5   : > { %1457 = vperm.xlu2 %4183, %v5099_v27   ;;  %v5566_v19 = vpop.permute.xlu1 %1257  ;;  %1497 = vperm.xlu0 %4184, %v5191_v58  }
 0x1b6   : > { %8288 = vst [vmem:[#allocation103_spill] sm:$0xff] %v5566_v19  ;;  %v5569_v57 = vpop.permute.xlu2 %1297  ;;  %v5571_v26 = vpop.permute.xlu0 %1289 }
 0x1b7   : > { %8289 = vst [vmem:[#allocation104_spill] sm:$0xff] %v5569_v57 }
 0x1b8   : > { %8290 = vst [vmem:[#allocation105_spill] sm:$0xff] %v5571_v26 }
 0x1bc   : > { %1465 = vperm.xlu1 %4185, %v5122_v34  }
 0x1bd   : > { %1469 = vperm.xlu2 %4183, %v5117_v33   ;;  %v5575_v14 = vpop.permute.xlu1 %1269  ;;  %1509 = vperm.xlu0 %4184, %v5209_v62  }
 0x1be   : > { %8291 = vst [vmem:[#allocation106_spill] sm:$0xff] %v5575_v14  ;;  %v5578_v22 = vpop.permute.xlu2 %1309  ;;  %v5580_v41 = vpop.permute.xlu0 %1301 }
 0x1bf   : > { %8292 = vst [vmem:[#allocation107_spill] sm:$0xff] %v5578_v22  ;;  %v4843_v22 = vmov 6  }
 0x1c0   : > { %8293 = vst [vmem:[#allocation108_spill] sm:$0xff] %v5580_v41 }
 0x1c4   : > { %1477 = vperm.xlu1 %4185, %v5146_v43  }
 0x1c5   : > { %1481 = vperm.xlu2 %4183, %v5141_v42   ;;  %v5584_v53 = vpop.permute.xlu1 %1281  ;;  %1521 = vperm.xlu0 %4184, %v5226_v10  }
 0x1c6   : > { %8294 = vst [vmem:[#allocation109_spill] sm:$0xff] %v5584_v53  ;;  %v5587_v57 = vpop.permute.xlu2 %1321  ;;  %v5589_v26 = vpop.permute.xlu0 %1313 }
 0x1c7   : > { %8295 = vst [vmem:[#allocation110_spill] sm:$0xff] %v5587_v57 }
 0x1c8   : > { %8296 = vst [vmem:[#allocation111_spill] sm:$0xff] %v5589_v26 }
 0x1cc   : > { %1489 = vperm.xlu1 %4185, %v5164_v49  }
 0x1cd   : > { %1493 = vperm.xlu2 %4183, %v5159_v48   ;;  %v5593_v14 = vpop.permute.xlu1 %1293  ;;  %4187 = vset.pattern.permute.xlu0 %v4843_v22 }
 0x1ce   : > { %8297 = vst [vmem:[#allocation112_spill] sm:$0xff] %v5593_v14  ;;  %v5595_v41 = vpop.permute.xlu2 %1333  ;;  %1565 = vperm.xlu0 %4187, %v5031_v8   ;;  %v5598_v59 = vpop.permute.xlu0 %1325 }
 0x1cf   : > { %8298 = vst [vmem:[#allocation113_spill] sm:$0xff] %v5595_v41 }
 0x1d0   : > { %8299 = vst [vmem:[#allocation114_spill] sm:$0xff] %v5598_v59 }
 0x1d4   : > { %1501 = vperm.xlu1 %4185, %v5186_v56  }
 0x1d5   : > { %1505 = vperm.xlu2 %4183, %v5181_v55   ;;  %v5602_v57 = vpop.permute.xlu1 %1305 }
 0x1d6   : > { %8300 = vst [vmem:[#allocation115_spill] sm:$0xff] %v5602_v57  ;;  %v5604_v26 = vpop.permute.xlu2 %1345  ;;  %1585 = vperm.xlu0 %4187, %v5055_v13   ;;  %v5607_v53 = vpop.permute.xlu0 %1337 }
 0x1d7   : > { %8301 = vst [vmem:[#allocation116_spill] sm:$0xff] %v5604_v26 }
 0x1d8   : > { %8302 = vst [vmem:[#allocation117_spill] sm:$0xff] %v5607_v53 }
 0x1dc   : > { %1513 = vperm.xlu1 %4185, %v5204_v61  }
 0x1dd   : > { %1517 = vperm.xlu2 %4183, %v5199_v60   ;;  %v5611_v41 = vpop.permute.xlu1 %1317 }
 0x1de   : > { %8303 = vst [vmem:[#allocation118_spill] sm:$0xff] %v5611_v41  ;;  %v5613_v14 = vpop.permute.xlu2 %1357  ;;  %1597 = vperm.xlu0 %4187, %v5079_v18   ;;  %v5616_v59 = vpop.permute.xlu0 %1349 }
 0x1df   : > { %8304 = vst [vmem:[#allocation119_spill] sm:$0xff] %v5613_v14 }
 0x1e0   : > { %8305 = vst [vmem:[#allocation120_spill] sm:$0xff] %v5616_v59 }
 0x1e4   : > { %1525 = vperm.xlu1 %4185, %v5221_v9  }
 0x1e5   : > { %4186 = vset.pattern.permute.xlu2 %v4843_v22  ;;  %v5619_v26 = vpop.permute.xlu1 %1329 }
 0x1e6   : > { %8306 = vst [vmem:[#allocation121_spill] sm:$0xff] %v5619_v26  ;;  %1561 = vperm.xlu2 %4186, %v5007_v3   ;;  %1609 = vperm.xlu0 %4187, %v5109_v30   ;;  %v5623_v53 = vpop.permute.xlu0 %1361 }
 0x1e7   : > { %8307 = vst [vmem:[#allocation122_spill] sm:$0xff] %v5623_v53  ;;  %v5625_v57 = vpop.permute.xlu2 %1401 }
 0x1ec   : > { %4188 = vset.pattern.permute.xlu1 %v4843_v22 }
 0x1ed   : > { %1569 = vperm.xlu1 %4188, %v5002_v2   ;;  %v5628_v14 = vpop.permute.xlu1 %1341 }
 0x1ee   : > { %8308 = vst [vmem:[#allocation123_spill] sm:$0xff] %v5628_v14  ;;  %1573 = vperm.xlu2 %4186, %v5026_v7   ;;  %1621 = vperm.xlu0 %4187, %v5127_v35  }
 0x1ef   : > { %v5632_v59 = vpop.permute.xlu2 %1413  ;;  %v5634_v26 = vpop.permute.xlu0 %1405 }
 0x1f0   : > { %8309 = vst [vmem:[#allocation124_spill] sm:$0xff] %v5632_v59 }
 0x1f5   : > { %1577 = vperm.xlu1 %4188, %v4997_v1   ;;  %v5637_v41 = vpop.permute.xlu1 %1353 }
 0x1f6   : > { %8310 = vst [vmem:[#allocation125_spill] sm:$0xff] %v5637_v41  ;;  %1581 = vperm.xlu2 %4186, %v5021_v6   ;;  %1633 = vperm.xlu0 %4187, %v5151_v45  }
 0x1f7   : > { %v5641_v22 = vpop.permute.xlu2 %1421  ;;  %v5643_v2 = vpop.permute.xlu0 %1425 }
 0x1f8   : > { %8311 = vst [vmem:[#allocation126_spill] sm:$0xff] %v5641_v22 }
 0x1f9   : > { %8312 = vst [vmem:[#allocation127_spill] sm:$0xff] %v5643_v2 }
 0x1fd   : > { %1589 = vperm.xlu1 %4188, %v5050_v12   ;;  %v5646_v53 = vpop.permute.xlu1 %1365 }
 0x1fe   : > { %8313 = vst [vmem:[#allocation128_spill] sm:$0xff] %v5646_v53  ;;  %1593 = vperm.xlu2 %4186, %v5045_v11   ;;  %1645 = vperm.xlu0 %4187, %v5169_v50   ;;  %v5663_v53 = vpop.f32.mrf.mxu0 }
 0x1ff   : > { %v5650_v14 = vpop.permute.xlu2 %1433  ;;  %v5652_v1 = vpop.permute.xlu0 %1437 }
 0x200   : > { %8314 = vst [vmem:[#allocation129_spill] sm:$0xff] %v5650_v14 }
 0x201   : > { %8315 = vst [vmem:[#allocation130_spill] sm:$0xff] %v5652_v1 }
 0x205   : > { %1601 = vperm.xlu1 %4188, %v5074_v17  }
 0x206   : > { %1605 = vperm.xlu2 %4186, %v5069_v16   ;;  %v5656_v6 = vpop.permute.xlu1 %1409  ;;  %1657 = vperm.xlu0 %4187, %v5191_v58  }
 0x207   : > { %v5659_v41 = vpop.permute.xlu2 %1445  ;;  %v5661_v46 = vpop.permute.xlu0 %1449 }
 0x208   : > { %8316 = vst [vmem:[#allocation131_spill] sm:$0xff] %v5659_v41 }
 0x209   : > { %8317 = vst [vmem:[#allocation132_spill] sm:$0xff] %v5661_v46  ;;  %v5678_v46 = vpop.f32.mrf.mxu0 }
 0x20d   : > { %1613 = vperm.xlu1 %4188, %v5104_v28  }
 0x20e   : > { %1617 = vperm.xlu2 %4186, %v5099_v27   ;;  %v5667_v14 = vpop.permute.xlu1 %1417  ;;  %1669 = vperm.xlu0 %4187, %v5209_v62  }
 0x20f   : > { %8318 = vst [vmem:[#allocation133_spill] sm:$0xff] %v5667_v14  ;;  %v5670_v1 = vpop.permute.xlu2 %1457  ;;  %v5672_v37 = vpop.permute.xlu0 %1461 }
 0x210   : > { %8319 = vst [vmem:[#allocation134_spill] sm:$0xff] %v5670_v1 }
 0x211   : > { %8320 = vst [vmem:[#allocation135_spill] sm:$0xff] %v5672_v37  ;;  %v4844_v37 = vmov 7   ;;  %v5694_v0 = vpop.f32.mrf.mxu0 }
 0x215   : > { %1625 = vperm.xlu1 %4188, %v5122_v34  }
 0x216   : > { %1629 = vperm.xlu2 %4186, %v5117_v33   ;;  %v5676_v41 = vpop.permute.xlu1 %1429  ;;  %1681 = vperm.xlu0 %4187, %v5226_v10  }
 0x217   : > { %8321 = vst [vmem:[#allocation136_spill] sm:$0xff] %v5676_v41  ;;  %v5681_v2 = vpop.permute.xlu2 %1469  ;;  %v5683_v19 = vpop.permute.xlu0 %1473 }
 0x218   : > { %8322 = vst [vmem:[#allocation137_spill] sm:$0xff] %v5681_v2 }
 0x219   : > { %8323 = vst [vmem:[#allocation138_spill] sm:$0xff] %v5683_v19  ;;  %v5705_v40 = vpop.f32.mrf.mxu0 }
 0x21d   : > { %1637 = vperm.xlu1 %4188, %v5146_v43  }
 0x21e   : > { %1641 = vperm.xlu2 %4186, %v5141_v42   ;;  %v5687_v1 = vpop.permute.xlu1 %1441  ;;  %4190 = vset.pattern.permute.xlu0 %v4844_v37 }
 0x21f   : > { %8324 = vst [vmem:[#allocation139_spill] sm:$0xff] %v5687_v1  ;;  %v5689_v51 = vpop.permute.xlu2 %1481  ;;  %1725 = vperm.xlu0 %4190, %v5031_v8   ;;  %v5692_v41 = vpop.permute.xlu0 %1485 }
 0x220   : > { %8325 = vst [vmem:[#allocation140_spill] sm:$0xff] %v5689_v51 }
 0x221   : > { %8326 = vst [vmem:[#allocation141_spill] sm:$0xff] %v5692_v41 }
 0x225   : > { %1649 = vperm.xlu1 %4188, %v5164_v49  }
 0x226   : > { %1653 = vperm.xlu2 %4186, %v5159_v48   ;;  %v5698_v19 = vpop.permute.xlu1 %1453 }
 0x227   : > { %8327 = vst [vmem:[#allocation142_spill] sm:$0xff] %v5698_v19  ;;  %v5700_v2 = vpop.permute.xlu2 %1493  ;;  %1745 = vperm.xlu0 %4190, %v5055_v13   ;;  %v5703_v1 = vpop.permute.xlu0 %1497 }
 0x228   : > { %8328 = vst [vmem:[#allocation143_spill] sm:$0xff] %v5700_v2  ;;  %v5716_v19 = vpop.f32.mrf.mxu0 }
 0x229   : > { %8329 = vst [vmem:[#allocation144_spill] sm:$0xff] %v5703_v1 }
 0x22d   : > { %1661 = vperm.xlu1 %4188, %v5186_v56  }
 0x22e   : > { %1665 = vperm.xlu2 %4186, %v5181_v55   ;;  %v5709_v8 = vpop.permute.xlu1 %1465 }
 0x22f   : > { %8330 = vst [vmem:[#allocation145_spill] sm:$0xff] %v5709_v8  ;;  %v5711_v41 = vpop.permute.xlu2 %1505  ;;  %1757 = vperm.xlu0 %4190, %v5079_v18   ;;  %v5714_v51 = vpop.permute.xlu0 %1509 }
 0x230   : > { %8331 = vst [vmem:[#allocation146_spill] sm:$0xff] %v5711_v41 }
 0x231   : > { %8332 = vst [vmem:[#allocation147_spill] sm:$0xff] %v5714_v51  ;;  %v5730_v51 = vpop.f32.mrf.mxu0 }
 0x235   : > { %1673 = vperm.xlu1 %4188, %v5204_v61  }
 0x236   : > { %1677 = vperm.xlu2 %4186, %v5199_v60   ;;  %v5720_v13 = vpop.permute.xlu1 %1477 }
 0x237   : > { %8333 = vst [vmem:[#allocation148_spill] sm:$0xff] %v5720_v13  ;;  %v5722_v1 = vpop.permute.xlu2 %1517  ;;  %1769 = vperm.xlu0 %4190, %v5109_v30   ;;  %v5725_v2 = vpop.permute.xlu0 %1521  ;;  %v5741_v30 = vld [vmem:[%s8045_s1 + $0x10] sm:$0xff] }
 0x238   : > { %8334 = vst [vmem:[#allocation149_spill] sm:$0xff] %v5722_v1 }
 0x239   : > { %8335 = vst [vmem:[#allocation150_spill] sm:$0xff] %v5725_v2  ;;  %v5750_v1 = vpop.f32.mrf.mxu0 }
 0x23d   : > { %1685 = vperm.xlu1 %4188, %v5221_v9  }
 0x23e   : > { %4189 = vset.pattern.permute.xlu2 %v4844_v37  ;;  %v5728_v18 = vpop.permute.xlu1 %1489 }
 0x23f   : > { %8336 = vst [vmem:[#allocation151_spill] sm:$0xff] %v5728_v18  ;;  %1721 = vperm.xlu2 %4189, %v5007_v3   ;;  %1781 = vperm.xlu0 %4190, %v5127_v35  }
 0x240   : > { %v5734_v41 = vpop.permute.xlu2 %1561  ;;  %v5736_v13 = vpop.permute.xlu0 %1565 }
 0x241   : > { %v5773_v22 = vpop.f32.mrf.mxu0 }
 0x245   : > { %4191 = vset.pattern.permute.xlu1 %v4844_v37  ;;  %v5757_v37 = vld [vmem:[%s8045_s1 + $0x20] sm:$0xff] }
 0x246   : > { %1729 = vperm.xlu1 %4191, %v5741_v30   ;;  %v5744_v2 = vpop.permute.xlu1 %1501 }
 0x247   : > { %8337 = vst [vmem:[#allocation152_spill] sm:$0xff] %v5744_v2  ;;  %1733 = vperm.xlu2 %4189, %v5026_v7   ;;  %1793 = vperm.xlu0 %4190, %v5151_v45   ;;  %v5765_v7 = vld [vmem:[%s8045_s1 + $0x28] sm:$0xff] }
 0x248   : > { %v5748_v3 = vpop.permute.xlu2 %1573  ;;  %v5752_v18 = vpop.permute.xlu0 %1585 }
 0x249   : > { %v5784_v21 = vpop.f32.mrf.mxu0 }
 0x24e   : > { %1737 = vperm.xlu1 %4191, %v5757_v37   ;;  %v5760_v8 = vpop.permute.xlu1 %1513 }
 0x24f   : > { %8338 = vst [vmem:[#allocation153_spill] sm:$0xff] %v5760_v8  ;;  %1741 = vperm.xlu2 %4189, %v5765_v7   ;;  %1805 = vperm.xlu0 %4190, %v5169_v50  }
 0x250   : > { %v5769_v2 = vpop.permute.xlu2 %1581  ;;  %v5771_v23 = vpop.permute.xlu0 %1597 }
 0x251   : > { %8339 = vst [vmem:[#allocation154_spill] sm:$0xff] %v5771_v23 }
 0x256   : > { %1749 = vperm.xlu1 %4191, %v5050_v12   ;;  %v5776_v31 = vpop.permute.xlu1 %1525 }
 0x257   : > { %8340 = vst [vmem:[#allocation155_spill] sm:$0xff] %v5776_v31  ;;  %1753 = vperm.xlu2 %4189, %v5045_v11   ;;  %1817 = vperm.xlu0 %4190, %v5191_v58   ;;  %v5796_v11 = vpop.f32.mrf.mxu0 }
 0x258   : > { %v5780_v8 = vpop.permute.xlu2 %1593  ;;  %v5782_v14 = vpop.permute.xlu0 %1609 }
 0x259   : > { %8341 = vst [vmem:[#allocation156_spill] sm:$0xff] %v5780_v8 }
 0x25a   : > { %8342 = vst [vmem:[#allocation157_spill] sm:$0xff] %v5782_v14 }
 0x25e   : > { %1761 = vperm.xlu1 %4191, %v5074_v17  }
 0x25f   : > { %1765 = vperm.xlu2 %4189, %v5069_v16   ;;  %v5788_v52 = vpop.permute.xlu1 %1569  ;;  %1829 = vperm.xlu0 %4190, %v5209_v62  }
 0x260   : > { %v5791_v12 = vpop.permute.xlu2 %1605  ;;  %v5793_v31 = vpop.permute.xlu0 %1621 }
 0x261   : > { %8343 = vst [vmem:[#allocation158_spill] sm:$0xff] %v5791_v12 }
 0x262   : > { %8344 = vst [vmem:[#allocation159_spill] sm:$0xff] %v5793_v31 }
 0x266   : > { %1773 = vperm.xlu1 %4191, %v5104_v28   ;;  %v4845_v28 = vmov 8  }
 0x267   : > { %1777 = vperm.xlu2 %4189, %v5099_v27   ;;  %v5799_v14 = vpop.permute.xlu1 %1577  ;;  %1841 = vperm.xlu0 %4190, %v5226_v10   ;;  %v5814_v27 = vpop.f32.mrf.mxu0  ;;  %v4681_v10 = vld [vmem:[%s8045_s1 + $0x8] sm:$0xff] }
 0x268   : > { %v5802_v17 = vpop.permute.xlu2 %1617  ;;  %v5804_v16 = vpop.permute.xlu0 %1633 }
 0x269   : > { %8345 = vst [vmem:[#allocation160_spill] sm:$0xff] %v5802_v17 }
 0x26a   : > { %8346 = vst [vmem:[#allocation161_spill] sm:$0xff] %v5804_v16 }
 0x26e   : > { %1785 = vperm.xlu1 %4191, %v5122_v34   ;;  %v5822_v34 = vpop.f32.mrf.mxu2 }
 0x26f   : > { %1789 = vperm.xlu2 %4189, %v5117_v33   ;;  %v5810_v31 = vpop.permute.xlu1 %1589  ;;  %4193 = vset.pattern.permute.xlu0 %v4845_v28 }
 0x270   : > { %v5812_v12 = vpop.permute.xlu2 %1629  ;;  %1885 = vperm.xlu0 %4193, %v4681_v10   ;;  %v5819_v16 = vpop.permute.xlu0 %1645 }
 0x271   : > { %8347 = vst [vmem:[#allocation162_spill] sm:$0xff] %v5812_v12  ;;  %v4682_v12 = vld [vmem:[%s8045_s1 + $0x30] sm:$0xff]  ;;  %v5834_v10 = vpop.f32.mrf.mxu0 }
 0x272   : > { %8348 = vst [vmem:[#allocation163_spill] sm:$0xff] %v5819_v16 }
 0x276   : > { %1797 = vperm.xlu1 %4191, %v5146_v43   ;;  %v5842_v16 = vpop.f32.mrf.mxu2 }
 0x277   : > { %1801 = vperm.xlu2 %4189, %v5141_v42   ;;  %v5825_v33 = vpop.permute.xlu1 %1601 }
 0x278   : > { %8349 = vst [vmem:[#allocation164_spill] sm:$0xff] %v5825_v33  ;;  %v5827_v17 = vpop.permute.xlu2 %1641  ;;  %1905 = vperm.xlu0 %4193, %v4682_v12   ;;  %v5832_v39 = vpop.permute.xlu0 %1657 }
 0x279   : > { %8350 = vst [vmem:[#allocation165_spill] sm:$0xff] %v5827_v17  ;;  %v4683_v17 = vld [vmem:[%s8045_s1 + $0x48] sm:$0xff] }
 0x27a   : > { %8351 = vst [vmem:[#allocation166_spill] sm:$0xff] %v5832_v39  ;;  %v5849_v39 = vpop.f32.mrf.mxu0 }
 0x27b   : > { %8355 = vst [vmem:[#allocation170_spill] sm:$0xff] %v5849_v39 }
 0x27e   : > { %1809 = vperm.xlu1 %4191, %v5164_v49  }
 0x27f   : > { %1813 = vperm.xlu2 %4189, %v5159_v48   ;;  %v5838_v43 = vpop.permute.xlu1 %1613 }
 0x280   : > { %8352 = vst [vmem:[#allocation167_spill] sm:$0xff] %v5838_v43  ;;  %v5840_v42 = vpop.permute.xlu2 %1653  ;;  %1917 = vperm.xlu0 %4193, %v4683_v17   ;;  %v5847_v12 = vpop.permute.xlu0 %1669 }
 0x281   : > { %8353 = vst [vmem:[#allocation168_spill] sm:$0xff] %v5840_v42  ;;  %v4684_v42 = vld [vmem:[%s8045_s1 + $0x60] sm:$0xff]  ;;  %v5862_v17 = vpop.f32.mrf.mxu2 }
 0x282   : > { %8354 = vst [vmem:[#allocation169_spill] sm:$0xff] %v5847_v12  ;;  %v5865_v12 = vpop.f32.mrf.mxu0 }
 0x283   : > { %8359 = vst [vmem:[#allocation174_spill] sm:$0xff] %v5865_v12 }
 0x286   : > { %1821 = vperm.xlu1 %4191, %v5186_v56  }
 0x287   : > { %1825 = vperm.xlu2 %4189, %v5181_v55   ;;  %v5853_v48 = vpop.permute.xlu1 %1625 }
 0x288   : > { %8356 = vst [vmem:[#allocation171_spill] sm:$0xff] %v5853_v48  ;;  %v5855_v49 = vpop.permute.xlu2 %1665  ;;  %1929 = vperm.xlu0 %4193, %v4684_v42   ;;  %v5860_v43 = vpop.permute.xlu0 %1681 }
 0x289   : > { %8357 = vst [vmem:[#allocation172_spill] sm:$0xff] %v5855_v49  ;;  %v5875_v48 = vpop.f32.mrf.mxu2 }
 0x28a   : > { %8358 = vst [vmem:[#allocation173_spill] sm:$0xff] %v5860_v43 }
 0x28e   : > { %1833 = vperm.xlu1 %4191, %v5204_v61   ;;  %v4685_v61 = vld [vmem:[%s8045_s1] sm:$0xff] }
 0x28f   : > { %1837 = vperm.xlu2 %4189, %v5199_v60   ;;  %v5868_v55 = vpop.permute.xlu1 %1637  ;;  %v5883_v60 = vpop.f32.mrf.mxu0 }
 0x290   : > { %8360 = vst [vmem:[#allocation175_spill] sm:$0xff] %v5868_v55  ;;  %v5870_v56 = vpop.permute.xlu2 %1677  ;;  %1941 = vperm.xlu0 %4193, %v5127_v35  }
 0x291   : > { %8361 = vst [vmem:[#allocation176_spill] sm:$0xff] %v5870_v56  ;;  %v5873_v49 = vpop.permute.xlu0 %1725  ;;  %v5890_v56 = vpop.f32.mrf.mxu2 }
 0x292   : > { %8363 = vst [vmem:[#allocation178_spill] sm:$0xff] %v5883_v60  ;;  %v4688_v60 = vld [vmem:[%s8045_s1 + $0x40] sm:$0xff] }
 0x296   : > { %1845 = vperm.xlu1 %4191, %v5221_v9  }
 0x297   : > { %4192 = vset.pattern.permute.xlu2 %v4845_v28  ;;  %v5878_v42 = vpop.permute.xlu1 %1649  ;;  %v5903_v55 = vpop.f32.mrf.mxu0 }
 0x298   : > { %8362 = vst [vmem:[#allocation177_spill] sm:$0xff] %v5878_v42  ;;  %1881 = vperm.xlu2 %4192, %v4685_v61   ;;  %1953 = vperm.xlu0 %4193, %v5151_v45   ;;  %v4686_v42 = vld [vmem:[%s8045_s1 + $0x18] sm:$0xff] }
 0x299   : > { %v5886_v43 = vpop.permute.xlu2 %1721  ;;  %v5888_v35 = vpop.permute.xlu0 %1745  ;;  %8368 = vst [vmem:[#allocation183_spill] sm:$0xff] %v5903_v55 }
 0x29a   : > { %8364 = vst [vmem:[#allocation179_spill] sm:$0xff] %v5888_v35 }
 0x29e   : > { %4194 = vset.pattern.permute.xlu1 %v4845_v28 }
 0x29f   : > { %1889 = vperm.xlu1 %4194, %v5741_v30   ;;  %v5893_v9 = vpop.permute.xlu1 %1661  ;;  %v527_v30 = vpop.f32.mrf.mxu2 }
 0x2a0   : > { %8365 = vst [vmem:[#allocation180_spill] sm:$0xff] %v5893_v9  ;;  %1893 = vperm.xlu2 %4192, %v4686_v42   ;;  %1965 = vperm.xlu0 %4193, %v5169_v50   ;;  %v5917_v50 = vld [vmem:[%s8047_s3] ss:$0 sm:$0xff] }
 0x2a1   : > { %v5899_v61 = vpop.permute.xlu2 %1733  ;;  %v5901_v45 = vpop.permute.xlu0 %1757 }
 0x2a2   : > { %8366 = vst [vmem:[#allocation181_spill] sm:$0xff] %v5899_v61 }
 0x2a3   : > { %8367 = vst [vmem:[#allocation182_spill] sm:$0xff] %v5901_v45  ;;  %v5919_v45 = vpop.f32.mrf.mxu1 }
 0x2a7   : > { %1897 = vperm.xlu1 %4194, %v5757_v37   ;;  %v5906_v28 = vpop.permute.xlu1 %1673  ;;  %v458_v37 = vadd.f32 %v5917_v50, %v5694_v0 }
 0x2a8   : > { %8369 = vst [vmem:[#allocation184_spill] sm:$0xff] %v5906_v28  ;;  %1901 = vperm.xlu2 %4192, %v5765_v7   ;;  %1977 = vperm.xlu0 %4193, %v5191_v58   ;;  %v492_v28 = vpop.f32.mrf.mxu0  ;;  %v460_v7 = vadd.f32 %v5917_v50, %v5705_v40  ;;  %v455_v58 = vadd.f32 %v5917_v50, %v5678_v46 }
 0x2a9   : > { %v5910_v9 = vpop.permute.xlu2 %1741  ;;  %v5912_v42 = vpop.permute.xlu0 %1769  ;;  %v5935_v0 = vmax.f32 %v458_v37, 0.0  ;;  %v528_v37 = vadd.f32 %v5917_v50, %v527_v30 }
 0x2aa   : > { %8370 = vst [vmem:[#allocation185_spill] sm:$0xff] %v5910_v9  ;;  %v596_v9 = vlaneseq  ;;  %v5940_v46 = vmax.f32 %v460_v7, 0.0  ;;  %v5942_v33 = vmax.f32 %v455_v58, 0.0 }
 0x2ab   : > { %8371 = vst [vmem:[#allocation186_spill] sm:$0xff] %v5912_v42  ;;  %v4687_v42 = vld [vmem:[%s8045_s1 + $0x38] sm:$0xff]  ;;  %v5948_v4 = vpop.f32.mrf.mxu1  ;;  %v5977_v39 = vmax.f32 %v528_v37, 0.0  ;;  %v4088_v37 = vld [vmem:[%s8048_s4 + $0x88] sm:$0xff] }
 0x2ac   : > { %8373 = vst [vmem:[#allocation188_spill] sm:$0xff] %v5935_v0  ;;  %v5944_v61 = vshrl.u32 %v596_v9, 7  ;;  %v8054_v58 = vrot.slane %v5942_v33, 7  ;;  %v4689_v9 = vld [vmem:[%s8045_s1 + $0x50] sm:$0xff]  ;;  %3431 = vmatpush.bf16.msrb.mxu0 %v4088_v37  ;;  %4108 = vmatpush.bf16.msra.mxu3 %v4088_v37 }
 0x2ad   : > { %8375 = vst [vmem:[#allocation190_spill] sm:$0xff] %v5940_v46 }
 0x2ae   : > { %8376 = vst [vmem:[#allocation191_spill] sm:$0xff] %v5942_v33  ;;  %vm598_vm0 = vcmp.lt.s32.totalorder %v5944_v61, 1  ;;  %vm1047_vm1 = vcmp.lt.s32.totalorder %v5944_v61, 7 }
 0x2af   : > { %1909 = vperm.xlu1 %4194, %v4687_v42   ;;  %v5930_v35 = vpop.permute.xlu1 %1685  ;;  %v529_v42 = vpop.f32.mrf.mxu2  ;;  %8381 = vst [vmem:[#allocation196_spill] sm:$0xff] %v5977_v39 }
 0x2b0   : > { %8372 = vst [vmem:[#allocation187_spill] sm:$0xff] %v5930_v35  ;;  %1913 = vperm.xlu2 %4192, %v4688_v60   ;;  %1989 = vperm.xlu0 %4193, %v5209_v62   ;;  %v453_v35 = vadd.f32 %v5917_v50, %v5663_v53  ;;  %v566_v60 = vrot.slane %v5935_v0, 7  ;;  %v530_v62 = vadd.f32 %v5917_v50, %v529_v42  ;;  %v4690_v53 = vld [vmem:[%s8045_s1 + $0x58] sm:$0xff] }
 0x2b1   : > { %v5938_v40 = vpop.permute.xlu2 %1753  ;;  %v1782_v55 = vpop.permute.xlu0 %1781 }
 0x2b2   : > { %8374 = vst [vmem:[#allocation189_spill] sm:$0xff] %v5938_v40  ;;  %v494_v40 = vpop.f32.mrf.mxu0  ;;  %v5964_v42 = vmax.f32 %v453_v35, 0.0  ;;  %v5970_v7 = vsel %vm598_vm0, %v8054_v58, %v566_v60 }
 0x2b3   : > { %8379 = vst [vmem:[#allocation194_spill] sm:$0xff] %v5970_v7  ;;  %v495_v35 = vadd.f32 %v5917_v50, %v494_v40  ;;  %v1688_v8 = vmul.f32 %v5734_v41, %v5970_v7  ;;  %v463_v41 = vadd.f32 %v5917_v50, %v5716_v19  ;;  %v4692_v7 = vld [vmem:[%s8045_s1 + $0x68] sm:$0xff] }
 0x2b4   : > { %8378 = vst [vmem:[#allocation193_spill] sm:$0xff] %v5964_v42 }
 0x2b7   : > { %1921 = vperm.xlu1 %4194, %v4689_v9   ;;  %v4691_v9 = vld [vmem:[%s8045_s1 + $0xf0] sm:$0xff] }
 0x2b8   : > { %1925 = vperm.xlu2 %4192, %v4690_v53   ;;  %v5962_v30 = vpop.permute.xlu1 %1729  ;;  %2001 = vperm.xlu0 %4193, %v4691_v9   ;;  %v5979_v53 = vmax.f32 %v530_v62, 0.0 }
 0x2b9   : > { %8377 = vst [vmem:[#allocation192_spill] sm:$0xff] %v5962_v30  ;;  %v5975_v12 = vpop.permute.xlu2 %1765  ;;  %v8383_v30 = vrot.slane %v5940_v46, 7  ;;  %v5988_v58 = vpop.permute.xlu0 %1793 }
 0x2ba   : > { %8380 = vst [vmem:[#allocation195_spill] sm:$0xff] %v5975_v12  ;;  %v1046_v62 = vrot.slane %v5979_v53, 1  ;;  %v1015_v12 = vrot.slane %v5964_v42, 1 }
 0x2bb   : > { %8382 = vst [vmem:[#allocation197_spill] sm:$0xff] %v5979_v53  ;;  %v5986_v59 = vsel %vm598_vm0, %v566_v60, %v8383_v30  ;;  %v493_v60 = vadd.f32 %v5917_v50, %v492_v28  ;;  %v507_v30 = vpop.f32.mrf.mxu1  ;;  %v8386_v28 = vrot.slane %v5977_v39, 1 }
 0x2bc   : > { %8384 = vst [vmem:[#allocation198_spill] sm:$0xff] %v5986_v59  ;;  %v1689_v9 = vmul.f32 %v5736_v13, %v5986_v59  ;;  %v6004_v13 = vmax.f32 %v495_v35, 0.0  ;;  %v465_v59 = vadd.f32 %v5917_v50, %v5730_v51  ;;  %v6019_v19 = vsel %vm1047_vm1, %v1046_v62, %v1015_v12 }
 0x2bd   : > { %v6015_v37 = vsel %vm1047_vm1, %v8386_v28, %v1046_v62  ;;  %8388 = vst [vmem:[#allocation201_spill] sm:$0xff] %v6019_v19  ;;  %v6021_v35 = vmax.f32 %v493_v60, 0.0  ;;  %v6032_v28 = vmax.f32 %v463_v41, 0.0  ;;  %v4694_v41 = vld [vmem:[%s8045_s1 + $0x80] sm:$0xff] }
 0x2be   : > { %8385 = vst [vmem:[#allocation199_spill] sm:$0xff] %v6004_v13  ;;  %v4200_v40 = vpack.i.bf16 %v1689_v9, %v1688_v8  ;;  %v6024_v51 = vmul.f32 %v1782_v55, %v6004_v13  ;;  %v4693_v8 = vld [vmem:[%s8045_s1 + $0x70] sm:$0xff]  ;;  %v1208_v55 = vmul.f32 %v5427_v47, %v6015_v37  ;;  %v1209_v13 = vmul.f32 %v5454_v24, %v6019_v19  ;;  %v4695_v47 = vld [vmem:[%s8045_s1 + $0x88] sm:$0xff] }
 0x2bf   : > { %1933 = vperm.xlu1 %4194, %v4692_v7   ;;  %8387 = vst [vmem:[#allocation200_spill] sm:$0xff] %v6015_v37  ;;  %v6041_v23 = vmax.f32 %v465_v59, 0.0 }
 0x2c0   : > { %8389 = vst [vmem:[#allocation202_spill] sm:$0xff] %v6021_v35  ;;  %1937 = vperm.xlu2 %4192, %v4693_v8   ;;  %v6029_v7 = vpop.permute.xlu1 %1737  ;;  %4201 = vrot.lane.b32.xlu0 %v4200_v40, %s4846_s23  ;;  %v568_v40 = vrot.slane %v6032_v28, 7 }
 0x2c1   : > { %8390 = vst [vmem:[#allocation203_spill] sm:$0xff] %v6024_v51  ;;  %v1778_v9 = vpop.permute.xlu2 %1777  ;;  %v1806_v60 = vpop.permute.xlu0 %1805  ;;  %v1016_v51 = vrot.slane %v5942_v33, 1 }
 0x2c2   : > { %8391 = vst [vmem:[#allocation204_spill] sm:$0xff] %v6029_v7  ;;  %v6035_v62 = vmul.f32 %v1778_v9, %v6021_v35  ;;  %v4215_v7 = vpack.i.bf16 %v1209_v13, %v1208_v55  ;;  %v569_v9 = vrot.slane %v6041_v23, 7  ;;  %v8396_v13 = vrot.slane %v5940_v46, 7  ;;  %v497_v35 = vpop.f32.mrf.mxu0 }
 0x2c3   : > { %8392 = vst [vmem:[#allocation205_spill] sm:$0xff] %v6032_v28  ;;  %v509_v59 = vpop.f32.mrf.mxu1 }
 0x2c4   : > { %8393 = vst [vmem:[#allocation206_spill] sm:$0xff] %v6035_v62  ;;  %v6062_v55 = vsel %vm598_vm0, %v8396_v13, %v568_v40  ;;  %v510_v37 = vadd.f32 %v5917_v50, %v509_v59  ;;  %v468_v13 = vadd.f32 %v5917_v50, %v5750_v1  ;;  %v6091_v1 = vsel %vm1047_vm1, %v1015_v12, %v1016_v51 }
 0x2c5   : > { %8394 = vst [vmem:[#allocation207_spill] sm:$0xff] %v6041_v23  ;;  %v1690_v19 = vmul.f32 %v5788_v52, %v6062_v55 }
 0x2c6   : > { %8397 = vst [vmem:[#allocation209_spill] sm:$0xff] %v6062_v55 }
 0x2c7   : > { %1945 = vperm.xlu1 %4194, %v4694_v41   ;;  %8401 = vst [vmem:[#allocation213_spill] sm:$0xff] %v6091_v1 }
 0x2c8   : > { %1949 = vperm.xlu2 %4192, %v4695_v47   ;;  %v6053_v24 = vpop.permute.xlu1 %1749  ;;  %4216 = vrot.lane.b32.xlu0 %v4215_v7, %s4846_s23  ;;  %v508_v47 = vadd.f32 %v5917_v50, %v507_v30  ;;  %v6072_v7 = vsel %vm598_vm0, %v568_v40, %v569_v9  ;;  %v4696_v30 = vld [vmem:[%s8045_s1 + $0x98] sm:$0xff]  ;;  %v6085_v40 = vmax.f32 %v510_v37, 0.0 }
 0x2c9   : > { %8395 = vst [vmem:[#allocation208_spill] sm:$0xff] %v6053_v24  ;;  %v6056_v8 = vpop.permute.xlu2 %1789  ;;  %v6064_v41 = vpop.permute.xlu0 %1817  ;;  %v1691_v62 = vmul.f32 %v5748_v3, %v6072_v7  ;;  %v1017_v24 = vrot.slane %v5935_v0, 1  ;;  %v470_v3 = vadd.f32 %v5917_v50, %v5773_v22 }
 0x2ca   : > { %8398 = vst [vmem:[#allocation210_spill] sm:$0xff] %v6072_v7  ;;  %v6083_v59 = vmax.f32 %v508_v47, 0.0  ;;  %v6106_v22 = vmul.f32 %v1806_v60, %v6085_v40 }
 0x2cb   : > { %v4230_v52 = vpack.i.bf16 %v1691_v62, %v1690_v19  ;;  %8400 = vst [vmem:[#allocation212_spill] sm:$0xff] %v6085_v40  ;;  %v4697_v19 = vld [vmem:[%s8045_s1 + $0xa0] sm:$0xff]  ;;  %v6103_v37 = vsel %vm1047_vm1, %v1016_v51, %v1017_v24 }
 0x2cc   : > { %8399 = vst [vmem:[#allocation211_spill] sm:$0xff] %v6083_v59  ;;  %v4087_v51 = vld [vmem:[%s8048_s4 + $0x80] sm:$0xff] }
 0x2cd   : > { %8404 = vst [vmem:[#allocation216_spill] sm:$0xff] %v6103_v37  ;;  %3432 = vmatpush.bf16.msrb.mxu0 %v4087_v51  ;;  %4109 = vmatpush.bf16.msra.mxu3 %v4087_v51  ;;  %v523_v51 = vadd.f32 %v5917_v50, %v5875_v48  ;;  %v1018_v48 = vrot.slane %v5940_v46, 1 }
 0x2ce   : > { %8405 = vst [vmem:[#allocation217_spill] sm:$0xff] %v6106_v22 }
 0x2cf   : > { %1957 = vperm.xlu1 %4194, %v4696_v30   ;;  %v6099_v30 = vmax.f32 %v468_v13, 0.0 }
 0x2d0   : > { %1961 = vperm.xlu2 %4192, %v4697_v19   ;;  %v6096_v62 = vpop.permute.xlu1 %1761  ;;  %4231 = vrot.lane.b32.xlu0 %v4230_v52, %s4846_s23  ;;  %v1210_v19 = vmul.f32 %v5458_v20, %v6091_v1  ;;  %v1211_v52 = vmul.f32 %v5436_v32, %v6103_v37  ;;  %v499_v20 = vpop.f32.mrf.mxu0  ;;  %v4699_v32 = vld [vmem:[%s8045_s1 + $0xb8] sm:$0xff] }
 0x2d1   : > { %8402 = vst [vmem:[#allocation214_spill] sm:$0xff] %v6096_v62  ;;  %v1802_v47 = vpop.permute.xlu2 %1801  ;;  %v1830_v7 = vpop.permute.xlu0 %1829  ;;  %v6113_v62 = vmax.f32 %v470_v3, 0.0  ;;  %v570_v60 = vrot.slane %v6099_v30, 7  ;;  %v498_v3 = vadd.f32 %v5917_v50, %v497_v35  ;;  %v473_v35 = vadd.f32 %v5917_v50, %v5784_v21 }
 0x2d2   : > { %8403 = vst [vmem:[#allocation215_spill] sm:$0xff] %v6099_v30  ;;  %v6109_v12 = vmul.f32 %v1802_v47, %v6083_v59  ;;  %v4245_v47 = vpack.i.bf16 %v1211_v52, %v1210_v19  ;;  %v4698_v59 = vld [vmem:[%s8045_s1 + $0xb0] sm:$0xff]  ;;  %v6170_v21 = vmax.f32 %v523_v51, 0.0 }
 0x2d3   : > { %8407 = vst [vmem:[#allocation219_spill] sm:$0xff] %v6113_v62  ;;  %v6137_v52 = vsel %vm598_vm0, %v569_v9, %v570_v60  ;;  %v8410_v22 = vrot.slane %v6113_v62, 7 }
 0x2d4   : > { %8406 = vst [vmem:[#allocation218_spill] sm:$0xff] %v6109_v12  ;;  %v500_v12 = vadd.f32 %v5917_v50, %v499_v20 }
 0x2d5   : > { %8409 = vst [vmem:[#allocation221_spill] sm:$0xff] %v6137_v52  ;;  %v6153_v9 = vsel %vm598_vm0, %v570_v60, %v8410_v22  ;;  %v4700_v22 = vld [vmem:[%s8045_s1 + $0xc8] sm:$0xff]  ;;  %v4701_v60 = vld [vmem:[%s8045_s1 + $0xd0] sm:$0xff] }
 0x2d6   : > { %8411 = vst [vmem:[#allocation222_spill] sm:$0xff] %v6153_v9  ;;  %v1693_v20 = vmul.f32 %v5769_v2, %v6153_v9 }
 0x2d7   : > { %1969 = vperm.xlu1 %4194, %v4698_v59   ;;  %8413 = vst [vmem:[#allocation224_spill] sm:$0xff] %v6170_v21 }
 0x2d8   : > { %1973 = vperm.xlu2 %4192, %v4699_v32   ;;  %v6130_v13 = vpop.permute.xlu1 %1773  ;;  %4246 = vrot.lane.b32.xlu0 %v4245_v47, %s4846_s23  ;;  %v1692_v32 = vmul.f32 %v5799_v14, %v6137_v52  ;;  %v525_v47 = vadd.f32 %v5917_v50, %v5890_v56  ;;  %v475_v14 = vadd.f32 %v5917_v50, %v5796_v11  ;;  %v6163_v56 = vmax.f32 %v498_v3, 0.0 }
 0x2d9   : > { %8408 = vst [vmem:[#allocation220_spill] sm:$0xff] %v6130_v13  ;;  %v6133_v19 = vpop.permute.xlu2 %1813  ;;  %v6139_v59 = vpop.permute.xlu0 %1841  ;;  %v1019_v13 = vrot.slane %v6032_v28, 1  ;;  %v6165_v52 = vmax.f32 %v500_v12, 0.0  ;;  %v6176_v11 = vsel %vm1047_vm1, %v1017_v24, %v1018_v48  ;;  %v6181_v3 = vmax.f32 %v473_v35, 0.0 }
 0x2da   : > { %8412 = vst [vmem:[#allocation223_spill] sm:$0xff] %v6163_v56  ;;  %v4260_v40 = vpack.i.bf16 %v1693_v20, %v1692_v32  ;;  %v6172_v2 = vmax.f32 %v525_v47, 0.0  ;;  %v6191_v24 = vmax.f32 %v475_v14, 0.0  ;;  %v1212_v14 = vmul.f32 %v5467_v38, %v6176_v11  ;;  %v4702_v38 = vld [vmem:[%s8045_s1 + $0xe0] sm:$0xff] }
 0x2db   : > { %8415 = vst [vmem:[#allocation226_spill] sm:$0xff] %v6181_v3  ;;  %v6185_v32 = vmul.f32 %v6056_v8, %v6165_v52  ;;  %v6195_v20 = vsel %vm1047_vm1, %v1018_v48, %v1019_v13  ;;  %v503_v8 = vadd.f32 %v5917_v50, %v5919_v45 }
 0x2dc   : > { %8414 = vst [vmem:[#allocation225_spill] sm:$0xff] %v6172_v2  ;;  %v8085_v45 = vrot.slane %v6191_v24, 7 }
 0x2dd   : > { %8416 = vst [vmem:[#allocation227_spill] sm:$0xff] %v6185_v32 }
 0x2de   : > { %8418 = vst [vmem:[#allocation229_spill] sm:$0xff] %v6191_v24 }
 0x2df   : > { %1981 = vperm.xlu1 %4194, %v4700_v22   ;;  %v6198_v22 = vmul.f32 %v1830_v7, %v6172_v2  ;;  %v6217_v2 = vmax.f32 %v503_v8, 0.0  ;;  %v4703_v7 = vld [vmem:[%s8045_s1 + $0xe8] sm:$0xff]  ;;  %v515_v8 = vadd.f32 %v5917_v50, %v5822_v34  ;;  %v1528_v34 = vmul.f32 %v5625_v57, %v6091_v1 }
 0x2e0   : > { %1985 = vperm.xlu2 %4192, %v4701_v60   ;;  %v1786_v12 = vpop.permute.xlu1 %1785  ;;  %4261 = vrot.lane.b32.xlu0 %v4260_v40, %s4846_s23  ;;  %v505_v40 = vadd.f32 %v5917_v50, %v5948_v4  ;;  %v513_v60 = vadd.f32 %v5917_v50, %v5806_v15  ;;  %v480_v57 = vadd.f32 %v5917_v50, %v5834_v10 }
 0x2e1   : > { %v6189_v51 = vmul.f32 %v1786_v12, %v6163_v56  ;;  %v1826_v47 = vpop.permute.xlu2 %1825  ;;  %8419 = vst [vmem:[#allocation230_spill] sm:$0xff] %v6198_v22  ;;  %v1213_v12 = vmul.f32 %v5445_v25, %v6195_v20  ;;  %v520_v10 = vadd.f32 %v5917_v50, %v5862_v17 }
 0x2e2   : > { %v6201_v35 = vmul.f32 %v1826_v47, %v6170_v21  ;;  %v1886_v48 = vpop.permute.xlu0 %1885  ;;  %v572_v47 = vrot.slane %v6181_v3, 7  ;;  %8421 = vst [vmem:[#allocation232_spill] sm:$0xff] %v6217_v2  ;;  %v6219_v4 = vmax.f32 %v505_v40, 0.0  ;;  %v6233_v40 = vmul.f32 %v5988_v58, %v6217_v2 }
 0x2e3   : > { %8417 = vst [vmem:[#allocation228_spill] sm:$0xff] %v6189_v51  ;;  %v4275_v21 = vpack.i.bf16 %v1213_v12, %v1212_v14  ;;  %v1529_v58 = vmul.f32 %v5634_v26, %v6103_v37  ;;  %v8088_v26 = vrot.slane %v6099_v30, 1  ;;  %v6271_v1 = vmax.f32 %v513_v60, 0.0  ;;  %v8471_v51 = vld [vmem:[#allocation183_spill] sm:$0xff] }
 0x2e4   : > { %8420 = vst [vmem:[#allocation231_spill] sm:$0xff] %v6201_v35  ;;  %v6251_v15 = vsel %vm598_vm0, %v572_v47, %v8085_v45 }
 0x2e5   : > { %8422 = vst [vmem:[#allocation233_spill] sm:$0xff] %v6219_v4  ;;  %v4195_v45 = vpack.i.bf16 %v1529_v58, %v1528_v34  ;;  %v6307_v58 = vmax.f32 %v480_v57, 0.0 }
 0x2e6   : > { %8423 = vst [vmem:[#allocation234_spill] sm:$0xff] %v6233_v40  ;;  %v4704_v40 = vld [vmem:[%s8045_s1 + $0xf8] sm:$0xff] }
 0x2e7   : > { %1993 = vperm.xlu1 %4194, %v4702_v38   ;;  %8427 = vst [vmem:[#allocation237_spill] sm:$0xff] %v6251_v15 }
 0x2e8   : > { %1997 = vperm.xlu2 %4192, %v4703_v7   ;;  %v1798_v25 = vpop.permute.xlu1 %1797  ;;  %4276 = vrot.lane.b32.xlu0 %v4275_v21, %s4846_s23  ;;  %v8425_v7 = vrot.slane %v6113_v62, 7  ;;  %v1020_v21 = vrot.slane %v6041_v23, 1  ;;  %8428 = vst [vmem:[#allocation238_spill] sm:$0xff] %v6271_v1 }
 0x2e9   : > { %v6237_v14 = vmul.f32 %v1798_v25, %v6219_v4  ;;  %v6239_v12 = vpop.permute.xlu2 %1837  ;;  %8432 = vst [vmem:[#allocation242_spill] sm:$0xff] %v6307_v58 }
 0x2ea   : > { %v6245_v38 = vsel %vm598_vm0, %v8425_v7, %v572_v47  ;;  %v1695_v7 = vmul.f32 %v5810_v31, %v6251_v15  ;;  %v6264_v22 = vpop.permute.xlu0 %1905  ;;  %v478_v47 = vadd.f32 %v5917_v50, %v5814_v27  ;;  %v6277_v31 = vsel %vm1047_vm1, %v1019_v13, %v1020_v21 }
 0x2eb   : > { %8424 = vst [vmem:[#allocation235_spill] sm:$0xff] %v6237_v14  ;;  %v1694_v25 = vmul.f32 %v5752_v18, %v6245_v38  ;;  %v6273_v18 = vmax.f32 %v515_v8, 0.0  ;;  %v518_v27 = vadd.f32 %v5917_v50, %v5842_v16  ;;  %v6290_v60 = vsel %vm1047_vm1, %v1020_v21, %v8088_v26 }
 0x2ec   : > { %8426 = vst [vmem:[#allocation236_spill] sm:$0xff] %v6245_v38  ;;  %v1849_v8 = vmul.f32 %v5873_v49, %v5940_v46  ;;  %v6305_v34 = vmax.f32 %v478_v47, 0.0  ;;  %v2009_v21 = vmul.f32 %v1886_v48, %v6195_v20  ;;  %v564_v47 = vrot.slane %v5964_v42, 7 }
 0x2ed   : > { %v4290_v35 = vpack.i.bf16 %v1695_v7, %v1694_v25  ;;  %v6299_v16 = vmul.f32 %v6133_v19, %v6273_v18  ;;  %v1215_v19 = vmul.f32 %v5476_v36, %v6290_v60  ;;  %v8091_v48 = vrot.slane %v6307_v58, 7 }
 0x2ee   : > { %8431 = vst [vmem:[#allocation241_spill] sm:$0xff] %v6305_v34  ;;  %v574_v36 = vrot.slane %v6305_v34, 7 }
 0x2ef   : > { %2005 = vperm.xlu1 %4194, %v4704_v40   ;;  %v1848_v40 = vmul.f32 %v5886_v43, %v5935_v0  ;;  %8429 = vst [vmem:[#allocation239_spill] sm:$0xff] %v6299_v16  ;;  %v984_v43 = vmul.f32 %v5364_v29, %v5979_v53  ;;  %v983_v29 = vmul.f32 %v5326_v63, %v5977_v39 }
 0x2f0   : > { %4196 = vrot.lane.b32.xlu2 %v4195_v45, %s4847_s14  ;;  %v1810_v13 = vpop.permute.xlu1 %1809  ;;  %4291 = vrot.lane.b32.xlu0 %v4290_v35, %s4846_s23  ;;  %v1214_v45 = vmul.f32 %v5463_v54, %v6277_v31  ;;  %v8090_v54 = vrot.slane %v5979_v53, 7  ;;  %v6327_v35 = vmax.f32 %v518_v27, 0.0 }
 0x2f1   : > { %v6303_v17 = vmul.f32 %v1810_v13, %v6271_v1  ;;  %v4205_v57 = vpack.i.bf16 %v1849_v8, %v1848_v40  ;;  %v4210_v26 = vpack.i.bf16 %v984_v43, %v983_v29  ;;  %v8434_v8 = vrot.slane %v5942_v33, 7 }
 0x2f2   : > { %v1882_v49 = vpop.permute.xlu2 %1881  ;;  %v6319_v7 = vpop.permute.xlu0 %1917  ;;  %v6337_v63 = vsel %vm598_vm0, %v8090_v54, %v564_v47  ;;  %v6352_v43 = vmul.f32 %v6064_v41, %v6327_v35  ;;  %v1530_v41 = vmul.f32 %v5656_v6, %v6176_v11  ;;  %v8445_v6 = vld [vmem:[#allocation170_spill] sm:$0xff]  ;;  %v1022_v54 = vrot.slane %v6113_v62, 1 }
 0x2f3   : > { %8430 = vst [vmem:[#allocation240_spill] sm:$0xff] %v6303_v17  ;;  %v2008_v25 = vmul.f32 %v1882_v49, %v6176_v11  ;;  %v6329_v49 = vmax.f32 %v520_v10, 0.0  ;;  %v4305_v17 = vpack.i.bf16 %v1215_v19, %v1214_v45  ;;  %v6343_v27 = vsel %vm598_vm0, %v564_v47, %v8434_v8  ;;  %v8442_v47 = vld [vmem:[#allocation156_spill] sm:$0xff] }
 0x2f4   : > { %8433 = vst [vmem:[#allocation243_spill] sm:$0xff] %v6337_v63  ;;  %v1368_v40 = vmul.f32 %v5526_v5, %v6337_v63  ;;  %v1369_v45 = vmul.f32 %v5544_v44, %v6343_v27  ;;  %v8439_v5 = vrot.slane %v6191_v24, 7  ;;  %v1023_v8 = vrot.slane %v6181_v3, 1 }
 0x2f5   : > { %v3005_v13 = vpack.c.bf16 %v2009_v21, %v2008_v25  ;;  %8435 = vst [vmem:[#allocation244_spill] sm:$0xff] %v6343_v27  ;;  %v483_v11 = vadd.f32 %v5917_v50, %v8445_v6 }
 0x2f6   : > { %8436 = vst [vmem:[#allocation245_spill] sm:$0xff] %v6352_v43  ;;  %v6368_v44 = vsel %vm598_vm0, %v8439_v5, %v574_v36  ;;  %v4220_v5 = vpack.i.bf16 %v1369_v45, %v1368_v40  ;;  %v6393_v43 = vsel %vm1047_vm1, %v1022_v54, %v1023_v8  ;;  %v8447_v40 = vld [vmem:[#allocation192_spill] sm:$0xff] }
 0x2f7   : > { %4017 = vmatmul.msk.bf16.vlgmr.msrb.gmra.mxu0 %vm2808_vm2, %v3005_v13  ;;  %4206 = vrot.lane.b32.xlu1 %v4205_v57, %s4848_s25  ;;  %8440 = vst [vmem:[#allocation248_spill] sm:$0xff] %v6368_v44  ;;  %v1696_v29 = vmul.f32 %v8442_v47, %v6368_v44  ;;  %v8446_v47 = vld [vmem:[#allocation174_spill] sm:$0xff]  ;;  %v1850_v45 = vmul.f32 %v8447_v40, %v6032_v28 }
 0x2f8   : > { %4211 = vrot.lane.b32.xlu2 %v4210_v26, %s4847_s14  ;;  %v1822_v10 = vpop.permute.xlu1 %1821  ;;  %4306 = vrot.lane.b32.xlu0 %v4305_v17, %s4846_s23  ;;  %v6362_v26 = vsel %vm598_vm0, %v574_v36, %v8091_v48  ;;  %v8441_v17 = vld [vmem:[#allocation154_spill] sm:$0xff]  ;;  %v8444_v36 = vld [vmem:[#allocation124_spill] sm:$0xff]  ;;  %v485_v57 = vadd.f32 %v5917_v50, %v8446_v47 }
 0x2f9   : > { %v6356_v19 = vmul.f32 %v1822_v10, %v6329_v49  ;;  %8438 = vst [vmem:[#allocation247_spill] sm:$0xff] %v6362_v26  ;;  %v1697_v25 = vmul.f32 %v8441_v17, %v6362_v26  ;;  %v1531_v10 = vmul.f32 %v8444_v36, %v6195_v20  ;;  %v6400_v36 = vmul.f32 %v6239_v12, %v5979_v53  ;;  %v8453_v12 = vld [vmem:[#allocation75_spill] sm:$0xff] }
 0x2fa   : > { %v6372_v21 = vpop.permute.xlu2 %1893  ;;  %v6380_v13 = vpop.permute.xlu0 %1929  ;;  %v1217_v47 = vmul.f32 %v8453_v12, %v6393_v43  ;;  %v6428_v16 = vmax.f32 %v485_v57, 0.0  ;;  %v6440_v57 = vmul.f32 %v6139_v59, %v5964_v42 }
 0x2fb   : > { %8437 = vst [vmem:[#allocation246_spill] sm:$0xff] %v6356_v19  ;;  %v4225_v17 = vpack.i.bf16 %v1531_v10, %v1530_v41  ;;  %v4320_v48 = vpack.i.bf16 %v1697_v25, %v1696_v29  ;;  %v8450_v25 = vld [vmem:[#allocation45_spill] sm:$0xff]  ;;  %v6408_v10 = vmax.f32 %v483_v11, 0.0  ;;  %v8455_v11 = vld [vmem:[#allocation38_spill] sm:$0xff] }
 0x2fc   : > { %8443 = vst [vmem:[#allocation154_spill] sm:$0xff] %v6380_v13  ;;  %v985_v29 = vmul.f32 %v8450_v25, %v5964_v42  ;;  %v986_v19 = vmul.f32 %v8455_v11, %v5942_v33  ;;  %v8491_v13 = vrot.slane %v6428_v16, 7 }
 0x2fd   : > { %8448 = vst [vmem:[#allocation156_spill] sm:$0xff] %v6400_v36  ;;  %v576_v12 = vrot.slane %v6408_v10, 7  ;;  %v8459_v36 = vld [vmem:[#allocation100_spill] sm:$0xff] }
 0x2fe   : > { %8451 = vst [vmem:[#allocation170_spill] sm:$0xff] %v6408_v10  ;;  %v4240_v37 = vpack.i.bf16 %v986_v19, %v985_v29 }
 0x2ff   : > { %4221 = vrot.lane.b32.xlu1 %v4220_v5, %s4848_s25  ;;  %v8452_v5 = vrot.slane %v6099_v30, 1  ;;  %8456 = vst [vmem:[#allocation174_spill] sm:$0xff] %v6428_v16 }
 0x300   : > { %4226 = vrot.lane.b32.xlu2 %v4225_v17, %s4847_s14  ;;  %v1834_v20 = vpop.permute.xlu1 %1833  ;;  %4321 = vrot.lane.b32.xlu0 %v4320_v48, %s4846_s23  ;;  %v8454_v48 = vld [vmem:[#allocation181_spill] sm:$0xff]  ;;  %8460 = vst [vmem:[#allocation192_spill] sm:$0xff] %v6440_v57  ;;  %v1025_v57 = vrot.slane %v6305_v34, 1 }
 0x301   : > { %v6404_v41 = vmul.f32 %v1834_v20, %v5977_v39  ;;  %v6414_v6 = vsel %vm1047_vm1, %v8452_v5, %v1022_v54  ;;  %v1851_v20 = vmul.f32 %v8454_v48, %v6041_v23  ;;  %v8457_v54 = vld [vmem:[#allocation72_spill] sm:$0xff]  ;;  %v8107_v48 = vrot.slane %v6428_v16, 7  ;;  %v8493_v39 = vld [vmem:[#allocation157_spill] sm:$0xff] }
 0x302   : > { %v6416_v17 = vpop.permute.xlu2 %1901  ;;  %v6424_v25 = vpop.permute.xlu0 %1941  ;;  %v1216_v5 = vmul.f32 %v8457_v54, %v6414_v6  ;;  %v8467_v54 = vld [vmem:[#allocation164_spill] sm:$0xff] }
 0x303   : > { %8449 = vst [vmem:[#allocation124_spill] sm:$0xff] %v6404_v41  ;;  %v4235_v14 = vpack.i.bf16 %v1851_v20, %v1850_v45  ;;  %v8458_v41 = vld [vmem:[#allocation194_spill] sm:$0xff]  ;;  %v8462_v45 = vrot.slane %v6307_v58, 7 }
 0x304   : > { %v4335_v27 = vpack.i.bf16 %v1217_v47, %v1216_v5  ;;  %v1370_v11 = vmul.f32 %v8459_v36, %v8458_v41  ;;  %v8465_v36 = vld [vmem:[#allocation198_spill] sm:$0xff] }
 0x305   : > { %v8466_v20 = vld [vmem:[#allocation94_spill] sm:$0xff] }
 0x306   : > { %v1371_v59 = vmul.f32 %v8466_v20, %v8465_v36  ;;  %v8470_v20 = vld [vmem:[#allocation158_spill] sm:$0xff] }
 0x307   : > { %4236 = vrot.lane.b32.xlu1 %v4235_v14, %s4848_s25  ;;  %v6450_v14 = vsel %vm598_vm0, %v8462_v45, %v576_v12  ;;  %v6468_v45 = vsel %vm598_vm0, %v576_v12, %v8107_v48  ;;  %v8472_v12 = vld [vmem:[#allocation178_spill] sm:$0xff] }
 0x308   : > { %4241 = vrot.lane.b32.xlu2 %v4240_v37, %s4847_s14  ;;  %v1846_v40 = vpop.permute.xlu1 %1845  ;;  %4336 = vrot.lane.b32.xlu0 %v4335_v27, %s4846_s23  ;;  %8463 = vst [vmem:[#allocation75_spill] sm:$0xff] %v6450_v14  ;;  %v8464_v37 = vld [vmem:[#allocation133_spill] sm:$0xff]  ;;  %v1698_v27 = vmul.f32 %v8467_v54, %v6450_v14  ;;  %v4250_v63 = vpack.i.bf16 %v1371_v59, %v1370_v11  ;;  %v8473_v59 = vld [vmem:[#allocation47_spill] sm:$0xff] }
 0x309   : > { %v6444_v19 = vmul.f32 %v1846_v40, %v5942_v33  ;;  %v1532_v29 = vmul.f32 %v8464_v37, %v6277_v31  ;;  %8468 = vst [vmem:[#allocation181_spill] sm:$0xff] %v6468_v45  ;;  %v8469_v37 = vld [vmem:[#allocation126_spill] sm:$0xff]  ;;  %v1699_v36 = vmul.f32 %v8470_v20, %v6468_v45  ;;  %v490_v54 = vadd.f32 %v5917_v50, %v8471_v51 }
 0x30a   : > { %v6454_v47 = vpop.permute.xlu2 %1913  ;;  %v6462_v5 = vpop.permute.xlu0 %1953  ;;  %v1533_v41 = vmul.f32 %v8469_v37, %v6290_v60  ;;  %v1024_v40 = vrot.slane %v6191_v24, 1  ;;  %v488_v48 = vadd.f32 %v5917_v50, %v8472_v12  ;;  %v987_v51 = vmul.f32 %v8473_v59, %v5935_v0  ;;  %v8474_v37 = vld [vmem:[#allocation204_spill] sm:$0xff]  ;;  %v8476_v12 = vld [vmem:[#allocation185_spill] sm:$0xff]  ;;  %v8478_v0 = vld [vmem:[#allocation199_spill] sm:$0xff] }
 0x30b   : > { %8461 = vst [vmem:[#allocation45_spill] sm:$0xff] %v6444_v19  ;;  %v4350_v32 = vpack.i.bf16 %v1699_v36, %v1698_v27  ;;  %v1852_v20 = vmul.f32 %v8474_v37, %v6099_v30  ;;  %v8475_v36 = vld [vmem:[#allocation78_spill] sm:$0xff]  ;;  %v1032_v42 = vrot.slane %v8478_v0, 1 }
 0x30c   : > { %v4255_v19 = vpack.i.bf16 %v1533_v41, %v1532_v29  ;;  %v6483_v11 = vsel %vm1047_vm1, %v1023_v8, %v1024_v40  ;;  %v6491_v29 = vmax.f32 %v490_v54, 0.0  ;;  %v6495_v50 = vsel %vm1047_vm1, %v1024_v40, %v1025_v57  ;;  %v8477_v54 = vld [vmem:[#allocation41_spill] sm:$0xff] }
 0x30d   : > { %v1218_v27 = vmul.f32 %v8475_v36, %v6483_v11  ;;  %v988_v37 = vmul.f32 %v8477_v54, %v5940_v46  ;;  %v6510_v40 = vmax.f32 %v488_v48, 0.0 }
 0x30e   : > { %v8117_v53 = vrot.slane %v6491_v29, 7 }
 0x30f   : > { %4251 = vrot.lane.b32.xlu1 %v4250_v63, %s4848_s25  ;;  %v2011_v63 = vmul.f32 %v6372_v21, %v6290_v60  ;;  %v8479_v21 = vld [vmem:[#allocation73_spill] sm:$0xff]  ;;  %v4270_v33 = vpack.i.bf16 %v988_v37, %v987_v51  ;;  %v578_v51 = vrot.slane %v6510_v40, 7 }
 0x310   : > { %4256 = vrot.lane.b32.xlu2 %v4255_v19, %s4847_s14  ;;  %4351 = vrot.lane.b32.xlu0 %v4350_v32, %s4846_s23  ;;  %v1853_v32 = vmul.f32 %v8476_v12, %v6113_v62  ;;  %v8113_v12 = vrot.slane %v6163_v56, 1 }
 0x311   : > { %v1890_v41 = vpop.permute.xlu1 %1889 }
 0x312   : > { %v2010_v8 = vmul.f32 %v1890_v41, %v6277_v31  ;;  %v6500_v19 = vpop.permute.xlu2 %1925  ;;  %v6506_v59 = vpop.permute.xlu0 %1965  ;;  %v4086_v31 = vld [vmem:[%s8048_s4 + $0x78] sm:$0xff]  ;;  %v1219_v41 = vmul.f32 %v8479_v21, %v6495_v50  ;;  %v4265_v36 = vpack.i.bf16 %v1853_v32, %v1852_v20  ;;  %v6527_v54 = vsel %vm1047_vm1, %v1032_v42, %v8113_v12  ;;  %v8481_v20 = vld [vmem:[#allocation103_spill] sm:$0xff] }
 0x313   : > { %3336 = vmatpush.bf16.msrb.mxu2 %v4086_v31  ;;  %v1372_v32 = vmul.f32 %v8481_v20, %v6062_v55  ;;  %v8484_v31 = vld [vmem:[#allocation127_spill] sm:$0xff]  ;;  %v8487_v20 = vld [vmem:[#allocation96_spill] sm:$0xff] }
 0x314   : > { %v3008_v60 = vpack.c.bf16 %v2011_v63, %v2010_v8  ;;  %v4365_v48 = vpack.i.bf16 %v1219_v41, %v1218_v27  ;;  %v8480_v63 = vld [vmem:[#allocation202_spill] sm:$0xff]  ;;  %v6535_v27 = vmul.f32 %v6424_v25, %v6527_v54  ;;  %v1534_v21 = vmul.f32 %v8484_v31, %v6414_v6  ;;  %v8485_v25 = vld [vmem:[#allocation136_spill] sm:$0xff]  ;;  %v8488_v55 = vld [vmem:[#allocation167_spill] sm:$0xff] }
 0x315   : > { %v8115_v8 = vrot.slane %v8480_v63, 1  ;;  %v1535_v41 = vmul.f32 %v8485_v25, %v6393_v43  ;;  %v6568_v31 = vsel %vm598_vm0, %v8491_v13, %v578_v51 }
 0x316   : > { %4018 = vmatmul.msk.bf16.gmra.mxu0 %vm2808_vm2, %v3008_v60  ;;  %8482 = vst [vmem:[#allocation38_spill] sm:$0xff] %v6535_v27  ;;  %v8504_v27 = vld [vmem:[#allocation99_spill] sm:$0xff] }
 0x317   : > { %4266 = vrot.lane.b32.xlu1 %v4265_v36, %s4848_s25  ;;  %v6542_v60 = vsel %vm1047_vm1, %v8115_v8, %v1032_v42  ;;  %8492 = vst [vmem:[#allocation94_spill] sm:$0xff] %v6568_v31 }
 0x318   : > { %4271 = vrot.lane.b32.xlu2 %v4270_v33, %s4847_s14  ;;  %4366 = vrot.lane.b32.xlu0 %v4365_v48, %s4846_s23  ;;  %v6548_v33 = vsel %vm598_vm0, %v578_v51, %v8117_v53  ;;  %v8486_v48 = vld [vmem:[#allocation210_spill] sm:$0xff]  ;;  %v1026_v53 = vrot.slane %v6307_v58, 1  ;;  %v8494_v51 = vld [vmem:[#allocation179_spill] sm:$0xff] }
 0x319   : > { %v1898_v37 = vpop.permute.xlu1 %1897  ;;  %8483 = vst [vmem:[#allocation72_spill] sm:$0xff] %v6548_v33  ;;  %v1373_v12 = vmul.f32 %v8487_v20, %v8486_v48  ;;  %v1701_v42 = vmul.f32 %v8488_v55, %v6548_v33  ;;  %v1700_v20 = vmul.f32 %v8493_v39, %v6568_v31  ;;  %v8122_v48 = vrot.slane %v6408_v10, 1 }
 0x31a   : > { %v1938_v36 = vpop.permute.xlu2 %1937  ;;  %v6561_v46 = vpop.permute.xlu0 %1977  ;;  %v4285_v33 = vpack.i.bf16 %v1535_v41, %v1534_v21  ;;  %v6581_v13 = vsel %vm1047_vm1, %v1025_v57, %v1026_v53  ;;  %v8495_v21 = vld [vmem:[#allocation208_spill] sm:$0xff] }
 0x31b   : > { %v6559_v8 = vmul.f32 %v1938_v36, %v6542_v60  ;;  %8490 = vst [vmem:[#allocation133_spill] sm:$0xff] %v6561_v46  ;;  %v4280_v25 = vpack.i.bf16 %v1373_v12, %v1372_v32  ;;  %v4085_v36 = vld [vmem:[%s8048_s4 + $0x70] sm:$0xff]  ;;  %v4380_v46 = vpack.i.bf16 %v1701_v42, %v1700_v20  ;;  %v6587_v39 = vsel %vm1047_vm1, %v1026_v53, %v8122_v48  ;;  %v8496_v42 = vld [vmem:[#allocation49_spill] sm:$0xff]  ;;  %v8497_v20 = vld [vmem:[#allocation50_spill] sm:$0xff] }
 0x31c   : > { %3337 = vmatpush.bf16.msrb.mxu2 %v4085_v36  ;;  %v2012_v12 = vmul.f32 %v1898_v37, %v6414_v6  ;;  %v1854_v32 = vmul.f32 %v8494_v51, %v6181_v3  ;;  %v1855_v41 = vmul.f32 %v8495_v21, %v6191_v24  ;;  %v990_v53 = vmul.f32 %v8497_v20, %v6041_v23  ;;  %v8499_v51 = vld [vmem:[#allocation81_spill] sm:$0xff] }
 0x31d   : > { %8489 = vst [vmem:[#allocation100_spill] sm:$0xff] %v6559_v8  ;;  %v2013_v6 = vmul.f32 %v6416_v17, %v6393_v43  ;;  %v1221_v21 = vmul.f32 %v8499_v51, %v6587_v39  ;;  %v580_v20 = vrot.slane %v8480_v63, 7  ;;  %v8127_v48 = vrot.slane %v8478_v0, 7  ;;  %v8502_v51 = vld [vmem:[#allocation211_spill] sm:$0xff]  ;;  %v8503_v8 = vld [vmem:[#allocation221_spill] sm:$0xff] }
 0x31e   : > { %v4295_v43 = vpack.i.bf16 %v1855_v41, %v1854_v32  ;;  %v8505_v32 = vld [vmem:[#allocation106_spill] sm:$0xff] }
 0x31f   : > { %4281 = vrot.lane.b32.xlu1 %v4280_v25, %s4848_s25  ;;  %v989_v25 = vmul.f32 %v8496_v42, %v6032_v28  ;;  %v4084_v42 = vld [vmem:[%s8048_s4 + $0x68] sm:$0xff]  ;;  %v8501_v28 = vld [vmem:[#allocation212_spill] sm:$0xff]  ;;  %v1375_v41 = vmul.f32 %v8505_v32, %v6153_v9 }
 0x320   : > { %4286 = vrot.lane.b32.xlu2 %v4285_v33, %s4847_s14  ;;  %4381 = vrot.lane.b32.xlu0 %v4380_v46, %s4846_s23  ;;  %v8498_v33 = vld [vmem:[#allocation77_spill] sm:$0xff]  ;;  %v3011_v46 = vpack.c.bf16 %v2013_v6, %v2012_v12  ;;  %v1038_v23 = vrot.slane %v8501_v28, 1  ;;  %v8128_v12 = vrot.slane %v8502_v51, 1  ;;  %v8130_v6 = vrot.slane %v6271_v1, 1  ;;  %v8511_v32 = vld [vmem:[#allocation159_spill] sm:$0xff] }
 0x321   : > { %v1910_v57 = vpop.permute.xlu1 %1909  ;;  %v1220_v36 = vmul.f32 %v8498_v33, %v6581_v13  ;;  %v4300_v17 = vpack.i.bf16 %v990_v53, %v989_v25  ;;  %3338 = vmatpush.bf16.msrb.mxu2 %v4084_v42  ;;  %v6629_v25 = vsel %vm598_vm0, %v580_v20, %v8127_v48  ;;  %v8507_v53 = vrot.slane %v6491_v29, 7  ;;  %v8509_v42 = vld [vmem:[#allocation129_spill] sm:$0xff]  ;;  %v8512_v48 = vld [vmem:[#allocation160_spill] sm:$0xff] }
 0x322   : > { %v6602_v37 = vpop.permute.xlu2 %1949  ;;  %v6608_v55 = vpop.permute.xlu0 %1989  ;;  %8506 = vst [vmem:[#allocation126_spill] sm:$0xff] %v6629_v25 }
 0x323   : > { %8500 = vst [vmem:[#allocation164_spill] sm:$0xff] %v6608_v55  ;;  %v4395_v33 = vpack.i.bf16 %v1221_v21, %v1220_v36  ;;  %v1374_v55 = vmul.f32 %v8504_v27, %v8503_v8  ;;  %v6635_v36 = vsel %vm598_vm0, %v8507_v53, %v580_v20  ;;  %v6644_v27 = vsel %vm1047_vm1, %v8128_v12, %v1038_v23 }
 0x324   : > { %8508 = vst [vmem:[#allocation158_spill] sm:$0xff] %v6635_v36  ;;  %v1536_v20 = vmul.f32 %v8509_v42, %v6483_v11  ;;  %v1703_v53 = vmul.f32 %v8511_v32, %v6629_v25  ;;  %v1702_v12 = vmul.f32 %v8512_v48, %v6635_v36  ;;  %v1028_v32 = vrot.slane %v6428_v16, 1 }
 0x325   : > { %v4310_v42 = vpack.i.bf16 %v1375_v41, %v1374_v55  ;;  %v8515_v55 = vld [vmem:[#allocation189_spill] sm:$0xff]  ;;  %v8516_v41 = vld [vmem:[#allocation52_spill] sm:$0xff] }
 0x326   : > { %4019 = vmatmul.msk.bf16.gmra.mxu0 %vm2808_vm2, %v3011_v46  ;;  %v6650_v46 = vsel %vm1047_vm1, %v1038_v23, %v8130_v6  ;;  %v8137_v6 = vrot.slane %v6510_v40, 1  ;;  %v4410_v45 = vpack.i.bf16 %v1703_v53, %v1702_v12  ;;  %v1856_v12 = vmul.f32 %v8515_v55, %v6305_v34  ;;  %v8520_v55 = vld [vmem:[#allocation74_spill] sm:$0xff] }
 0x327   : > { %4296 = vrot.lane.b32.xlu1 %v4295_v43, %s4848_s25  ;;  %v8510_v43 = vld [vmem:[#allocation130_spill] sm:$0xff]  ;;  %v2029_v9 = vmul.f32 %v6506_v59, %v6650_v46 }
 0x328   : > { %4301 = vrot.lane.b32.xlu2 %v4300_v17, %s4847_s14  ;;  %4396 = vrot.lane.b32.xlu0 %v4395_v33, %s4846_s23  ;;  %v1537_v17 = vmul.f32 %v8510_v43, %v6495_v50  ;;  %v4083_v43 = vld [vmem:[%s8048_s4 + $0x60] sm:$0xff]  ;;  %v6676_v59 = vsel %vm1047_vm1, %v1028_v32, %v8137_v6 }
 0x329   : > { %v6638_v21 = vpop.permute.xlu1 %1921  ;;  %3339 = vmatpush.bf16.msrb.mxu2 %v4083_v43 }
 0x32a   : > { %v1962_v33 = vpop.permute.xlu2 %1961  ;;  %v6663_v23 = vpop.permute.xlu0 %2001  ;;  %v4315_v25 = vpack.i.bf16 %v1537_v17, %v1536_v20  ;;  %v992_v20 = vmul.f32 %v8516_v41, %v6113_v62  ;;  %v8517_v17 = vrot.slane %v6408_v10, 1  ;;  %v1036_v62 = vrot.slane %v6219_v4, 1 }
 0x32b   : > { %v2028_v8 = vmul.f32 %v1962_v33, %v6644_v27  ;;  %8513 = vst [vmem:[#allocation183_spill] sm:$0xff] %v6663_v23  ;;  %v8518_v33 = vld [vmem:[#allocation80_spill] sm:$0xff] }
 0x32c   : > { %v1223_v53 = vmul.f32 %v8518_v33, %v6676_v59  ;;  %v582_v33 = vrot.slane %v6163_v56, 7 }
 0x32d   : > { %v3035_v31 = vpack.c.bf16 %v2029_v9, %v2028_v8  ;;  %v2015_v9 = vmul.f32 %v1910_v57, %v6495_v50  ;;  %v8514_v8 = vld [vmem:[#allocation182_spill] sm:$0xff]  ;;  %v6693_v50 = vsel %vm1047_vm1, %v8517_v17, %v1028_v32  ;;  %v2014_v57 = vmul.f32 %v6264_v22, %v6483_v11  ;;  %v4082_v22 = vld [vmem:[%s8048_s4 + $0x58] sm:$0xff] }
 0x32e   : > { %v1857_v48 = vmul.f32 %v8514_v8, %v6307_v58  ;;  %v1222_v41 = vmul.f32 %v8520_v55, %v6693_v50  ;;  %v1034_v32 = vrot.slane %v6165_v52, 1  ;;  %v1035_v17 = vrot.slane %v6217_v2, 1  ;;  %3340 = vmatpush.bf16.msrb.mxu2 %v4082_v22 }
 0x32f   : > { %4027 = vmatmul.msk.bf16.vlgmr.msra.gmra.mxu3 %vm2808_vm2, %v3035_v31  ;;  %4311 = vrot.lane.b32.xlu1 %v4310_v42, %s4848_s25  ;;  %v8519_v42 = vld [vmem:[#allocation44_spill] sm:$0xff]  ;;  %v3014_v8 = vpack.c.bf16 %v2015_v9, %v2014_v57  ;;  %v4078_v9 = vld [vmem:[%s8048_s4 + $0x38] sm:$0xff] }
 0x330   : > { %4316 = vrot.lane.b32.xlu2 %v4315_v25, %s4847_s14  ;;  %4411 = vrot.lane.b32.xlu0 %v4410_v45, %s4846_s23  ;;  %v991_v43 = vmul.f32 %v8519_v42, %v6099_v30  ;;  %v4325_v6 = vpack.i.bf16 %v1857_v48, %v1856_v12  ;;  %v4425_v57 = vpack.i.bf16 %v1223_v53, %v1222_v41  ;;  %v8521_v48 = vrot.slane %v6163_v56, 1  ;;  %v8522_v53 = vld [vmem:[#allocation102_spill] sm:$0xff]  ;;  %v8525_v41 = vld [vmem:[#allocation139_spill] sm:$0xff]  ;;  %v4077_v56 = vld [vmem:[%s8048_s4 + $0x30] sm:$0xff] }
 0x331   : > { %v6685_v31 = vpop.permute.xlu1 %1933  ;;  %3247 = vmatpush.bf16.msrb.mxu1 %v4078_v9  ;;  %v1538_v22 = vmul.f32 %v8525_v41, %v6581_v13  ;;  %v2017_v30 = vmul.f32 %v6319_v7, %v6587_v39 }
 0x332   : > { %v6697_v25 = vpop.permute.xlu2 %1973  ;;  %v6701_v45 = vpop.permute.xlu0 %4201  ;;  %v4330_v11 = vpack.i.bf16 %v992_v20, %v991_v43  ;;  %v6724_v12 = vsel %vm1047_vm1, %v8521_v48, %v1034_v32  ;;  %v6728_v20 = vsel %vm1047_vm1, %v1034_v32, %v1035_v17  ;;  %v1377_v43 = vmul.f32 %v8522_v53, %v6251_v15  ;;  %v8528_v53 = vld [vmem:[#allocation171_spill] sm:$0xff] }
 0x333   : > { %v8529_v15 = vrot.slane %v6165_v52, 7 }
 0x335   : > { %v6760_v41 = vsel %vm598_vm0, %v582_v33, %v8529_v15  ;;  %v4081_v15 = vld [vmem:[%s8048_s4 + $0x50] sm:$0xff]  ;;  %3248 = vmatpush.bf16.msrb.mxu1 %v4077_v56  ;;  %v8534_v56 = vrot.slane %v8502_v51, 1 }
 0x336   : > { %4020 = vmatmul.msk.bf16.gmra.mxu0 %vm2808_vm2, %v3014_v8  ;;  %v8523_v8 = vrot.slane %v8478_v0, 7  ;;  %8530 = vst [vmem:[#allocation204_spill] sm:$0xff] %v6760_v41  ;;  %3341 = vmatpush.bf16.msrb.mxu2 %v4081_v15 }
 0x337   : > { %4326 = vrot.lane.b32.xlu1 %v4325_v6, %s4848_s25 }
 0x338   : > { %4331 = vrot.lane.b32.xlu2 %v4330_v11, %s4847_s14  ;;  %4426 = vrot.lane.b32.xlu0 %v4425_v57, %s4846_s23  ;;  %v6737_v55 = vsel %vm598_vm0, %v8523_v8, %v582_v33  ;;  %v6743_v11 = vmul.f32 %v6602_v37, %v6728_v20  ;;  %v8527_v57 = vld [vmem:[#allocation98_spill] sm:$0xff]  ;;  %v8531_v37 = vld [vmem:[#allocation131_spill] sm:$0xff]  ;;  %v1030_v33 = vrot.slane %v6491_v29, 1 }
 0x339   : > { %v1946_v6 = vpop.permute.xlu1 %1945  ;;  %8524 = vst [vmem:[#allocation178_spill] sm:$0xff] %v6737_v55  ;;  %v1376_v48 = vmul.f32 %v8527_v57, %v6245_v38  ;;  %v1704_v42 = vmul.f32 %v8528_v53, %v6737_v55  ;;  %v8532_v38 = vld [vmem:[#allocation162_spill] sm:$0xff] }
 0x33a   : > { %v6746_v32 = vmul.f32 %v1946_v6, %v6724_v12  ;;  %v6748_v9 = vpop.permute.xlu2 %1985  ;;  %v6754_v8 = vpop.permute.xlu0 %4216  ;;  %v1539_v6 = vmul.f32 %v8531_v37, %v6587_v39  ;;  %v1705_v53 = vmul.f32 %v8532_v38, %v6760_v41  ;;  %v8533_v38 = vrot.slane %v6510_v40, 1 }
 0x33b   : > { %v4340_v57 = vpack.i.bf16 %v1377_v43, %v1376_v48  ;;  %v4076_v43 = vld [vmem:[%s8048_s4 + $0x28] sm:$0xff] }
 0x33c   : > { %8526 = vst [vmem:[#allocation47_spill] sm:$0xff] %v6746_v32  ;;  %v4345_v37 = vpack.i.bf16 %v1539_v6, %v1538_v22  ;;  %v4440_v23 = vpack.i.bf16 %v1705_v53, %v1704_v42  ;;  %v6784_v48 = vsel %vm1047_vm1, %v8533_v38, %v1030_v33  ;;  %v2016_v22 = vmul.f32 %v6454_v47, %v6581_v13 }
 0x33d   : > { %v6795_v42 = vsel %vm1047_vm1, %v1036_v62, %v8534_v56  ;;  %v6799_v6 = vsel %vm1047_vm1, %v1035_v17, %v1036_v62  ;;  %v8536_v47 = vrot.slane %v8480_v63, 1  ;;  %v8538_v17 = vld [vmem:[#allocation46_spill] sm:$0xff]  ;;  %v584_v56 = vrot.slane %v6217_v2, 7  ;;  %3249 = vmatpush.bf16.msrb.mxu1 %v4076_v43 }
 0x33e   : > { %v6812_v39 = vmul.f32 %v6462_v5, %v6799_v6  ;;  %v8153_v5 = vrot.slane %v6219_v4, 7  ;;  %v3017_v55 = vpack.c.bf16 %v2017_v30, %v2016_v22  ;;  %v1040_v2 = vrot.slane %v6273_v18, 1  ;;  %v4075_v43 = vld [vmem:[%s8048_s4 + $0x20] sm:$0xff] }
 0x33f   : > { %4341 = vrot.lane.b32.xlu1 %v4340_v57, %s4848_s25  ;;  %v8535_v57 = vld [vmem:[#allocation214_spill] sm:$0xff]  ;;  %v6808_v13 = vsel %vm1047_vm1, %v1030_v33, %v8536_v47  ;;  %v8540_v33 = vld [vmem:[#allocation195_spill] sm:$0xff]  ;;  %v8152_v32 = vrot.slane %v6327_v35, 1 }
 0x340   : > { %4346 = vrot.lane.b32.xlu2 %v4345_v37, %s4847_s14  ;;  %v1858_v53 = vmul.f32 %v8535_v57, %v6408_v10  ;;  %4441 = vrot.lane.b32.xlu0 %v4440_v23, %s4846_s23  ;;  %8537 = vst [vmem:[#allocation78_spill] sm:$0xff] %v6812_v39  ;;  %v994_v37 = vmul.f32 %v8538_v17, %v6191_v24  ;;  %v8539_v23 = vld [vmem:[#allocation84_spill] sm:$0xff]  ;;  %v8547_v17 = vld [vmem:[#allocation101_spill] sm:$0xff] }
 0x341   : > { %v1958_v7 = vpop.permute.xlu1 %1957  ;;  %v1224_v38 = vmul.f32 %v8539_v23, %v6784_v48  ;;  %v1859_v57 = vmul.f32 %v8540_v33, %v6428_v16  ;;  %v8542_v24 = vld [vmem:[#allocation76_spill] sm:$0xff]  ;;  %3250 = vmatpush.bf16.msrb.mxu1 %v4075_v43 }
 0x342   : > { %v6815_v15 = vmul.f32 %v1958_v7, %v6795_v42  ;;  %v6817_v62 = vpop.permute.xlu2 %1997  ;;  %v6826_v47 = vpop.permute.xlu0 %4231  ;;  %v8541_v7 = vld [vmem:[#allocation53_spill] sm:$0xff]  ;;  %v1225_v23 = vmul.f32 %v8542_v24, %v6808_v13 }
 0x343   : > { %v993_v41 = vmul.f32 %v8541_v7, %v6181_v3  ;;  %v4355_v33 = vpack.i.bf16 %v1859_v57, %v1858_v53  ;;  %v4080_v7 = vld [vmem:[%s8048_s4 + $0x48] sm:$0xff]  ;;  %v4074_v24 = vld [vmem:[%s8048_s4 + $0x18] sm:$0xff]  ;;  %v8543_v53 = vrot.slane %v6271_v1, 1 }
 0x344   : > { %v4455_v22 = vpack.i.bf16 %v1225_v23, %v1224_v38  ;;  %3342 = vmatpush.bf16.msrb.mxu2 %v4080_v7  ;;  %v6867_v38 = vsel %vm598_vm0, %v584_v56, %v8153_v5  ;;  %v8546_v7 = vld [vmem:[#allocation142_spill] sm:$0xff]  ;;  %v8548_v5 = vld [vmem:[#allocation175_spill] sm:$0xff] }
 0x345   : > { %v4360_v30 = vpack.i.bf16 %v994_v37, %v993_v41  ;;  %v6853_v57 = vsel %vm1047_vm1, %v8543_v53, %v1040_v2  ;;  %v8544_v41 = vld [vmem:[#allocation109_spill] sm:$0xff]  ;;  %3251 = vmatpush.bf16.msrb.mxu1 %v4074_v24 }
 0x346   : > { %4021 = vmatmul.msk.bf16.gmra.mxu0 %vm2808_vm2, %v3017_v55  ;;  %v6859_v55 = vsel %vm1047_vm1, %v1040_v2, %v8152_v32  ;;  %v1378_v37 = vmul.f32 %v8544_v41, %v6368_v44  ;;  %v1379_v32 = vmul.f32 %v8547_v17, %v6362_v26  ;;  %v4073_v17 = vld [vmem:[%s8048_s4 + $0x10] sm:$0xff] }
 0x347   : > { %4356 = vrot.lane.b32.xlu1 %v4355_v33, %s4848_s25  ;;  %v8545_v33 = vld [vmem:[#allocation132_spill] sm:$0xff]  ;;  %v2031_v2 = vmul.f32 %v6697_v25, %v6859_v55 }
 0x348   : > { %4361 = vrot.lane.b32.xlu2 %v4360_v30, %s4847_s14  ;;  %4456 = vrot.lane.b32.xlu0 %v4455_v22, %s4846_s23  ;;  %v1540_v43 = vmul.f32 %v8545_v33, %v6693_v50  ;;  %v1541_v30 = vmul.f32 %v8546_v7, %v6676_v59  ;;  %v1707_v22 = vmul.f32 %v8548_v5, %v6867_v38  ;;  %v8549_v33 = vrot.slane %v6165_v52, 7  ;;  %v4079_v5 = vld [vmem:[%s8048_s4 + $0x40] sm:$0xff] }
 0x349   : > { %v1970_v23 = vpop.permute.xlu1 %1969  ;;  %v4370_v3 = vpack.i.bf16 %v1379_v32, %v1378_v37  ;;  %3252 = vmatpush.bf16.msrb.mxu1 %v4073_v17  ;;  %v4072_v32 = vld [vmem:[%s8048_s4 + $0x8] sm:$0xff]  ;;  %3343 = vmatpush.bf16.msrb.mxu2 %v4079_v5  ;;  %v8552_v37 = vld [vmem:[#allocation220_spill] sm:$0xff] }
 0x34a   : > { %v2030_v53 = vmul.f32 %v1970_v23, %v6853_v57  ;;  %v6877_v41 = vpop.permute.xlu2 %4196  ;;  %v6883_v44 = vpop.permute.xlu0 %4246  ;;  %v6889_v7 = vsel %vm598_vm0, %v8549_v33, %v584_v56  ;;  %v8551_v23 = vld [vmem:[#allocation161_spill] sm:$0xff]  ;;  %v4375_v24 = vpack.i.bf16 %v1541_v30, %v1540_v43  ;;  %v2018_v56 = vmul.f32 %v6638_v21, %v6693_v50  ;;  %v8554_v21 = vld [vmem:[#allocation56_spill] sm:$0xff]  ;;  %v8555_v33 = vld [vmem:[#allocation83_spill] sm:$0xff] }
 0x34b   : > { %8550 = vst [vmem:[#allocation185_spill] sm:$0xff] %v6889_v7  ;;  %v1706_v39 = vmul.f32 %v8551_v23, %v6889_v7  ;;  %v996_v50 = vmul.f32 %v8554_v21, %v6307_v58  ;;  %v8556_v23 = vld [vmem:[#allocation87_spill] sm:$0xff]  ;;  %v8557_v17 = vld [vmem:[#allocation224_spill] sm:$0xff]  ;;  %v4071_v21 = vld [vmem:[%s8048_s4] sm:$0xff] }
 0x34c   : > { %v3038_v25 = vpack.c.bf16 %v2031_v2, %v2030_v53  ;;  %v1861_v2 = vmul.f32 %v8552_v37, %v6491_v29  ;;  %v8553_v53 = vld [vmem:[#allocation55_spill] sm:$0xff]  ;;  %v1043_v5 = vrot.slane %v8557_v17, 1 }
 0x34d   : > { %v4470_v26 = vpack.i.bf16 %v1707_v22, %v1706_v39  ;;  %v1042_v39 = vrot.slane %v6329_v49, 1  ;;  %v995_v22 = vmul.f32 %v8553_v53, %v6305_v34  ;;  %3253 = vmatpush.bf16.msrb.mxu1 %v4072_v32  ;;  %v586_v53 = vrot.slane %v8502_v51, 7  ;;  %v8589_v7 = vld [vmem:[#allocation203_spill] sm:$0xff] }
 0x34e   : > { %4028 = vmatmul.msk.bf16.gmra.mxu3 %vm2808_vm2, %v3038_v25  ;;  %v1226_v25 = vmul.f32 %v8555_v33, %v6542_v60  ;;  %v587_v33 = vrot.slane %v8501_v28, 7 }
 0x34f   : > { %4371 = vrot.lane.b32.xlu1 %v4370_v3, %s4848_s25  ;;  %v2019_v3 = vmul.f32 %v6500_v19, %v6676_v59 }
 0x350   : > { %4376 = vrot.lane.b32.xlu2 %v4375_v24, %s4847_s14  ;;  %4471 = vrot.lane.b32.xlu0 %v4470_v26, %s4846_s23  ;;  %v1227_v26 = vmul.f32 %v8556_v23, %v6527_v54  ;;  %v8558_v24 = vld [vmem:[#allocation186_spill] sm:$0xff]  ;;  %v4390_v23 = vpack.i.bf16 %v996_v50, %v995_v22  ;;  %v8564_v50 = vld [vmem:[#allocation105_spill] sm:$0xff] }
 0x351   : > { %v1982_v43 = vpop.permute.xlu1 %1981  ;;  %v1860_v37 = vmul.f32 %v8558_v24, %v6510_v40  ;;  %v3020_v59 = vpack.c.bf16 %v2019_v3, %v2018_v56  ;;  %v6936_v24 = vsel %vm1047_vm1, %v1042_v39, %v1043_v5  ;;  %3254 = vmatpush.bf16.msrb.mxu1 %v4071_v21  ;;  %v8560_v56 = vrot.slane %v6219_v4, 7  ;;  %v8568_v21 = vld [vmem:[#allocation134_spill] sm:$0xff] }
 0x352   : > { %v6913_v30 = vpop.permute.xlu2 %4211  ;;  %v6926_v19 = vpop.permute.xlu0 %4261  ;;  %v4485_v58 = vpack.i.bf16 %v1227_v26, %v1226_v25  ;;  %8559 = vst [vmem:[#allocation41_spill] sm:$0xff] %v6936_v24  ;;  %v2033_v32 = vmul.f32 %v1982_v43, %v6936_v24  ;;  %v8562_v3 = vrot.slane %v6327_v35, 1  ;;  %v8565_v25 = vld [vmem:[#allocation181_spill] sm:$0xff]  ;;  %v8566_v26 = vld [vmem:[#allocation112_spill] sm:$0xff] }
 0x353   : > { %v4385_v34 = vpack.i.bf16 %v1861_v2, %v1860_v37  ;;  %v6945_v2 = vsel %vm598_vm0, %v8560_v56, %v586_v53  ;;  %v1381_v43 = vmul.f32 %v8566_v26, %v8565_v25  ;;  %v8571_v26 = vld [vmem:[#allocation163_spill] sm:$0xff]  ;;  %v8572_v25 = vld [vmem:[#allocation165_spill] sm:$0xff] }
 0x354   : > { %8561 = vst [vmem:[#allocation199_spill] sm:$0xff] %v6945_v2  ;;  %v6951_v22 = vsel %vm1047_vm1, %v8562_v3, %v1042_v39  ;;  %v8569_v39 = vld [vmem:[#allocation135_spill] sm:$0xff]  ;;  %v8570_v3 = vld [vmem:[#allocation133_spill] sm:$0xff]  ;;  %v1708_v51 = vmul.f32 %v8572_v25, %v6945_v2  ;;  %v8587_v2 = vld [vmem:[#allocation94_spill] sm:$0xff] }
 0x355   : > { %8563 = vst [vmem:[#allocation73_spill] sm:$0xff] %v6951_v22  ;;  %v1543_v56 = vmul.f32 %v8569_v39, %v6808_v13  ;;  %v2021_v39 = vmul.f32 %v6685_v31, %v6808_v13  ;;  %v8576_v31 = vld [vmem:[#allocation58_spill] sm:$0xff] }
 0x356   : > { %4022 = vmatmul.msk.bf16.gmra.mxu0 %vm2808_vm2, %v3020_v59  ;;  %v6962_v59 = vsel %vm598_vm0, %v586_v53, %v587_v33  ;;  %v8577_v13 = vld [vmem:[#allocation86_spill] sm:$0xff] }
 0x357   : > { %4386 = vrot.lane.b32.xlu1 %v4385_v34, %s4848_s25  ;;  %v1380_v34 = vmul.f32 %v8564_v50, %v6450_v14  ;;  %8567 = vst [vmem:[#allocation202_spill] sm:$0xff] %v6962_v59  ;;  %v2032_v50 = vmul.f32 %v8570_v3, %v6951_v22  ;;  %v4198_v3 = vunpack.i.l.bf16 %v6877_v41  ;;  %v8588_v22 = vld [vmem:[#allocation104_spill] sm:$0xff] }
 0x358   : > { %4391 = vrot.lane.b32.xlu2 %v4390_v23, %s4847_s14  ;;  %4486 = vrot.lane.b32.xlu0 %v4485_v58, %s4846_s23  ;;  %v1542_v23 = vmul.f32 %v8568_v21, %v6784_v48  ;;  %v1709_v58 = vmul.f32 %v8571_v26, %v6962_v59  ;;  %v588_v26 = vrot.slane %v6271_v1, 7  ;;  %v8579_v59 = vld [vmem:[#allocation48_spill] sm:$0xff] }
 0x359   : > { %v6958_v37 = vpop.permute.xlu1 %1993  ;;  %v3041_v53 = vpack.c.bf16 %v2033_v32, %v2032_v50  ;;  %v4400_v24 = vpack.i.bf16 %v1381_v43, %v1380_v34  ;;  %v8573_v32 = vld [vmem:[#allocation225_spill] sm:$0xff]  ;;  %v8574_v43 = vld [vmem:[#allocation196_spill] sm:$0xff]  ;;  %v1229_v50 = vmul.f32 %v8577_v13, %v6728_v20  ;;  %v8581_v13 = vld [vmem:[#allocation79_spill] sm:$0xff] }
 0x35a   : > { %v6970_v14 = vpop.permute.xlu2 %4226  ;;  %v6976_v28 = vpop.permute.xlu0 %4276  ;;  %v4405_v4 = vpack.i.bf16 %v1543_v56, %v1542_v23  ;;  %v4500_v21 = vpack.i.bf16 %v1709_v58, %v1708_v51  ;;  %v1044_v34 = vrot.slane %v8573_v32, 1  ;;  %v594_v23 = vrot.slane %v8574_v43, 7  ;;  %v8575_v51 = vld [vmem:[#allocation154_spill] sm:$0xff] }
 0x35b   : > { %v8177_v58 = vrot.slane %v8573_v32, 7 }
 0x35e   : > { %4029 = vmatmul.msk.bf16.gmra.mxu3 %vm2808_vm2, %v3041_v53 }
 0x35f   : > { %4401 = vrot.lane.b32.xlu1 %v4400_v24, %s4848_s25  ;;  %v2020_v24 = vmul.f32 %v8575_v51, %v6784_v48  ;;  %v997_v48 = vmul.f32 %v8579_v59, %v6408_v10  ;;  %v8580_v51 = vrot.slane %v6273_v18, 7  ;;  %v7025_v59 = vsel %vm598_vm0, %v8177_v58, %v594_v23 }
 0x360   : > { %4406 = vrot.lane.b32.xlu2 %v4405_v4, %s4847_s14  ;;  %4501 = vrot.lane.b32.xlu0 %v4500_v21, %s4846_s23  ;;  %v998_v4 = vmul.f32 %v8576_v31, %v6428_v16  ;;  %v4199_v21 = vunpack.i.h.bf16 %v6877_v41  ;;  %v1228_v16 = vmul.f32 %v8581_v13, %v6724_v12  ;;  %v7019_v41 = vsel %vm1047_vm1, %v1043_v5, %v1044_v34 }
 0x361   : > { %v6986_v25 = vpop.permute.xlu1 %2005  ;;  %v3023_v53 = vpack.c.bf16 %v2021_v39, %v2020_v24  ;;  %v7009_v31 = vsel %vm598_vm0, %v588_v26, %v8580_v51  ;;  %v7015_v39 = vsel %vm598_vm0, %v587_v33, %v588_v26  ;;  %8582 = vst [vmem:[#allocation127_spill] sm:$0xff] %v7019_v41  ;;  %v8583_v24 = vld [vmem:[#allocation197_spill] sm:$0xff]  ;;  %v8585_v13 = vrot.slane %v8574_v43, 1 }
 0x362   : > { %v6992_v56 = vpop.permute.xlu2 %4241  ;;  %v7001_v1 = vpop.permute.xlu0 %4291  ;;  %v8584_v51 = vrot.slane %v8583_v24, 7  ;;  %v4420_v33 = vpack.i.bf16 %v998_v4, %v997_v48  ;;  %v4515_v26 = vpack.i.bf16 %v1229_v50, %v1228_v16  ;;  %v1382_v58 = vmul.f32 %v8588_v22, %v8587_v2  ;;  %v8593_v4 = vld [vmem:[#allocation108_spill] sm:$0xff]  ;;  %v8594_v50 = vld [vmem:[#allocation191_spill] sm:$0xff]  ;;  %v8595_v43 = vld [vmem:[#allocation193_spill] sm:$0xff] }
 0x363   : > { %8578 = vst [vmem:[#allocation103_spill] sm:$0xff] %v7001_v1  ;;  %v7038_v5 = vsel %vm1047_vm1, %v1044_v34, %v8585_v13  ;;  %v2034_v24 = vmul.f32 %v6748_v9, %v7019_v41  ;;  %v2908_v48 = vsel %vm2808_vm2, %v8594_v50, %v4199_v21  ;;  %v2907_v34 = vsel %vm2808_vm2, %v8595_v43, %v4198_v3  ;;  %v8596_v22 = vld [vmem:[#allocation164_spill] sm:$0xff] }
 0x364   : > { %v7031_v10 = vsel %vm598_vm0, %v594_v23, %v8584_v51  ;;  %8586 = vst [vmem:[#allocation136_spill] sm:$0xff] %v7038_v5  ;;  %v8590_v23 = vld [vmem:[#allocation206_spill] sm:$0xff]  ;;  %v2035_v9 = vmul.f32 %v8596_v22, %v7038_v5  ;;  %v4204_v13 = vunpack.i.h.bf16 %v6701_v45  ;;  %v8599_v22 = vld [vmem:[#allocation177_spill] sm:$0xff]  ;;  %v4214_v41 = vunpack.i.h.bf16 %v6913_v30 }
 0x365   : > { %v8591_v51 = vpack.i.bf16 %v8589_v7, %v8590_v23  ;;  %v4203_v7 = vunpack.i.l.bf16 %v6701_v45  ;;  %v4213_v5 = vunpack.i.l.bf16 %v6913_v30 }
 0x366   : > { %4023 = vmatmul.msk.bf16.gmra.mxu0 %vm2808_vm2, %v3023_v53  ;;  %v8592_v53 = vld [vmem:[#allocation72_spill] sm:$0xff]  ;;  %v3044_v2 = vpack.c.bf16 %v2035_v9, %v2034_v24 }
 0x367   : > { %4416 = vrot.lane.b32.xlu1 %v8591_v51, %s4848_s25  ;;  %v1383_v16 = vmul.f32 %v8593_v4, %v8592_v53  ;;  %v8597_v51 = vld [vmem:[#allocation137_spill] sm:$0xff]  ;;  %v1710_v53 = vmul.f32 %v8599_v22, %v7015_v39  ;;  %v2939_v45 = vsel %vm2841_vm3, %v2907_v34, %v4203_v7  ;;  %v8601_v22 = vld [vmem:[#allocation15_spill] sm:$0xff]  ;;  %v8602_v34 = vld [vmem:[#allocation18_spill] sm:$0xff]  ;;  %v590_v7 = vrot.slane %v6327_v35, 7 }
 0x368   : > { %4421 = vrot.lane.b32.xlu2 %v4420_v33, %s4847_s14  ;;  %4516 = vrot.lane.b32.xlu0 %v4515_v26, %s4846_s23  ;;  %v1545_v21 = vmul.f32 %v8597_v51, %v6527_v54  ;;  %v8598_v4 = vld [vmem:[#allocation145_spill] sm:$0xff]  ;;  %v2940_v26 = vsel %vm2841_vm3, %v2908_v48, %v4204_v13  ;;  %v823_v24 = vmul.f32 %v8601_v22, %v7025_v59 }
 0x369   : > { %v4207_v23 = vpop.permute.xlu1 %4206  ;;  %v1544_v3 = vmul.f32 %v8598_v4, %v6542_v60  ;;  %v4430_v51 = vpack.i.bf16 %v1383_v16, %v1382_v58  ;;  %v824_v9 = vmul.f32 %v8602_v34, %v7031_v10  ;;  %v8606_v34 = vld [vmem:[#allocation82_spill] sm:$0xff] }
 0x36a   : > { %v4209_v43 = vunpack.i.h.bf16 %v4207_v23  ;;  %v4208_v33 = vunpack.i.l.bf16 %v4207_v23  ;;  %v7064_v50 = vpop.permute.xlu2 %4256  ;;  %v8600_v23 = vld [vmem:[#allocation168_spill] sm:$0xff]  ;;  %v7080_v13 = vpop.permute.xlu0 %4306  ;;  %v2809_v16 = vsel %vm2808_vm2, %v823_v24, %v4213_v5 }
 0x36b   : > { %v1711_v4 = vmul.f32 %v8600_v23, %v7009_v31  ;;  %v4435_v48 = vpack.i.bf16 %v1545_v21, %v1544_v3  ;;  %v2810_v58 = vsel %vm2808_vm2, %v824_v9, %v4214_v41  ;;  %v4218_v21 = vunpack.i.l.bf16 %v6754_v8  ;;  %v8603_v41 = vld [vmem:[#allocation51_spill] sm:$0xff] }
 0x36c   : > { %v2971_v54 = vsel %vm2874_vm4, %v2939_v45, %v4208_v33  ;;  %v2972_v60 = vsel %vm2874_vm4, %v2940_v26, %v4209_v43  ;;  %v4219_v43 = vunpack.i.h.bf16 %v6754_v8  ;;  %v1000_v5 = vmul.f32 %v8603_v41, %v6491_v29  ;;  %v8604_v45 = vld [vmem:[#allocation90_spill] sm:$0xff] }
 0x36d   : > { %v3004_v1 = vpack.c.bf16 %v2972_v60, %v2971_v54  ;;  %v4530_v30 = vpack.i.bf16 %v1711_v4, %v1710_v53  ;;  %v1230_v26 = vmul.f32 %v8604_v45, %v6799_v6  ;;  %v8605_v54 = vld [vmem:[#allocation59_spill] sm:$0xff]  ;;  %v2842_v8 = vsel %vm2841_vm3, %v2809_v16, %v4218_v21  ;;  %v8611_v21 = vld [vmem:[#allocation200_spill] sm:$0xff] }
 0x36e   : > { %4030 = vmatmul.msk.bf16.gmra.mxu3 %vm2808_vm2, %v3044_v2  ;;  %v8186_v2 = vrot.slane %v6329_v49, 7  ;;  %v999_v60 = vmul.f32 %v8605_v54, %v6510_v40  ;;  %v4229_v23 = vunpack.i.h.bf16 %v6970_v14  ;;  %v4228_v4 = vunpack.i.l.bf16 %v6970_v14  ;;  %v8613_v45 = vld [vmem:[#allocation228_spill] sm:$0xff] }
 0x36f   : > { %3344 = vmatmul.bf16.vlgmr.msrb.gmra.mxu2 %v3004_v1  ;;  %4431 = vrot.lane.b32.xlu1 %v4430_v51, %s4848_s25  ;;  %v2843_v51 = vsel %vm2841_vm3, %v2810_v58, %v4219_v43  ;;  %v1231_v9 = vmul.f32 %v8606_v34, %v6795_v42  ;;  %v8610_v58 = vrot.slane %v6273_v18, 7 }
 0x370   : > { %4436 = vrot.lane.b32.xlu2 %v4435_v48, %s4847_s14  ;;  %4531 = vrot.lane.b32.xlu0 %v4530_v30, %s4846_s23  ;;  %v8607_v30 = vld [vmem:[#allocation38_spill] sm:$0xff]  ;;  %v4450_v16 = vpack.i.bf16 %v1000_v5, %v999_v60  ;;  %v7130_v5 = vsel %vm598_vm0, %v590_v7, %v8186_v2  ;;  %v4243_v2 = vunpack.i.l.bf16 %v6992_v56 }
 0x371   : > { %v4222_v3 = vpop.permute.xlu1 %4221  ;;  %v7116_v43 = vsel %vm598_vm0, %v8610_v58, %v590_v7  ;;  %v4545_v14 = vpack.i.bf16 %v1231_v9, %v1230_v26  ;;  %v8617_v60 = vld [vmem:[#allocation190_spill] sm:$0xff]  ;;  %v8619_v9 = vld [vmem:[#allocation115_spill] sm:$0xff]  ;;  %v4233_v7 = vunpack.i.l.bf16 %v6826_v47 }
 0x372   : > { %v7092_v1 = vpop.permute.xlu2 %4271  ;;  %v4224_v53 = vunpack.i.h.bf16 %v4222_v3  ;;  %v4223_v33 = vunpack.i.l.bf16 %v4222_v3  ;;  %v8608_v3 = vld [vmem:[#allocation100_spill] sm:$0xff]  ;;  %v2910_v26 = vsel %vm2808_vm2, %v8617_v60, %v4229_v23  ;;  %v7136_v34 = vpop.permute.xlu0 %4321  ;;  %v8621_v58 = vld [vmem:[#allocation138_spill] sm:$0xff] }
 0x373   : > { %v8609_v41 = vpack.c.bf16 %v8607_v30, %v8608_v3  ;;  %v8620_v30 = vld [vmem:[#allocation201_spill] sm:$0xff]  ;;  %v8623_v60 = vld [vmem:[#allocation180_spill] sm:$0xff] }
 0x374   : > { %v2875_v22 = vsel %vm2874_vm4, %v2842_v8, %v4223_v33  ;;  %v2876_v24 = vsel %vm2874_vm4, %v2843_v51, %v4224_v53  ;;  %v2036_v53 = vmul.f32 %v6958_v37, %v8611_v21  ;;  %v8612_v33 = vld [vmem:[#allocation227_spill] sm:$0xff]  ;;  %v8615_v8 = vld [vmem:[#allocation126_spill] sm:$0xff]  ;;  %v2037_v3 = vmul.f32 %v6817_v62, %v8620_v30 }
 0x375   : > { %v3003_v48 = vpack.c.bf16 %v2876_v24, %v2875_v22  ;;  %v8614_v54 = vpack.i.bf16 %v8612_v33, %v8613_v45  ;;  %v8616_v51 = vld [vmem:[#allocation107_spill] sm:$0xff]  ;;  %v8618_v24 = vld [vmem:[#allocation188_spill] sm:$0xff]  ;;  %v1713_v62 = vmul.f32 %v8623_v60, %v7130_v5  ;;  %v8626_v60 = vld [vmem:[#allocation14_spill] sm:$0xff] }
 0x376   : > { %4024 = vmatmul.msk.bf16.gmra.mxu0 %vm2808_vm2, %v8609_v41  ;;  %v1385_v22 = vmul.f32 %v8616_v51, %v8615_v8  ;;  %v2909_v37 = vsel %vm2808_vm2, %v8618_v24, %v4228_v4  ;;  %v4234_v41 = vunpack.i.h.bf16 %v6826_v47  ;;  %v1546_v4 = vmul.f32 %v8621_v58, %v6724_v12  ;;  %v8622_v33 = vld [vmem:[#allocation148_spill] sm:$0xff]  ;;  %v8625_v8 = vld [vmem:[#allocation243_spill] sm:$0xff] }
 0x377   : > { %4446 = vrot.lane.b32.xlu1 %v8614_v54, %s4848_s25  ;;  %3255 = vmatmul.bf16.vlgmr.msrb.gmra.mxu1 %v3003_v48  ;;  %v1384_v48 = vmul.f32 %v8619_v9, %v6635_v36  ;;  %v1547_v45 = vmul.f32 %v8622_v33, %v6728_v20  ;;  %v3047_v24 = vpack.c.bf16 %v2037_v3, %v2036_v53  ;;  %v8624_v33 = vld [vmem:[#allocation166_spill] sm:$0xff]  ;;  %v8627_v3 = vld [vmem:[#allocation244_spill] sm:$0xff] }
 0x378   : > { %4451 = vrot.lane.b32.xlu2 %v4450_v16, %s4847_s14  ;;  %4546 = vrot.lane.b32.xlu0 %v4545_v14, %s4846_s23  ;;  %v2941_v9 = vsel %vm2841_vm3, %v2909_v37, %v4233_v7  ;;  %v2942_v47 = vsel %vm2841_vm3, %v2910_v26, %v4234_v41  ;;  %v4244_v14 = vunpack.i.h.bf16 %v6992_v56  ;;  %v825_v53 = vmul.f32 %v8626_v60, %v8625_v8  ;;  %v8628_v37 = vld [vmem:[#allocation17_spill] sm:$0xff] }
 0x379   : > { %v4237_v23 = vpop.permute.xlu1 %4236  ;;  %v4460_v58 = vpack.i.bf16 %v1385_v22, %v1384_v48  ;;  %v826_v7 = vmul.f32 %v8628_v37, %v8627_v3  ;;  %v4465_v26 = vpack.i.bf16 %v1547_v45, %v1546_v4  ;;  %v4249_v48 = vunpack.i.h.bf16 %v6883_v44  ;;  %v8632_v37 = vld [vmem:[#allocation89_spill] sm:$0xff] }
 0x37a   : > { %v7150_v16 = vpop.permute.xlu2 %4286  ;;  %v4239_v54 = vunpack.i.h.bf16 %v4237_v23  ;;  %v4238_v51 = vunpack.i.l.bf16 %v4237_v23  ;;  %v1712_v23 = vmul.f32 %v8624_v33, %v7116_v43  ;;  %v2811_v56 = vsel %vm2808_vm2, %v825_v53, %v4243_v2  ;;  %v7175_v45 = vpop.permute.xlu0 %4336  ;;  %v8629_v2 = vld [vmem:[#allocation62_spill] sm:$0xff] }
 0x37b   : > { %v2812_v22 = vsel %vm2808_vm2, %v826_v7, %v4244_v14  ;;  %v592_v4 = vrot.slane %v8557_v17, 7  ;;  %v4259_v33 = vunpack.i.h.bf16 %v7064_v50  ;;  %v1232_v7 = vmul.f32 %v8632_v37, %v6644_v27 }
 0x37c   : > { %v2973_v12 = vsel %vm2874_vm4, %v2941_v9, %v4238_v51  ;;  %v2974_v20 = vsel %vm2874_vm4, %v2942_v47, %v4239_v54  ;;  %v4560_v41 = vpack.i.bf16 %v1713_v62, %v1712_v23  ;;  %v4248_v54 = vunpack.i.l.bf16 %v6883_v44  ;;  %v8630_v47 = vld [vmem:[#allocation92_spill] sm:$0xff] }
 0x37d   : > { %v3007_v36 = vpack.c.bf16 %v2974_v20, %v2973_v12  ;;  %v1002_v9 = vmul.f32 %v8629_v2, %v8478_v0  ;;  %v1233_v14 = vmul.f32 %v8630_v47, %v6650_v46  ;;  %v8631_v12 = vld [vmem:[#allocation61_spill] sm:$0xff]  ;;  %v4258_v23 = vunpack.i.l.bf16 %v7064_v50  ;;  %v8634_v50 = vld [vmem:[#allocation47_spill] sm:$0xff]  ;;  %v8637_v2 = vld [vmem:[#allocation216_spill] sm:$0xff] }
 0x37e   : > { %4031 = vmatmul.msk.bf16.gmra.mxu3 %vm2808_vm2, %v3047_v24  ;;  %v1001_v44 = vmul.f32 %v8631_v12, %v8480_v63  ;;  %v2844_v20 = vsel %vm2841_vm3, %v2811_v56, %v4248_v54  ;;  %v8633_v56 = vrot.slane %v6329_v49, 7  ;;  %v2039_v47 = vmul.f32 %v6986_v25, %v8637_v2  ;;  %v8638_v12 = vld [vmem:[#allocation235_spill] sm:$0xff]  ;;  %v8646_v25 = vld [vmem:[#allocation118_spill] sm:$0xff] }
 0x37f   : > { %4461 = vrot.lane.b32.xlu1 %v4460_v58, %s4848_s25  ;;  %3349 = vmatmul.bf16.gmra.mxu2 %v3007_v36  ;;  %v2845_v58 = vsel %vm2841_vm3, %v2812_v22, %v4249_v48  ;;  %v8635_v48 = vpack.c.bf16 %v6743_v11, %v8634_v50  ;;  %v8641_v11 = vld [vmem:[#allocation178_spill] sm:$0xff] }
 0x380   : > { %4466 = vrot.lane.b32.xlu2 %v4465_v26, %s4847_s14  ;;  %4561 = vrot.lane.b32.xlu0 %v4560_v41, %s4846_s23  ;;  %v4090_v41 = vld [vmem:[%s8050_s6 + $0x8] sm:$0xff]  ;;  %v7200_v22 = vsel %vm598_vm0, %v8633_v56, %v592_v4  ;;  %v4480_v54 = vpack.i.bf16 %v1002_v9, %v1001_v44  ;;  %v8644_v44 = vld [vmem:[#allocation205_spill] sm:$0xff] }
 0x381   : > { %v4252_v51 = vpop.permute.xlu1 %4251  ;;  %v8643_v9 = vld [vmem:[#allocation207_spill] sm:$0xff]  ;;  %v2911_v61 = vsel %vm2808_vm2, %v8644_v44, %v4258_v23  ;;  %3636 = vmatpush.bf16.msrb.mxu3 %v4090_v41  ;;  %v8650_v23 = vld [vmem:[#allocation141_spill] sm:$0xff] }
 0x382   : > { %v7177_v62 = vpop.permute.xlu2 %4301  ;;  %v4254_v36 = vunpack.i.h.bf16 %v4252_v51  ;;  %v4253_v24 = vunpack.i.l.bf16 %v4252_v51  ;;  %v4575_v51 = vpack.i.bf16 %v1233_v14, %v1232_v7  ;;  %v2912_v14 = vsel %vm2808_vm2, %v8643_v9, %v4259_v33  ;;  %v8647_v7 = vld [vmem:[#allocation213_spill] sm:$0xff]  ;;  %v8648_v56 = vld [vmem:[#allocation183_spill] sm:$0xff]  ;;  %v8649_v33 = vld [vmem:[#allocation140_spill] sm:$0xff] }
 0x383   : > { %v2038_v50 = vmul.f32 %v8648_v56, %v8647_v7  ;;  %v1548_v2 = vmul.f32 %v8649_v33, %v6799_v6  ;;  %v7244_v6 = vpop.permute.xlu0 %4351 }
 0x384   : > { %v2877_v60 = vsel %vm2874_vm4, %v2844_v20, %v4253_v24  ;;  %v2878_v53 = vsel %vm2874_vm4, %v2845_v58, %v4254_v36  ;;  %v8636_v36 = vrot.slane %v8573_v32, 7  ;;  %v8639_v20 = vld [vmem:[#allocation234_spill] sm:$0xff] }
 0x385   : > { %v3006_v26 = vpack.c.bf16 %v2878_v53, %v2877_v60  ;;  %v8640_v58 = vpack.i.bf16 %v8638_v12, %v8639_v20  ;;  %v8642_v60 = vld [vmem:[#allocation111_spill] sm:$0xff]  ;;  %v3050_v9 = vpack.c.bf16 %v2039_v47, %v2038_v50  ;;  %v8653_v47 = vld [vmem:[#allocation198_spill] sm:$0xff] }
 0x386   : > { %4025 = vmatmul.msk.bf16.gmra.mxu0 %vm2808_vm2, %v8635_v48  ;;  %v7210_v24 = vsel %vm598_vm0, %v592_v4, %v8636_v36  ;;  %v1386_v53 = vmul.f32 %v8642_v60, %v8641_v11  ;;  %v8645_v4 = vld [vmem:[#allocation204_spill] sm:$0xff]  ;;  %v4263_v48 = vunpack.i.l.bf16 %v6926_v19  ;;  %v8654_v50 = vld [vmem:[#allocation11_spill] sm:$0xff] }
 0x387   : > { %4476 = vrot.lane.b32.xlu1 %v8640_v58, %s4848_s25  ;;  %3260 = vmatmul.bf16.gmra.mxu1 %v3006_v26  ;;  %v1387_v37 = vmul.f32 %v8646_v25, %v8645_v4  ;;  %v4264_v26 = vunpack.i.h.bf16 %v6926_v19  ;;  %v8651_v58 = vld [vmem:[#allocation172_spill] sm:$0xff]  ;;  %v4273_v25 = vunpack.i.l.bf16 %v7092_v1 }
 0x388   : > { %4481 = vrot.lane.b32.xlu2 %v4480_v54, %s4847_s14  ;;  %4576 = vrot.lane.b32.xlu0 %v4575_v51, %s4846_s23  ;;  %v1549_v54 = vmul.f32 %v8650_v23, %v6795_v42  ;;  %v1714_v60 = vmul.f32 %v8651_v58, %v7200_v22  ;;  %v2943_v44 = vsel %vm2841_vm3, %v2911_v61, %v4263_v48  ;;  %v4274_v51 = vunpack.i.h.bf16 %v7092_v1  ;;  %v8655_v48 = vld [vmem:[#allocation194_spill] sm:$0xff] }
 0x389   : > { %v4267_v36 = vpop.permute.xlu1 %4266  ;;  %v2944_v19 = vsel %vm2841_vm3, %v2912_v14, %v4264_v26  ;;  %v4490_v56 = vpack.i.bf16 %v1387_v37, %v1386_v53  ;;  %v828_v61 = vmul.f32 %v8654_v50, %v8653_v47  ;;  %v8656_v14 = vld [vmem:[#allocation10_spill] sm:$0xff]  ;;  %v4279_v37 = vunpack.i.h.bf16 %v6976_v28 }
 0x38a   : > { %v7236_v41 = vpop.permute.xlu2 %4316  ;;  %v4269_v12 = vunpack.i.h.bf16 %v4267_v36  ;;  %v4268_v20 = vunpack.i.l.bf16 %v4267_v36  ;;  %v8652_v36 = vld [vmem:[#allocation169_spill] sm:$0xff]  ;;  %v827_v26 = vmul.f32 %v8656_v14, %v8655_v48  ;;  %v4495_v58 = vpack.i.bf16 %v1549_v54, %v1548_v2 }
 0x38b   : > { %v1715_v33 = vmul.f32 %v8652_v36, %v7210_v24 }
 0x38c   : > { %v2975_v42 = vsel %vm2874_vm4, %v2943_v44, %v4268_v20  ;;  %v2976_v7 = vsel %vm2874_vm4, %v2944_v19, %v4269_v12  ;;  %v2814_v12 = vsel %vm2808_vm2, %v828_v61, %v4274_v51  ;;  %v2813_v53 = vsel %vm2808_vm2, %v827_v26, %v4273_v25  ;;  %v8658_v51 = vld [vmem:[#allocation91_spill] sm:$0xff]  ;;  %v8661_v61 = vld [vmem:[#allocation85_spill] sm:$0xff]  ;;  %v7278_v26 = vpop.permute.xlu0 %4366 }
 0x38d   : > { %v3010_v23 = vpack.c.bf16 %v2976_v7, %v2975_v42  ;;  %v4590_v1 = vpack.i.bf16 %v1715_v33, %v1714_v60  ;;  %v4278_v20 = vunpack.i.l.bf16 %v6976_v28  ;;  %v1235_v42 = vmul.f32 %v8658_v51, %v6859_v55  ;;  %v8659_v25 = vld [vmem:[#allocation223_spill] sm:$0xff]  ;;  %v8660_v7 = vld [vmem:[#allocation54_spill] sm:$0xff] }
 0x38e   : > { %4032 = vmatmul.msk.bf16.gmra.mxu3 %vm2808_vm2, %v3050_v9  ;;  %v8657_v9 = vld [vmem:[#allocation64_spill] sm:$0xff]  ;;  %v2847_v28 = vsel %vm2841_vm3, %v2814_v12, %v4279_v37  ;;  %v4289_v33 = vunpack.i.h.bf16 %v7150_v16  ;;  %v1234_v48 = vmul.f32 %v8661_v61, %v6853_v57  ;;  %v8664_v37 = vld [vmem:[#allocation217_spill] sm:$0xff] }
 0x38f   : > { %4491 = vrot.lane.b32.xlu1 %v4490_v56, %s4848_s25  ;;  %3354 = vmatmul.bf16.gmra.mxu2 %v3010_v23  ;;  %v1004_v19 = vmul.f32 %v8657_v9, %v6165_v52  ;;  %v1003_v56 = vmul.f32 %v8660_v7, %v8659_v25  ;;  %v2846_v36 = vsel %vm2841_vm3, %v2813_v53, %v4278_v20  ;;  %v4288_v23 = vunpack.i.l.bf16 %v7150_v16  ;;  %v8665_v16 = vld [vmem:[#allocation218_spill] sm:$0xff]  ;;  %v8670_v7 = vld [vmem:[#allocation103_spill] sm:$0xff] }
 0x390   : > { %4496 = vrot.lane.b32.xlu2 %v4495_v58, %s4847_s14  ;;  %4591 = vrot.lane.b32.xlu0 %v4590_v1, %s4846_s23  ;;  %v8662_v58 = vld [vmem:[#allocation78_spill] sm:$0xff]  ;;  %v4605_v53 = vpack.i.bf16 %v1235_v42, %v1234_v48  ;;  %v8666_v20 = vpack.i.bf16 %v8664_v37, %v8665_v16  ;;  %v4293_v42 = vunpack.i.l.bf16 %v8670_v7  ;;  %v4304_v16 = vunpack.i.h.bf16 %v7177_v62 }
 0x391   : > { %v4282_v44 = vpop.permute.xlu1 %4281  ;;  %v8663_v1 = vpack.c.bf16 %v6815_v15, %v8662_v58  ;;  %v4510_v12 = vpack.i.bf16 %v1004_v19, %v1003_v56  ;;  %v8669_v15 = vld [vmem:[#allocation114_spill] sm:$0xff]  ;;  %v4294_v19 = vunpack.i.h.bf16 %v8670_v7 }
 0x392   : > { %v7262_v2 = vpop.permute.xlu2 %4331  ;;  %v4284_v54 = vunpack.i.h.bf16 %v4282_v44  ;;  %v4283_v60 = vunpack.i.l.bf16 %v4282_v44  ;;  %v8667_v44 = vld [vmem:[#allocation219_spill] sm:$0xff]  ;;  %v1389_v51 = vmul.f32 %v8669_v15, %v6867_v38  ;;  %v8676_v15 = vld [vmem:[#allocation176_spill] sm:$0xff] }
 0x393   : > { %v1717_v7 = vmul.f32 %v8676_v15, %v7031_v10  ;;  %v8686_v15 = vld [vmem:[#allocation95_spill] sm:$0xff] }
 0x394   : > { %v2879_v47 = vsel %vm2874_vm4, %v2846_v36, %v4283_v60  ;;  %v2880_v50 = vsel %vm2874_vm4, %v2847_v28, %v4284_v54  ;;  %v2914_v54 = vsel %vm2808_vm2, %v8667_v44, %v4289_v33  ;;  %v8668_v60 = vld [vmem:[#allocation215_spill] sm:$0xff]  ;;  %v8671_v36 = vld [vmem:[#allocation185_spill] sm:$0xff]  ;;  %v8672_v28 = vld [vmem:[#allocation110_spill] sm:$0xff] }
 0x395   : > { %v3009_v14 = vpack.c.bf16 %v2880_v50, %v2879_v47  ;;  %v2913_v9 = vsel %vm2808_vm2, %v8668_v60, %v4288_v23  ;;  %v1388_v47 = vmul.f32 %v8672_v28, %v8671_v36  ;;  %v8673_v33 = vld [vmem:[#allocation151_spill] sm:$0xff]  ;;  %v8678_v28 = vld [vmem:[#allocation20_spill] sm:$0xff] }
 0x396   : > { %4026 = vmatmul.msk.bf16.gmra.mxu0 %vm2808_vm2, %v8663_v1  ;;  %v1550_v50 = vmul.f32 %v8673_v33, %v6644_v27  ;;  %v8675_v1 = vld [vmem:[#allocation184_spill] sm:$0xff]  ;;  %v2945_v37 = vsel %vm2841_vm3, %v2913_v9, %v4293_v42  ;;  %v8680_v9 = vld [vmem:[#allocation21_spill] sm:$0xff] }
 0x397   : > { %4506 = vrot.lane.b32.xlu1 %v8666_v20, %s4848_s25  ;;  %3265 = vmatmul.bf16.gmra.mxu1 %v3009_v14  ;;  %v8674_v14 = vld [vmem:[#allocation143_spill] sm:$0xff]  ;;  %v4303_v20 = vunpack.i.l.bf16 %v7177_v62  ;;  %v4520_v60 = vpack.i.bf16 %v1389_v51, %v1388_v47  ;;  %v7323_v51 = vpop.permute.xlu0 %4381  ;;  %v4309_v47 = vunpack.i.h.bf16 %v7080_v13 }
 0x398   : > { %4511 = vrot.lane.b32.xlu2 %v4510_v12, %s4847_s14  ;;  %4606 = vrot.lane.b32.xlu0 %v4605_v53, %s4846_s23  ;;  %v1551_v58 = vmul.f32 %v8674_v14, %v6650_v46  ;;  %v1716_v12 = vmul.f32 %v8675_v1, %v7025_v59  ;;  %v2946_v53 = vsel %vm2841_vm3, %v2914_v54, %v4294_v19  ;;  %v8679_v14 = vld [vmem:[#allocation209_spill] sm:$0xff] }
 0x399   : > { %v4297_v56 = vpop.permute.xlu1 %4296  ;;  %v829_v42 = vmul.f32 %v8680_v9, %v8679_v14  ;;  %v8687_v9 = vld [vmem:[#allocation41_spill] sm:$0xff] }
 0x39a   : > { %v7302_v61 = vpop.permute.xlu2 %4346  ;;  %v4299_v23 = vunpack.i.h.bf16 %v4297_v56  ;;  %v4298_v48 = vunpack.i.l.bf16 %v4297_v56  ;;  %v8677_v56 = vld [vmem:[#allocation210_spill] sm:$0xff]  ;;  %v4525_v54 = vpack.i.bf16 %v1551_v58, %v1550_v50  ;;  %v4620_v19 = vpack.i.bf16 %v1717_v7, %v1716_v12  ;;  %v8681_v50 = vld [vmem:[#allocation232_spill] sm:$0xff]  ;;  %v8682_v58 = vld [vmem:[#allocation65_spill] sm:$0xff] }
 0x39b   : > { %v830_v33 = vmul.f32 %v8678_v28, %v8677_v56  ;;  %v1005_v12 = vmul.f32 %v8682_v58, %v8681_v50  ;;  %v4319_v56 = vunpack.i.h.bf16 %v7236_v41  ;;  %v4318_v28 = vunpack.i.l.bf16 %v7236_v41  ;;  %v8693_v41 = vld [vmem:[#allocation226_spill] sm:$0xff] }
 0x39c   : > { %v2977_v27 = vsel %vm2874_vm4, %v2945_v37, %v4298_v48  ;;  %v2978_v44 = vsel %vm2874_vm4, %v2946_v53, %v4299_v23  ;;  %v2815_v23 = vsel %vm2808_vm2, %v829_v42, %v4303_v20  ;;  %v4308_v48 = vunpack.i.l.bf16 %v7080_v13  ;;  %v8684_v20 = vld [vmem:[#allocation57_spill] sm:$0xff]  ;;  %v8688_v42 = vld [vmem:[#allocation88_spill] sm:$0xff] }
 0x39d   : > { %v3013_v46 = vpack.c.bf16 %v2978_v44, %v2977_v27  ;;  %v2816_v62 = vsel %vm2808_vm2, %v830_v33, %v4304_v16  ;;  %v8683_v27 = vld [vmem:[#allocation233_spill] sm:$0xff] }
 0x39e   : > { %v1006_v44 = vmul.f32 %v8684_v20, %v8683_v27  ;;  %v2849_v13 = vsel %vm2841_vm3, %v2816_v62, %v4309_v47  ;;  %v8689_v20 = vld [vmem:[#allocation239_spill] sm:$0xff]  ;;  %v8692_v62 = vld [vmem:[#allocation229_spill] sm:$0xff] }
 0x39f   : > { %4521 = vrot.lane.b32.xlu1 %v4520_v60, %s4848_s25  ;;  %3359 = vmatmul.bf16.gmra.mxu2 %v3013_v46  ;;  %v8685_v60 = vld [vmem:[#allocation73_spill] sm:$0xff]  ;;  %v2848_v46 = vsel %vm2841_vm3, %v2815_v23, %v4308_v48  ;;  %v2916_v47 = vsel %vm2808_vm2, %v8692_v62, %v4319_v56  ;;  %v2915_v48 = vsel %vm2808_vm2, %v8693_v41, %v4318_v28  ;;  %v8698_v56 = vld [vmem:[#allocation152_spill] sm:$0xff]  ;;  %v4334_v41 = vunpack.i.h.bf16 %v7262_v2 }
 0x3a0   : > { %4526 = vrot.lane.b32.xlu2 %v4525_v54, %s4847_s14  ;;  %4621 = vrot.lane.b32.xlu0 %v4620_v19, %s4846_s23  ;;  %v1236_v7 = vmul.f32 %v8686_v15, %v8685_v60  ;;  %v1237_v54 = vmul.f32 %v8688_v42, %v8687_v9  ;;  %v8690_v15 = vld [vmem:[#allocation240_spill] sm:$0xff]  ;;  %v1553_v42 = vmul.f32 %v8698_v56, %v6859_v55  ;;  %v4333_v55 = vunpack.i.l.bf16 %v7262_v2 }
 0x3a1   : > { %v4312_v1 = vpop.permute.xlu1 %4311  ;;  %v8691_v23 = vpack.i.bf16 %v8689_v20, %v8690_v15  ;;  %v8699_v20 = vld [vmem:[#allocation144_spill] sm:$0xff] }
 0x3a2   : > { %v7331_v37 = vpop.permute.xlu2 %4361  ;;  %v4314_v53 = vunpack.i.h.bf16 %v4312_v1  ;;  %v4313_v16 = vunpack.i.l.bf16 %v4312_v1  ;;  %v4540_v1 = vpack.i.bf16 %v1006_v44, %v1005_v12  ;;  %v4635_v58 = vpack.i.bf16 %v1237_v54, %v1236_v7  ;;  %v7363_v54 = vpop.permute.xlu0 %4396 }
 0x3a3   : > { %v4324_v12 = vunpack.i.h.bf16 %v7136_v34  ;;  %v4323_v44 = vunpack.i.l.bf16 %v7136_v34  ;;  %v1552_v15 = vmul.f32 %v8699_v20, %v6853_v57  ;;  %v8700_v34 = vld [vmem:[#allocation187_spill] sm:$0xff]  ;;  %v8702_v20 = vld [vmem:[#allocation221_spill] sm:$0xff] }
 0x3a4   : > { %v2881_v33 = vsel %vm2874_vm4, %v2848_v46, %v4313_v16  ;;  %v2882_v14 = vsel %vm2874_vm4, %v2849_v13, %v4314_v53  ;;  %v8694_v53 = vld [vmem:[#allocation199_spill] sm:$0xff]  ;;  %v8695_v16 = vld [vmem:[#allocation121_spill] sm:$0xff]  ;;  %v8696_v13 = vld [vmem:[#allocation202_spill] sm:$0xff] }
 0x3a5   : > { %v3012_v19 = vpack.c.bf16 %v2882_v14, %v2881_v33  ;;  %v1390_v46 = vmul.f32 %v8695_v16, %v8694_v53  ;;  %v8697_v33 = vld [vmem:[#allocation113_spill] sm:$0xff]  ;;  %v2948_v62 = vsel %vm2841_vm3, %v2916_v47, %v4324_v12  ;;  %v8703_v53 = vld [vmem:[#allocation12_spill] sm:$0xff]  ;;  %v4555_v47 = vpack.i.bf16 %v1553_v42, %v1552_v15 }
 0x3a6   : > { %v1391_v14 = vmul.f32 %v8697_v33, %v8696_v13 }
 0x3a7   : > { %4536 = vrot.lane.b32.xlu1 %v8691_v23, %s4848_s25  ;;  %3270 = vmatmul.bf16.gmra.mxu1 %v3012_v19  ;;  %v1719_v23 = vmul.f32 %v8700_v34, %v8627_v3  ;;  %v831_v3 = vmul.f32 %v8703_v53, %v8702_v20  ;;  %v8704_v34 = vld [vmem:[#allocation222_spill] sm:$0xff] }
 0x3a8   : > { %4541 = vrot.lane.b32.xlu2 %v4540_v1, %s4847_s14  ;;  %4636 = vrot.lane.b32.xlu0 %v4635_v58, %s4846_s23  ;;  %v2947_v58 = vsel %vm2841_vm3, %v2915_v48, %v4323_v44  ;;  %v4550_v56 = vpack.i.bf16 %v1391_v14, %v1390_v46  ;;  %v8705_v48 = vld [vmem:[#allocation24_spill] sm:$0xff]  ;;  %v4338_v46 = vunpack.i.l.bf16 %v7175_v45 }
 0x3a9   : > { %v4327_v7 = vpop.permute.xlu1 %4326  ;;  %v832_v44 = vmul.f32 %v8705_v48, %v8704_v34  ;;  %v8706_v14 = vld [vmem:[#allocation212_spill] sm:$0xff]  ;;  %v8712_v48 = vld [vmem:[#allocation127_spill] sm:$0xff] }
 0x3aa   : > { %v7365_v28 = vpop.permute.xlu2 %4376  ;;  %v4329_v19 = vunpack.i.h.bf16 %v4327_v7  ;;  %v4328_v1 = vunpack.i.l.bf16 %v4327_v7  ;;  %v8701_v7 = vld [vmem:[#allocation173_spill] sm:$0xff]  ;;  %v7402_v20 = vpop.permute.xlu0 %4411 }
 0x3ab   : > { %v1718_v13 = vmul.f32 %v8701_v7, %v8625_v8  ;;  %v2818_v2 = vsel %vm2808_vm2, %v832_v44, %v4334_v41  ;;  %v4339_v8 = vunpack.i.h.bf16 %v7175_v45  ;;  %v4349_v7 = vunpack.i.h.bf16 %v7302_v61  ;;  %v8713_v44 = vld [vmem:[#allocation93_spill] sm:$0xff] }
 0x3ac   : > { %v2979_v16 = vsel %vm2874_vm4, %v2947_v58, %v4328_v1  ;;  %v2980_v33 = vsel %vm2874_vm4, %v2948_v62, %v4329_v19  ;;  %v2817_v19 = vsel %vm2808_vm2, %v831_v3, %v4333_v55  ;;  %v8707_v1 = vld [vmem:[#allocation67_spill] sm:$0xff]  ;;  %v8709_v62 = vld [vmem:[#allocation66_spill] sm:$0xff]  ;;  %v8710_v55 = vld [vmem:[#allocation136_spill] sm:$0xff] }
 0x3ad   : > { %v3016_v57 = vpack.c.bf16 %v2980_v33, %v2979_v16  ;;  %v4650_v12 = vpack.i.bf16 %v1719_v23, %v1718_v13  ;;  %v1008_v42 = vmul.f32 %v8707_v1, %v8706_v14  ;;  %v8708_v58 = vld [vmem:[#allocation211_spill] sm:$0xff]  ;;  %v8711_v16 = vld [vmem:[#allocation97_spill] sm:$0xff]  ;;  %v2851_v45 = vsel %vm2841_vm3, %v2818_v2, %v4339_v8  ;;  %v8714_v8 = vld [vmem:[#allocation246_spill] sm:$0xff] }
 0x3ae   : > { %v1007_v41 = vmul.f32 %v8709_v62, %v8708_v58  ;;  %v1239_v33 = vmul.f32 %v8711_v16, %v8710_v55  ;;  %v8717_v1 = vld [vmem:[#allocation242_spill] sm:$0xff]  ;;  %v8719_v16 = vld [vmem:[#allocation123_spill] sm:$0xff] }
 0x3af   : > { %4551 = vrot.lane.b32.xlu1 %v4550_v56, %s4848_s25  ;;  %3364 = vmatmul.bf16.gmra.mxu2 %v3016_v57  ;;  %v2850_v56 = vsel %vm2841_vm3, %v2817_v19, %v4338_v46  ;;  %v4348_v57 = vunpack.i.l.bf16 %v7302_v61  ;;  %v4089_v19 = vld [vmem:[%s8050_s6] sm:$0xff] }
 0x3b0   : > { %4556 = vrot.lane.b32.xlu2 %v4555_v47, %s4847_s14  ;;  %4651 = vrot.lane.b32.xlu0 %v4650_v12, %s4846_s23  ;;  %v1238_v47 = vmul.f32 %v8713_v44, %v8712_v48  ;;  %v4570_v46 = vpack.i.bf16 %v1008_v42, %v1007_v41  ;;  %v4354_v42 = vunpack.i.h.bf16 %v7244_v6  ;;  %v4353_v41 = vunpack.i.l.bf16 %v7244_v6 }
 0x3b1   : > { %v4342_v53 = vpop.permute.xlu1 %4341  ;;  %3637 = vmatpush.bf16.msrb.mxu3 %v4089_v19 }
 0x3b2   : > { %v7392_v13 = vpop.permute.xlu2 %4391  ;;  %v4344_v15 = vunpack.i.h.bf16 %v4342_v53  ;;  %v4343_v23 = vunpack.i.l.bf16 %v4342_v53  ;;  %v4665_v2 = vpack.i.bf16 %v1239_v33, %v1238_v47  ;;  %v8715_v53 = vld [vmem:[#allocation245_spill] sm:$0xff] }
 0x3b3   : > { %v8716_v61 = vpack.i.bf16 %v8714_v8, %v8715_v53  ;;  %v4363_v8 = vunpack.i.l.bf16 %v7331_v37 }
 0x3b4   : > { %v2883_v3 = vsel %vm2874_vm4, %v2850_v56, %v4343_v23  ;;  %v2884_v34 = vsel %vm2874_vm4, %v2851_v45, %v4344_v15  ;;  %v2918_v23 = vsel %vm2808_vm2, %v8717_v1, %v4349_v7  ;;  %v8718_v15 = vld [vmem:[#allocation241_spill] sm:$0xff]  ;;  %v1393_v56 = vmul.f32 %v8719_v16, %v7009_v31  ;;  %v8720_v45 = vld [vmem:[#allocation146_spill] sm:$0xff]  ;;  %v8721_v7 = vld [vmem:[#allocation147_spill] sm:$0xff] }
 0x3b5   : > { %v3015_v12 = vpack.c.bf16 %v2884_v34, %v2883_v3  ;;  %v2917_v62 = vsel %vm2808_vm2, %v8718_v15, %v4348_v57  ;;  %v1554_v3 = vmul.f32 %v8720_v45, %v8685_v60  ;;  %v1555_v34 = vmul.f32 %v8721_v7, %v8687_v9  ;;  %v8723_v1 = vld [vmem:[#allocation236_spill] sm:$0xff]  ;;  %v8724_v15 = vld [vmem:[#allocation23_spill] sm:$0xff]  ;;  %v8726_v45 = vld [vmem:[#allocation13_spill] sm:$0xff] }
 0x3b6   : > { %v2950_v6 = vsel %vm2841_vm3, %v2918_v23, %v4354_v42  ;;  %v833_v16 = vmul.f32 %v8724_v15, %v8723_v1  ;;  %v4368_v42 = vunpack.i.l.bf16 %v7278_v26 }
 0x3b7   : > { %4566 = vrot.lane.b32.xlu1 %v8716_v61, %s4848_s25  ;;  %3275 = vmatmul.bf16.gmra.mxu1 %v3015_v12  ;;  %v8722_v12 = vld [vmem:[#allocation117_spill] sm:$0xff] }
 0x3b8   : > { %4571 = vrot.lane.b32.xlu2 %v4570_v46, %s4847_s14  ;;  %4666 = vrot.lane.b32.xlu0 %v4665_v2, %s4846_s23  ;;  %v1392_v19 = vmul.f32 %v8722_v12, %v7015_v39  ;;  %v2949_v46 = vsel %vm2841_vm3, %v2917_v62, %v4353_v41  ;;  %v4364_v2 = vunpack.i.h.bf16 %v7331_v37  ;;  %v4585_v12 = vpack.i.bf16 %v1555_v34, %v1554_v3  ;;  %v7443_v62 = vpop.permute.xlu0 %4426  ;;  %s3816_s23 = scalar_lea.sflag [#allocation4], %s4982_s26 }
 0x3b9   : > { %v4357_v33 = vpop.permute.xlu1 %4356  ;;  %v2819_v23 = vsel %vm2808_vm2, %v833_v16, %v4363_v8  ;;  %v8730_v16 = vld [vmem:[#allocation230_spill] sm:$0xff] }
 0x3ba   : > { %v7429_v57 = vpop.permute.xlu2 %4406  ;;  %v4359_v44 = vunpack.i.h.bf16 %v4357_v33  ;;  %v4358_v47 = vunpack.i.l.bf16 %v4357_v33  ;;  %v4580_v9 = vpack.i.bf16 %v1393_v56, %v1392_v19  ;;  %v8725_v33 = vld [vmem:[#allocation237_spill] sm:$0xff]  ;;  %v4369_v56 = vunpack.i.h.bf16 %v7278_v26 }
 0x3bb   : > { %v834_v7 = vmul.f32 %v8726_v45, %v8725_v33  ;;  %v8731_v33 = vld [vmem:[#allocation231_spill] sm:$0xff] }
 0x3bc   : > { %v2981_v60 = vsel %vm2874_vm4, %v2949_v46, %v4358_v47  ;;  %v2982_v53 = vsel %vm2874_vm4, %v2950_v6, %v4359_v44  ;;  %v8727_v44 = vld [vmem:[#allocation68_spill] sm:$0xff]  ;;  %v8728_v46 = vld [vmem:[#allocation238_spill] sm:$0xff]  ;;  %v8732_v45 = vpack.i.bf16 %v8730_v16, %v8731_v33 }
 0x3bd   : > { %v3019_v61 = vpack.c.bf16 %v2982_v53, %v2981_v60  ;;  %v2820_v37 = vsel %vm2808_vm2, %v834_v7, %v4364_v2  ;;  %v1010_v47 = vmul.f32 %v8727_v44, %v6273_v18  ;;  %v8729_v6 = vld [vmem:[#allocation60_spill] sm:$0xff]  ;;  %v2852_v2 = vsel %vm2841_vm3, %v2819_v23, %v4368_v42  ;;  %v8733_v7 = vld [vmem:[#allocation174_spill] sm:$0xff] }
 0x3be   : > { %v1009_v60 = vmul.f32 %v8729_v6, %v8728_v46  ;;  %v2853_v8 = vsel %vm2841_vm3, %v2820_v37, %v4369_v56  ;;  %v4379_v53 = vunpack.i.h.bf16 %v7365_v28  ;;  %v8734_v37 = vld [vmem:[#allocation170_spill] sm:$0xff]  ;;  %v4383_v44 = vunpack.i.l.bf16 %v7323_v51 }
 0x3bf   : > { %4581 = vrot.lane.b32.xlu1 %v4580_v9, %s4848_s25  ;;  %3369 = vmatmul.bf16.gmra.mxu2 %v3019_v61  ;;  %v4378_v9 = vunpack.i.l.bf16 %v7365_v28  ;;  %v8735_v28 = vld [vmem:[#allocation120_spill] sm:$0xff] }
 0x3c0   : > { %4586 = vrot.lane.b32.xlu2 %v4585_v12, %s4847_s14  ;;  %v4600_v15 = vpack.i.bf16 %v1010_v47, %v1009_v60  ;;  %v2920_v12 = vsel %vm2808_vm2, %v8733_v7, %v4379_v53  ;;  %v7471_v56 = vpop.permute.xlu0 %4441  ;;  %v1395_v42 = vmul.f32 %v8735_v28, %v7130_v5  ;;  %v8739_v7 = vld [vmem:[#allocation247_spill] sm:$0xff] }
 0x3c1   : > { %v4372_v41 = vpop.permute.xlu1 %4371  ;;  %v2919_v23 = vsel %vm2808_vm2, %v8734_v37, %v4378_v9  ;;  %v8738_v9 = vld [vmem:[#allocation149_spill] sm:$0xff]  ;;  %v8740_v37 = vld [vmem:[#allocation26_spill] sm:$0xff] }
 0x3c2   : > { %v7453_v3 = vpop.permute.xlu2 %4421  ;;  %v4374_v34 = vunpack.i.h.bf16 %v4372_v41  ;;  %v4373_v19 = vunpack.i.l.bf16 %v4372_v41  ;;  %v4384_v41 = vunpack.i.h.bf16 %v7323_v51  ;;  %v4394_v51 = vunpack.i.h.bf16 %v7392_v13 }
 0x3c3   : > { %v836_v28 = vmul.f32 %v8740_v37, %v8739_v7  ;;  %v8745_v37 = vld [vmem:[#allocation156_spill] sm:$0xff] }
 0x3c4   : > { %v2885_v26 = vsel %vm2874_vm4, %v2852_v2, %v4373_v19  ;;  %v2886_v61 = vsel %vm2874_vm4, %v2853_v8, %v4374_v34  ;;  %v8736_v34 = vld [vmem:[#allocation153_spill] sm:$0xff]  ;;  %v8737_v8 = vld [vmem:[#allocation116_spill] sm:$0xff] }
 0x3c5   : > { %v3018_v1 = vpack.c.bf16 %v2886_v61, %v2885_v26  ;;  %v1556_v19 = vmul.f32 %v8736_v34, %v8712_v48  ;;  %v1394_v53 = vmul.f32 %v8737_v8, %v7116_v43  ;;  %v1557_v26 = vmul.f32 %v8738_v9, %v8710_v55  ;;  %v8742_v34 = vld [vmem:[#allocation27_spill] sm:$0xff] }
 0x3c6   : > { %v2951_v61 = vsel %vm2841_vm3, %v2919_v23, %v4383_v44  ;;  %v4399_v23 = vunpack.i.h.bf16 %v7363_v54  ;;  %v8743_v44 = vld [vmem:[#allocation69_spill] sm:$0xff] }
 0x3c7   : > { %4596 = vrot.lane.b32.xlu1 %v8732_v45, %s4848_s25  ;;  %3280 = vmatmul.bf16.gmra.mxu1 %v3018_v1  ;;  %v2952_v1 = vsel %vm2841_vm3, %v2920_v12, %v4384_v41  ;;  %v4610_v33 = vpack.i.bf16 %v1395_v42, %v1394_v53  ;;  %v4615_v8 = vpack.i.bf16 %v1557_v26, %v1556_v19  ;;  %v4398_v42 = vunpack.i.l.bf16 %v7363_v54  ;;  %v8744_v26 = vld [vmem:[#allocation63_spill] sm:$0xff] }
 0x3c8   : > { %4601 = vrot.lane.b32.xlu2 %v4600_v15, %s4847_s14  ;;  %v4393_v15 = vunpack.i.l.bf16 %v7392_v13  ;;  %v2822_v12 = vsel %vm2808_vm2, %v836_v28, %v4394_v51  ;;  %v4409_v54 = vunpack.i.h.bf16 %v7429_v57  ;;  %v8746_v28 = vld [vmem:[#allocation124_spill] sm:$0xff] }
 0x3c9   : > { %v4387_v47 = vpop.permute.xlu1 %4386 }
 0x3ca   : > { %v7480_v6 = vpop.permute.xlu2 %4436  ;;  %v4389_v60 = vunpack.i.h.bf16 %v4387_v47  ;;  %v4388_v2 = vunpack.i.l.bf16 %v4387_v47  ;;  %v8741_v47 = vld [vmem:[#allocation248_spill] sm:$0xff] }
 0x3cb   : > { %v835_v55 = vmul.f32 %v8742_v34, %v8741_v47  ;;  %v8747_v47 = vpack.i.bf16 %v8745_v37, %v8746_v28  ;;  %v2922_v34 = vsel %vm2808_vm2, %v6491_v29, %v4409_v54  ;;  %v8754_v28 = vld [vmem:[#allocation181_spill] sm:$0xff] }
 0x3cc   : > { %v2983_v48 = vsel %vm2874_vm4, %v2951_v61, %v4388_v2  ;;  %v2984_v16 = vsel %vm2874_vm4, %v2952_v1, %v4389_v60  ;;  %v1011_v60 = vmul.f32 %v8743_v44, %v6327_v35  ;;  %v7504_v2 = vpop.permute.xlu0 %4456  ;;  %v1012_v61 = vmul.f32 %v8744_v26, %v6329_v49  ;;  %v7510_v1 = vpop.f32.mrf.mxu0 }
 0x3cd   : > { %v3022_v45 = vpack.c.bf16 %v2984_v16, %v2983_v48  ;;  %v2821_v13 = vsel %vm2808_vm2, %v835_v55, %v4393_v15  ;;  %v2855_v15 = vsel %vm2841_vm3, %v2822_v12, %v4399_v23  ;;  %v4408_v48 = vunpack.i.l.bf16 %v7429_v57  ;;  %v8748_v57 = vld [vmem:[#allocation125_spill] sm:$0xff] }
 0x3ce   : > { %v2854_v51 = vsel %vm2841_vm3, %v2821_v13, %v4398_v42  ;;  %v4630_v7 = vpack.i.bf16 %v1012_v61, %v1011_v60  ;;  %v4414_v12 = vunpack.i.h.bf16 %v7402_v20  ;;  %v4413_v13 = vunpack.i.l.bf16 %v7402_v20  ;;  %v8749_v42 = vld [vmem:[#allocation155_spill] sm:$0xff] }
 0x3cf   : > { %4611 = vrot.lane.b32.xlu1 %v4610_v33, %s4848_s25  ;;  %3374 = vmatmul.bf16.gmra.mxu2 %v3022_v45  ;;  %v2921_v55 = vsel %vm2808_vm2, %v6510_v40, %v4408_v48  ;;  %v4424_v20 = vunpack.i.h.bf16 %v7453_v3 }
 0x3d0   : > { %4616 = vrot.lane.b32.xlu2 %v4615_v8, %s4847_s14  ;;  %v1396_v8 = vmul.f32 %v8748_v57, %v7200_v22  ;;  %v2953_v61 = vsel %vm2841_vm3, %v2921_v55, %v4413_v13 }
 0x3d1   : > { %v4402_v41 = vpop.permute.xlu1 %4401 }
 0x3d2   : > { %v7506_v19 = vpop.permute.xlu2 %4451  ;;  %v4404_v53 = vunpack.i.h.bf16 %v4402_v41  ;;  %v4403_v9 = vunpack.i.l.bf16 %v4402_v41  ;;  %v1559_v41 = vmul.f32 %v8749_v42, %v8620_v30  ;;  %v4423_v30 = vunpack.i.l.bf16 %v7453_v3 }
 0x3d4   : > { %v2887_v16 = vsel %vm2874_vm4, %v2854_v51, %v4403_v9  ;;  %v2888_v33 = vsel %vm2874_vm4, %v2855_v15, %v4404_v53  ;;  %v8750_v53 = vld [vmem:[#allocation119_spill] sm:$0xff]  ;;  %v8751_v9 = vld [vmem:[#allocation150_spill] sm:$0xff]  ;;  %v2954_v51 = vsel %vm2841_vm3, %v2922_v34, %v4414_v12  ;;  %v7541_v15 = vpop.permute.xlu0 %4471  ;;  %v4428_v12 = vunpack.i.l.bf16 %v7443_v62 }
 0x3d5   : > { %v3021_v45 = vpack.c.bf16 %v2888_v33, %v2887_v16  ;;  %v1397_v40 = vmul.f32 %v8750_v53, %v7210_v24  ;;  %v1558_v26 = vmul.f32 %v8751_v9, %v8611_v21  ;;  %v7547_v33 = vpop.f32.mrf.mxu0  ;;  %v8753_v21 = vld [vmem:[#allocation16_spill] sm:$0xff]  ;;  %v8757_v53 = vld [vmem:[#allocation70_spill] sm:$0xff] }
 0x3d7   : > { %4626 = vrot.lane.b32.xlu1 %v8747_v47, %s4848_s25  ;;  %3285 = vmatmul.bf16.gmra.mxu1 %v3021_v45  ;;  %v4640_v16 = vpack.i.bf16 %v1397_v40, %v1396_v8  ;;  %v8755_v47 = vld [vmem:[#allocation30_spill] sm:$0xff]  ;;  %v4645_v55 = vpack.i.bf16 %v1559_v41, %v1558_v26  ;;  %v4429_v8 = vunpack.i.h.bf16 %v7443_v62  ;;  %v1013_v40 = vmul.f32 %v8757_v53, %v8557_v17 }
 0x3d8   : > { %4631 = vrot.lane.b32.xlu2 %v4630_v7, %s4847_s14  ;;  %v8752_v7 = vld [vmem:[#allocation75_spill] sm:$0xff]  ;;  %v838_v34 = vmul.f32 %v8755_v47, %v8754_v28  ;;  %v8761_v28 = vld [vmem:[#allocation128_spill] sm:$0xff] }
 0x3d9   : > { %v4417_v23 = vpop.permute.xlu1 %4416  ;;  %v837_v37 = vmul.f32 %v8753_v21, %v8752_v7  ;;  %v8759_v7 = vld [vmem:[#allocation192_spill] sm:$0xff]  ;;  %v1399_v47 = vmul.f32 %v8761_v28, %v7031_v10  ;;  %v4453_v10 = vunpack.i.l.bf16 %v7506_v19 }
 0x3da   : > { %v7533_v44 = vpop.permute.xlu2 %4466  ;;  %v4419_v60 = vunpack.i.h.bf16 %v4417_v23  ;;  %v4418_v29 = vunpack.i.l.bf16 %v4417_v23  ;;  %v2824_v3 = vsel %vm2808_vm2, %v838_v34, %v4424_v20  ;;  %v8756_v23 = vld [vmem:[#allocation71_spill] sm:$0xff]  ;;  %v4444_v34 = vunpack.i.h.bf16 %v7471_v56 }
 0x3db   : > { %v2823_v57 = vsel %vm2808_vm2, %v837_v37, %v4423_v30  ;;  %v1014_v42 = vmul.f32 %v8756_v23, %v8573_v32  ;;  %v2857_v26 = vsel %vm2841_vm3, %v2824_v3, %v4429_v8 }
 0x3dc   : > { %v2985_v54 = vsel %vm2874_vm4, %v2953_v61, %v4418_v29  ;;  %v2986_v48 = vsel %vm2874_vm4, %v2954_v51, %v4419_v60  ;;  %v2856_v9 = vsel %vm2841_vm3, %v2823_v57, %v4428_v12  ;;  %v4439_v61 = vunpack.i.h.bf16 %v7480_v6  ;;  %v8762_v12 = vld [vmem:[#allocation122_spill] sm:$0xff] }
 0x3dd   : > { %v3025_v45 = vpack.c.bf16 %v2986_v48, %v2985_v54  ;;  %v4438_v51 = vunpack.i.l.bf16 %v7480_v6  ;;  %v7571_v30 = vpop.f32.mrf.mxu0  ;;  %v4660_v48 = vpack.i.bf16 %v1014_v42, %v1013_v40  ;;  %v4454_v42 = vunpack.i.h.bf16 %v7506_v19  ;;  %v8763_v40 = vld [vmem:[#allocation94_spill] sm:$0xff] }
 0x3de   : > { %v2924_v37 = vsel %vm2808_vm2, %v8478_v0, %v4439_v61  ;;  %v8766_v61 = vld [vmem:[#allocation19_spill] sm:$0xff] }
 0x3df   : > { %4641 = vrot.lane.b32.xlu1 %v4640_v16, %s4848_s25  ;;  %3379 = vmatmul.bf16.gmra.mxu2 %v3025_v45  ;;  %v7573_v16 = vpop.permute.xlu0 %4486  ;;  %v8758_v45 = vld [vmem:[#allocation45_spill] sm:$0xff]  ;;  %v2923_v6 = vsel %vm2808_vm2, %v8480_v63, %v4438_v51  ;;  %v2956_v63 = vsel %vm2841_vm3, %v2924_v37, %v4444_v34  ;;  %v4469_v34 = vunpack.i.h.bf16 %v7533_v44 }
 0x3e0   : > { %4646 = vrot.lane.b32.xlu2 %v4645_v55, %s4847_s14  ;;  %v8760_v21 = vpack.i.bf16 %v8758_v45, %v8759_v7  ;;  %v4443_v55 = vunpack.i.l.bf16 %v7471_v56  ;;  %v4458_v45 = vunpack.i.l.bf16 %v7504_v2 }
 0x3e1   : > { %v4432_v13 = vpop.permute.xlu1 %4431 }
 0x3e2   : > { %v7561_v60 = vpop.permute.xlu2 %4481  ;;  %v4434_v41 = vunpack.i.h.bf16 %v4432_v13  ;;  %v4433_v29 = vunpack.i.l.bf16 %v4432_v13  ;;  %v1398_v13 = vmul.f32 %v8762_v12, %v7025_v59  ;;  %v2955_v0 = vsel %vm2841_vm3, %v2923_v6, %v4443_v55  ;;  %v8765_v59 = vld [vmem:[#allocation72_spill] sm:$0xff] }
 0x3e3   : > { %v840_v51 = vmul.f32 %v8766_v61, %v8765_v59  ;;  %v4468_v55 = vunpack.i.l.bf16 %v7533_v44  ;;  %v4483_v59 = vunpack.i.l.bf16 %v7561_v60 }
 0x3e4   : > { %v2889_v62 = vsel %vm2874_vm4, %v2856_v9, %v4433_v29  ;;  %v2890_v20 = vsel %vm2874_vm4, %v2857_v26, %v4434_v41  ;;  %v4670_v29 = vpack.i.bf16 %v1399_v47, %v1398_v13  ;;  %v8764_v9 = vld [vmem:[#allocation29_spill] sm:$0xff] }
 0x3e5   : > { %v3024_v54 = vpack.c.bf16 %v2890_v20, %v2889_v62  ;;  %v839_v26 = vmul.f32 %v8764_v9, %v8763_v40  ;;  %v7602_v62 = vpop.f32.mrf.mxu0  ;;  %v2826_v19 = vsel %vm2808_vm2, %v840_v51, %v4454_v42  ;;  %v2925_v44 = vsel %vm2808_vm2, %v8659_v25, %v4468_v55 }
 0x3e7   : > { %4656 = vrot.lane.b32.xlu1 %v8760_v21, %s4848_s25  ;;  %3290 = vmatmul.bf16.gmra.mxu1 %v3024_v54  ;;  %v7605_v20 = vpop.permute.xlu0 %4501  ;;  %v2825_v54 = vsel %vm2808_vm2, %v839_v26, %v4453_v10  ;;  %v4474_v10 = vunpack.i.h.bf16 %v7541_v15  ;;  %v4484_v26 = vunpack.i.h.bf16 %v7561_v60 }
 0x3e8   : > { %4661 = vrot.lane.b32.xlu2 %v4660_v48, %s4847_s14  ;;  %v4459_v48 = vunpack.i.h.bf16 %v7504_v2  ;;  %v2858_v28 = vsel %vm2841_vm3, %v2825_v54, %v4458_v45  ;;  %v8767_v45 = vld [vmem:[#allocation126_spill] sm:$0xff]  ;;  %s4784_s14 = scalar_lea.hbm %s4783_s9, 256 }
 0x3e9   : > { %v4447_v3 = vpop.permute.xlu1 %4446  ;;  %p4785_p6 = scmp.ne.s32.totalorder %s4783_s9, %s4784_s14  ;;  %p4790_p1 = scmp.lt.s32.totalorder %s4788_s29, %s4784_s14 }
 0x3ea   : > { %v4449_v57 = vunpack.i.h.bf16 %v4447_v3  ;;  %v4448_v8 = vunpack.i.l.bf16 %v4447_v3  ;;  %v7590_v23 = vpop.permute.xlu2 %4496  ;;  %v2859_v47 = vsel %vm2841_vm3, %v2826_v19, %v4459_v48  ;;  %v7618_v3 = vld [vmem:[%s8049_s5] ss:$0 sm:$0xff] }
 0x3eb   : > { %p4786_p9 = pnand %p4785_p6, %p4946_p11  ;;  %p4791_p3 = por %p4790_p1, %p4789_p0 }
 0x3ec   : > { %v2987_v41 = vsel %vm2874_vm4, %v2955_v0, %v4448_v8  ;;  %v2988_v56 = vsel %vm2874_vm4, %v2956_v63, %v4449_v57  ;;  %v2926_v0 = vsel %vm2808_vm2, %v6165_v52, %v4469_v34 }
 0x3ed   : > { %v3028_v53 = vpack.c.bf16 %v2988_v56, %v2987_v41  ;;  %v7629_v42 = vpop.f32.mrf.mxu0  ;;  %v4473_v41 = vunpack.i.l.bf16 %v7541_v15  ;;  %v2958_v25 = vsel %vm2841_vm3, %v2926_v0, %v4474_v10  ;;  %p4787_p13 = pneg %p4786_p9 }
 0x3ef   : > { %4671 = vrot.lane.b32.xlu1 %v4670_v29, %s4848_s25  ;;  %3384 = vmatmul.bf16.gmra.mxu2 %v3028_v53  ;;  %v7633_v29 = vpop.permute.xlu0 %4516  ;;  %v2957_v52 = vsel %vm2841_vm3, %v2925_v44, %v4473_v41  ;;  %p4792_p4 = pnand %p4791_p3, %p4787_p13 }
 0x3f1   : > { %v4462_v7 = vpop.permute.xlu1 %4461 }
 0x3f2   : > { %v4464_v21 = vunpack.i.h.bf16 %v4462_v7  ;;  %v4463_v37 = vunpack.i.l.bf16 %v4462_v7  ;;  %v3345_v6 = vpop.f32.mrf.mxu2  ;;  %v7622_v12 = vpop.permute.xlu2 %4511  ;;  %v8768_v7 = vld [vmem:[#allocation32_spill] sm:$0xff] }
 0x3f4   : > { %v3256_v57 = vpop.f32.mrf.mxu1  ;;  %v2891_v2 = vsel %vm2874_vm4, %v2858_v28, %v4463_v37  ;;  %v2892_v8 = vsel %vm2874_vm4, %v2859_v47, %v4464_v21  ;;  %v842_v21 = vmul.f32 %v8768_v7, %v8767_v45  ;;  %v8769_v37 = vld [vmem:[#allocation158_spill] sm:$0xff]  ;;  %v8770_v28 = vld [vmem:[#allocation33_spill] sm:$0xff] }
 0x3f5   : > { %v3027_v13 = vpack.c.bf16 %v2892_v8, %v2891_v2  ;;  %v3257_v63 = vadd.f32 %v7618_v3, %v3256_v57  ;;  %v841_v47 = vmul.f32 %v8770_v28, %v8769_v37  ;;  %v4489_v2 = vunpack.i.h.bf16 %v7573_v16  ;;  %v7654_v41 = vpop.f32.mrf.mxu0 }
 0x3f6   : > { %v2828_v60 = vsel %vm2808_vm2, %v842_v21, %v4484_v26  ;;  %v4488_v8 = vunpack.i.l.bf16 %v7573_v16  ;;  %v4498_v26 = vunpack.i.l.bf16 %v7590_v23  ;;  %v4514_v28 = vunpack.i.h.bf16 %v7622_v12 }
 0x3f7   : > { %3295 = vmatmul.bf16.gmra.mxu1 %v3027_v13  ;;  %v3346_v61 = vadd.f32 %v3345_v6, %v3257_v63  ;;  %v2827_v6 = vsel %vm2808_vm2, %v841_v47, %v4483_v59  ;;  %v4513_v47 = vunpack.i.l.bf16 %v7622_v12 }
 0x3f9   : > { %v4477_v56 = vpop.permute.xlu1 %4476  ;;  %v3435_v57 = vadd.f32 %v7510_v1, %v3346_v61  ;;  %v7659_v1 = vpop.permute.xlu0 %4531 }
 0x3fa   : > { %v4479_v53 = vunpack.i.h.bf16 %v4477_v56  ;;  %v4478_v40 = vunpack.i.l.bf16 %v4477_v56  ;;  %v3347_v9 = vpop.f32.mrf.mxu2  ;;  %v7646_v34 = vpop.permute.xlu2 %4526  ;;  %v4499_v56 = vunpack.i.h.bf16 %v7590_v23  ;;  %v4504_v23 = vunpack.i.h.bf16 %v7605_v20 }
 0x3fb   : > { %v3514_v16 = vmax.f32 %v3435_v57, 0.0 }
 0x3fc   : > { %v3258_v51 = vpop.f32.mrf.mxu1  ;;  %v2989_v19 = vsel %vm2874_vm4, %v2957_v52, %v4478_v40  ;;  %v2990_v15 = vsel %vm2874_vm4, %v2958_v25, %v4479_v53  ;;  %v2860_v40 = vsel %vm2841_vm3, %v2827_v6, %v4488_v8 }
 0x3fd   : > { %v3259_v54 = vadd.f32 %v7618_v3, %v3258_v51  ;;  %v3031_v48 = vpack.c.bf16 %v2990_v15, %v2989_v19  ;;  %v2928_v51 = vsel %vm2808_vm2, %v8683_v27, %v4499_v56  ;;  %v2927_v19 = vsel %vm2808_vm2, %v8681_v50, %v4498_v26  ;;  %v7680_v57 = vpop.f32.mrf.mxu0 }
 0x3fe   : > { %v2960_v50 = vsel %vm2841_vm3, %v2928_v51, %v4504_v23  ;;  %v4518_v26 = vunpack.i.l.bf16 %v7633_v29 }
 0x3ff   : > { %v3348_v55 = vadd.f32 %v3347_v9, %v3259_v54  ;;  %3389 = vmatmul.bf16.gmra.mxu2 %v3031_v48  ;;  %v2861_v9 = vsel %vm2841_vm3, %v2828_v60, %v4489_v2  ;;  %v4503_v54 = vunpack.i.l.bf16 %v7605_v20 }
 0x401   : > { %v3437_v13 = vadd.f32 %v7547_v33, %v3348_v55  ;;  %v4492_v0 = vpop.permute.xlu1 %4491  ;;  %v2959_v27 = vsel %vm2841_vm3, %v2927_v19, %v4503_v54  ;;  %v7687_v56 = vpop.permute.xlu0 %4546 }
 0x402   : > { %v4494_v44 = vunpack.i.h.bf16 %v4492_v0  ;;  %v4493_v63 = vunpack.i.l.bf16 %v4492_v0  ;;  %v3350_v10 = vpop.f32.mrf.mxu2  ;;  %v7672_v48 = vpop.permute.xlu2 %4541 }
 0x403   : > { %v3515_v53 = vmax.f32 %v3437_v13, 0.0  ;;  %v8771_v13 = vld [vmem:[#allocation22_spill] sm:$0xff] }
 0x404   : > { %v3261_v52 = vpop.f32.mrf.mxu1  ;;  %v2893_v33 = vsel %vm2874_vm4, %v2860_v40, %v4493_v63  ;;  %v2894_v25 = vsel %vm2874_vm4, %v2861_v9, %v4494_v44  ;;  %v843_v0 = vmul.f32 %v8771_v13, %v8641_v11  ;;  %v8772_v44 = vld [vmem:[#allocation35_spill] sm:$0xff]  ;;  %v4519_v9 = vunpack.i.h.bf16 %v7633_v29 }
 0x405   : > { %v3030_v59 = vpack.c.bf16 %v2894_v25, %v2893_v33  ;;  %v3546_v61 = vpack.c.bf16 %v3515_v53, %v3514_v16  ;;  %v3262_v15 = vadd.f32 %v7618_v3, %v3261_v52  ;;  %v844_v63 = vmul.f32 %v8772_v44, %v8645_v4 }
 0x406   : > { %v2829_v53 = vsel %vm2808_vm2, %v843_v0, %v4513_v47  ;;  %v4529_v25 = vunpack.i.h.bf16 %v7646_v34  ;;  %v4533_v47 = vunpack.i.l.bf16 %v7659_v1 }
 0x407   : > { %3300 = vmatmul.bf16.gmra.mxu1 %v3030_v59  ;;  %4041 = vmatmul.msk.bf16.vlgmr.msrb.gmra.mxu3 %vm2808_vm2, %v3546_v61  ;;  %v3351_v55 = vadd.f32 %v3350_v10, %v3262_v15  ;;  %v2830_v10 = vsel %vm2808_vm2, %v844_v63, %v4514_v28  ;;  %v2862_v61 = vsel %vm2841_vm3, %v2829_v53, %v4518_v26  ;;  %v8773_v53 = vld [vmem:[#allocation34_spill] sm:$0xff] }
 0x408   : > { %v2863_v51 = vsel %vm2841_vm3, %v2830_v10, %v4519_v9  ;;  %v2930_v28 = vsel %vm2808_vm2, %v8706_v14, %v4529_v25  ;;  %v8774_v9 = vld [vmem:[#allocation25_spill] sm:$0xff]  ;;  %v4549_v25 = vunpack.i.h.bf16 %v7687_v56 }
 0x409   : > { %v4507_v45 = vpop.permute.xlu1 %4506  ;;  %v3440_v40 = vadd.f32 %v7571_v30, %v3351_v55  ;;  %v4528_v30 = vunpack.i.l.bf16 %v7646_v34  ;;  %v846_v26 = vmul.f32 %v8774_v9, %v6867_v38 }
 0x40a   : > { %v4509_v7 = vunpack.i.h.bf16 %v4507_v45  ;;  %v4508_v21 = vunpack.i.l.bf16 %v4507_v45  ;;  %v3352_v37 = vpop.f32.mrf.mxu2  ;;  %v7696_v59 = vpop.permute.xlu2 %4556 }
 0x40b   : > { %v3516_v15 = vmax.f32 %v3440_v40, 0.0  ;;  %v7703_v45 = vpop.f32.mrf.mxu3  ;;  %v2929_v34 = vsel %vm2808_vm2, %v8708_v58, %v4528_v30  ;;  %v4543_v58 = vunpack.i.l.bf16 %v7672_v48  ;;  %v845_v40 = vmul.f32 %v8773_v53, %v8671_v36 }
 0x40c   : > { %v3263_v60 = vpop.f32.mrf.mxu1  ;;  %v2991_v6 = vsel %vm2874_vm4, %v2959_v27, %v4508_v21  ;;  %v2992_v20 = vsel %vm2874_vm4, %v2960_v50, %v4509_v7  ;;  %v7705_v21 = vpop.f32.mrf.mxu0  ;;  %v4534_v50 = vunpack.i.h.bf16 %v7659_v1 }
 0x40d   : > { %v3264_v2 = vadd.f32 %v7618_v3, %v3263_v60  ;;  %v3034_v8 = vpack.c.bf16 %v2992_v20, %v2991_v6 }
 0x40e   : > { %v2962_v14 = vsel %vm2841_vm3, %v2930_v28, %v4534_v50 }
 0x40f   : > { %v3353_v12 = vadd.f32 %v3352_v37, %v3264_v2  ;;  %3394 = vmatmul.bf16.gmra.mxu2 %v3034_v8  ;;  %v7707_v37 = vpop.permute.xlu0 %4561  ;;  %v4544_v2 = vunpack.i.h.bf16 %v7672_v48  ;;  %v2961_v8 = vsel %vm2841_vm3, %v2929_v34, %v4533_v47 }
 0x411   : > { %v3442_v16 = vadd.f32 %v7602_v62, %v3353_v12  ;;  %v4522_v11 = vpop.permute.xlu1 %4521 }
 0x412   : > { %v4524_v52 = vunpack.i.h.bf16 %v4522_v11  ;;  %v4523_v33 = vunpack.i.l.bf16 %v4522_v11  ;;  %v3355_v4 = vpop.f32.mrf.mxu2  ;;  %v7723_v12 = vpop.permute.xlu2 %4571  ;;  %v2832_v11 = vsel %vm2808_vm2, %v846_v26, %v4544_v2  ;;  %v8775_v26 = vld [vmem:[#allocation199_spill] sm:$0xff] }
 0x413   : > { %v3517_v19 = vmax.f32 %v3442_v16, 0.0  ;;  %v7730_v48 = vpop.f32.mrf.mxu3 }
 0x414   : > { %v3266_v23 = vpop.f32.mrf.mxu1  ;;  %v2895_v29 = vsel %vm2874_vm4, %v2862_v61, %v4523_v33  ;;  %v2896_v62 = vsel %vm2874_vm4, %v2863_v51, %v4524_v52  ;;  %v2831_v52 = vsel %vm2808_vm2, %v845_v40, %v4543_v58  ;;  %v4548_v61 = vunpack.i.l.bf16 %v7687_v56 }
 0x415   : > { %v3033_v54 = vpack.c.bf16 %v2896_v62, %v2895_v29  ;;  %v3547_v7 = vpack.c.bf16 %v3517_v19, %v3516_v15  ;;  %v3267_v27 = vadd.f32 %v7618_v3, %v3266_v23  ;;  %v4559_v23 = vunpack.i.h.bf16 %v7696_v59 }
 0x416   : > { %v2864_v29 = vsel %vm2841_vm3, %v2831_v52, %v4548_v61  ;;  %v2865_v62 = vsel %vm2841_vm3, %v2832_v11, %v4549_v25  ;;  %v8777_v52 = vld [vmem:[#allocation202_spill] sm:$0xff] }
 0x417   : > { %3305 = vmatmul.bf16.gmra.mxu1 %v3033_v54  ;;  %4042 = vmatmul.msk.bf16.gmra.mxu3 %vm2808_vm2, %v3547_v7  ;;  %v3356_v13 = vadd.f32 %v3355_v4, %v3267_v27  ;;  %v7735_v4 = vpop.f32.mrf.mxu0  ;;  %v4577_v38 = vpop.permute.xlu0 %4576  ;;  %v4558_v54 = vunpack.i.l.bf16 %v7696_v59  ;;  %v2932_v47 = vsel %vm2808_vm2, %v6273_v18, %v4559_v23  ;;  %v4574_v18 = vunpack.i.h.bf16 %v7723_v12 }
 0x419   : > { %v4537_v55 = vpop.permute.xlu1 %4536  ;;  %v3445_v33 = vadd.f32 %v7629_v42, %v3356_v13 }
 0x41a   : > { %v4539_v60 = vunpack.i.h.bf16 %v4537_v55  ;;  %v4538_v6 = vunpack.i.l.bf16 %v4537_v55  ;;  %v3357_v20 = vpop.f32.mrf.mxu2  ;;  %v4587_v50 = vpop.permute.xlu2 %4586  ;;  %v2931_v55 = vsel %vm2808_vm2, %v8728_v46, %v4558_v54 }
 0x41b   : > { %v3518_v7 = vmax.f32 %v3445_v33, 0.0  ;;  %v7752_v59 = vpop.f32.mrf.mxu3  ;;  %v8778_v33 = vld [vmem:[#allocation36_spill] sm:$0xff] }
 0x41c   : > { %v3268_v0 = vpop.f32.mrf.mxu1  ;;  %v2993_v44 = vsel %vm2874_vm4, %v2961_v8, %v4538_v6  ;;  %v2994_v63 = vsel %vm2874_vm4, %v2962_v14, %v4539_v60  ;;  %v4564_v6 = vunpack.i.h.bf16 %v7707_v37  ;;  %v848_v25 = vmul.f32 %v8778_v33, %v8777_v52  ;;  %v8779_v52 = vld [vmem:[#allocation40_spill] sm:$0xff] }
 0x41d   : > { %v3269_v1 = vadd.f32 %v7618_v3, %v3268_v0  ;;  %v3037_v10 = vpack.c.bf16 %v2994_v63, %v2993_v44  ;;  %v4573_v63 = vunpack.i.l.bf16 %v7723_v12  ;;  %v850_v33 = vmul.f32 %v8779_v52, %v7009_v31  ;;  %v8782_v52 = vld [vmem:[#allocation31_spill] sm:$0xff] }
 0x41e   : > { %v2964_v0 = vsel %vm2841_vm3, %v2932_v47, %v4564_v6 }
 0x41f   : > { %v3358_v16 = vadd.f32 %v3357_v20, %v3269_v1  ;;  %3399 = vmatmul.bf16.gmra.mxu2 %v3037_v10  ;;  %v4563_v20 = vunpack.i.l.bf16 %v7707_v37  ;;  %v7756_v13 = vpop.f32.mrf.mxu0  ;;  %v4592_v44 = vpop.permute.xlu0 %4591 }
 0x421   : > { %v3447_v36 = vadd.f32 %v7654_v41, %v3358_v16  ;;  %v4552_v51 = vpop.permute.xlu1 %4551  ;;  %v2963_v46 = vsel %vm2841_vm3, %v2931_v55, %v4563_v20  ;;  %v8776_v16 = vld [vmem:[#allocation37_spill] sm:$0xff] }
 0x422   : > { %v4554_v19 = vunpack.i.h.bf16 %v4552_v51  ;;  %v4553_v30 = vunpack.i.l.bf16 %v4552_v51  ;;  %v3360_v15 = vpop.f32.mrf.mxu2  ;;  %v847_v11 = vmul.f32 %v8776_v16, %v8775_v26 }
 0x423   : > { %v3519_v42 = vmax.f32 %v3447_v36, 0.0  ;;  %v2834_v36 = vsel %vm2808_vm2, %v848_v25, %v4574_v18  ;;  %v8780_v25 = vld [vmem:[#allocation28_spill] sm:$0xff] }
 0x424   : > { %v3271_v28 = vpop.f32.mrf.mxu1  ;;  %v2897_v56 = vsel %vm2874_vm4, %v2864_v29, %v4553_v30  ;;  %v2898_v41 = vsel %vm2874_vm4, %v2865_v62, %v4554_v19  ;;  %v2833_v12 = vsel %vm2808_vm2, %v847_v11, %v4573_v63  ;;  %v4579_v19 = vunpack.i.h.bf16 %v4577_v38 }
 0x425   : > { %v3036_v34 = vpack.c.bf16 %v2898_v41, %v2897_v56  ;;  %v3548_v27 = vpack.c.bf16 %v3519_v42, %v3518_v7  ;;  %v3272_v60 = vadd.f32 %v7618_v3, %v3271_v28  ;;  %v4578_v30 = vunpack.i.l.bf16 %v4577_v38  ;;  %v7773_v7 = vpop.f32.mrf.mxu3 }
 0x426   : > { %v4589_v28 = vunpack.i.h.bf16 %v4587_v50  ;;  %v2867_v41 = vsel %vm2841_vm3, %v2834_v36, %v4579_v19 }
 0x427   : > { %3310 = vmatmul.bf16.gmra.mxu1 %v3036_v34  ;;  %4043 = vmatmul.msk.bf16.gmra.mxu3 %vm2808_vm2, %v3548_v27  ;;  %v3361_v1 = vadd.f32 %v3360_v15, %v3272_v60  ;;  %v4602_v15 = vpop.permute.xlu2 %4601  ;;  %v2866_v56 = vsel %vm2841_vm3, %v2833_v12, %v4578_v30  ;;  %v4588_v27 = vunpack.i.l.bf16 %v4587_v50  ;;  %v4607_v6 = vpop.permute.xlu0 %4606 }
 0x429   : > { %v4567_v2 = vpop.permute.xlu1 %4566  ;;  %v3450_v51 = vadd.f32 %v7680_v57, %v3361_v1  ;;  %v4604_v1 = vunpack.i.h.bf16 %v4602_v15 }
 0x42a   : > { %v4569_v8 = vunpack.i.h.bf16 %v4567_v2  ;;  %v4568_v14 = vunpack.i.l.bf16 %v4567_v2  ;;  %v3362_v58 = vpop.f32.mrf.mxu2  ;;  %v2934_v2 = vsel %vm2808_vm2, %v6329_v49, %v4589_v28  ;;  %v4603_v49 = vunpack.i.l.bf16 %v4602_v15 }
 0x42b   : > { %v3520_v47 = vmax.f32 %v3450_v51, 0.0  ;;  %v2836_v19 = vsel %vm2808_vm2, %v850_v33, %v4604_v1  ;;  %v852_v33 = vmul.f32 %v8782_v52, %v7130_v5 }
 0x42c   : > { %v3273_v10 = vpop.f32.mrf.mxu1  ;;  %v2995_v53 = vsel %vm2874_vm4, %v2963_v46, %v4568_v14  ;;  %v2996_v37 = vsel %vm2874_vm4, %v2964_v0, %v4569_v8  ;;  %v2933_v8 = vsel %vm2808_vm2, %v6327_v35, %v4588_v27  ;;  %v4594_v14 = vunpack.i.h.bf16 %v4592_v44 }
 0x42d   : > { %v3274_v40 = vadd.f32 %v7618_v3, %v3273_v10  ;;  %v3040_v9 = vpack.c.bf16 %v2996_v37, %v2995_v53  ;;  %v7791_v16 = vpop.f32.mrf.mxu3 }
 0x42e   : > { %v2966_v37 = vsel %vm2841_vm3, %v2934_v2, %v4594_v14 }
 0x42f   : > { %v3363_v61 = vadd.f32 %v3362_v58, %v3274_v40  ;;  %3404 = vmatmul.bf16.gmra.mxu2 %v3040_v9  ;;  %v4593_v58 = vunpack.i.l.bf16 %v4592_v44  ;;  %v4617_v10 = vpop.permute.xlu2 %4616  ;;  %v4622_v51 = vpop.permute.xlu0 %4621 }
 0x430   : > { %v4618_v27 = vunpack.i.l.bf16 %v4617_v10  ;;  %v4624_v14 = vunpack.i.h.bf16 %v4622_v51 }
 0x431   : > { %v3452_v23 = vadd.f32 %v7705_v21, %v3363_v61  ;;  %v4582_v29 = vpop.permute.xlu1 %4581  ;;  %v7779_v21 = vpop.f32.mrf.mxu0  ;;  %v2965_v53 = vsel %vm2841_vm3, %v2933_v8, %v4593_v58  ;;  %v849_v61 = vmul.f32 %v8780_v25, %v7015_v39  ;;  %v4623_v58 = vunpack.i.l.bf16 %v4622_v51 }
 0x432   : > { %v4584_v62 = vunpack.i.h.bf16 %v4582_v29  ;;  %v4583_v42 = vunpack.i.l.bf16 %v4582_v29  ;;  %v3365_v54 = vpop.f32.mrf.mxu2  ;;  %v4608_v29 = vunpack.i.l.bf16 %v4607_v6  ;;  %v2935_v8 = vsel %vm2808_vm2, %v8557_v17, %v4618_v27 }
 0x433   : > { %v3521_v34 = vmax.f32 %v3452_v23, 0.0  ;;  %v2835_v30 = vsel %vm2808_vm2, %v849_v61, %v4603_v49  ;;  %v4609_v23 = vunpack.i.h.bf16 %v4607_v6 }
 0x434   : > { %v3276_v57 = vpop.f32.mrf.mxu1  ;;  %v2899_v38 = vsel %vm2874_vm4, %v2866_v56, %v4583_v42  ;;  %v2900_v55 = vsel %vm2874_vm4, %v2867_v41, %v4584_v62  ;;  %v4619_v56 = vunpack.i.h.bf16 %v4617_v10  ;;  %v2868_v41 = vsel %vm2841_vm3, %v2835_v30, %v4608_v29 }
 0x435   : > { %v3039_v60 = vpack.c.bf16 %v2900_v55, %v2899_v38  ;;  %v3549_v20 = vpack.c.bf16 %v3521_v34, %v3520_v47  ;;  %v3277_v50 = vadd.f32 %v7618_v3, %v3276_v57  ;;  %v2869_v34 = vsel %vm2841_vm3, %v2836_v19, %v4609_v23  ;;  %v7806_v6 = vpop.f32.mrf.mxu3 }
 0x436   : > { %v2936_v2 = vsel %vm2808_vm2, %v8573_v32, %v4619_v56 }
 0x437   : > { %3315 = vmatmul.bf16.gmra.mxu1 %v3039_v60  ;;  %4044 = vmatmul.msk.bf16.gmra.mxu3 %vm2808_vm2, %v3549_v20  ;;  %v3366_v40 = vadd.f32 %v3365_v54, %v3277_v50  ;;  %v4632_v55 = vpop.permute.xlu2 %4631 }
 0x438   : > { %v4634_v32 = vunpack.i.h.bf16 %v4632_v55  ;;  %v4633_v49 = vunpack.i.l.bf16 %v4632_v55  ;;  %v8783_v55 = vld [vmem:[#allocation197_spill] sm:$0xff] }
 0x439   : > { %v4597_v18 = vpop.permute.xlu1 %4596  ;;  %v3461_v36 = vpop.f32.mrf.mxu0  ;;  %v3455_v15 = vadd.f32 %v7735_v4, %v3366_v40 }
 0x43a   : > { %v4599_v46 = vunpack.i.h.bf16 %v4597_v18  ;;  %v4598_v0 = vunpack.i.l.bf16 %v4597_v18  ;;  %v3367_v63 = vpop.f32.mrf.mxu2  ;;  %v2838_v51 = vsel %vm2808_vm2, %v852_v33, %v4634_v32 }
 0x43b   : > { %v3522_v47 = vmax.f32 %v3455_v15, 0.0 }
 0x43c   : > { %v3278_v9 = vpop.f32.mrf.mxu1  ;;  %v2997_v35 = vsel %vm2874_vm4, %v2965_v53, %v4598_v0  ;;  %v2998_v26 = vsel %vm2874_vm4, %v2966_v37, %v4599_v46  ;;  %v4637_v46 = vpop.permute.xlu0 %4636  ;;  %v2967_v53 = vsel %vm2841_vm3, %v2935_v8, %v4623_v58  ;;  %v2968_v37 = vsel %vm2841_vm3, %v2936_v2, %v4624_v14 }
 0x43d   : > { %v3279_v44 = vadd.f32 %v7618_v3, %v3278_v9  ;;  %v3043_v11 = vpack.c.bf16 %v2998_v26, %v2997_v35  ;;  %v7828_v30 = vpop.f32.mrf.mxu3  ;;  %v4639_v15 = vunpack.i.h.bf16 %v4637_v46  ;;  %v4638_v23 = vunpack.i.l.bf16 %v4637_v46 }
 0x43f   : > { %v3368_v12 = vadd.f32 %v3367_v63, %v3279_v44  ;;  %3409 = vmatmul.bf16.gmra.mxu2 %v3043_v11  ;;  %v8781_v44 = vld [vmem:[#allocation39_spill] sm:$0xff]  ;;  %v4647_v25 = vpop.permute.xlu2 %4646  ;;  %v2871_v56 = vsel %vm2841_vm3, %v2838_v51, %v4639_v15 }
 0x440   : > { %v851_v11 = vmul.f32 %v8781_v44, %v7116_v43 }
 0x441   : > { %v3457_v62 = vadd.f32 %v7756_v13, %v3368_v12  ;;  %v4612_v42 = vpop.permute.xlu1 %4611  ;;  %v7814_v50 = vpop.f32.mrf.mxu0 }
 0x442   : > { %v4614_v54 = vunpack.i.h.bf16 %v4612_v42  ;;  %v4613_v31 = vunpack.i.l.bf16 %v4612_v42  ;;  %v3370_v28 = vpop.f32.mrf.mxu2  ;;  %v2837_v19 = vsel %vm2808_vm2, %v851_v11, %v4633_v49  ;;  %v8786_v11 = vld [vmem:[#allocation43_spill] sm:$0xff] }
 0x443   : > { %v3523_v39 = vmax.f32 %v3457_v62, 0.0  ;;  %v853_v52 = vmul.f32 %v8786_v11, %v7200_v22 }
 0x444   : > { %v3281_v57 = vpop.f32.mrf.mxu1  ;;  %v2901_v38 = vsel %vm2874_vm4, %v2868_v41, %v4613_v31  ;;  %v2902_v4 = vsel %vm2874_vm4, %v2869_v34, %v4614_v54  ;;  %v4649_v41 = vunpack.i.h.bf16 %v4647_v25  ;;  %v4648_v34 = vunpack.i.l.bf16 %v4647_v25 }
 0x445   : > { %v3042_v60 = vpack.c.bf16 %v2902_v4, %v2901_v38  ;;  %v3550_v13 = vpack.c.bf16 %v3523_v39, %v3522_v47  ;;  %v3282_v20 = vadd.f32 %v7618_v3, %v3281_v57  ;;  %v4652_v39 = vpop.permute.xlu0 %4651 }
 0x446   : > { %v4654_v2 = vunpack.i.h.bf16 %v4652_v39  ;;  %v4653_v8 = vunpack.i.l.bf16 %v4652_v39 }
 0x447   : > { %3320 = vmatmul.bf16.gmra.mxu1 %v3042_v60  ;;  %4045 = vmatmul.msk.bf16.gmra.mxu3 %vm2808_vm2, %v3550_v13  ;;  %v3371_v10 = vadd.f32 %v3370_v28, %v3282_v20  ;;  %v2938_v60 = vsel %vm2808_vm2, %v8783_v55, %v4649_v41  ;;  %v8784_v13 = vld [vmem:[#allocation196_spill] sm:$0xff]  ;;  %v4662_v14 = vpop.permute.xlu2 %4661 }
 0x448   : > { %v2937_v20 = vsel %vm2808_vm2, %v8784_v13, %v4648_v34  ;;  %v4663_v32 = vunpack.i.l.bf16 %v4662_v14 }
 0x449   : > { %v4627_v18 = vpop.permute.xlu1 %4626  ;;  %v3460_v61 = vadd.f32 %v7779_v21, %v3371_v10  ;;  %v3466_v31 = vpop.f32.mrf.mxu0  ;;  %v2870_v21 = vsel %vm2841_vm3, %v2837_v19, %v4638_v23  ;;  %v2969_v10 = vsel %vm2841_vm3, %v2937_v20, %v4653_v8 }
 0x44a   : > { %v4629_v0 = vunpack.i.h.bf16 %v4627_v18  ;;  %v4628_v63 = vunpack.i.l.bf16 %v4627_v18  ;;  %v3372_v1 = vpop.f32.mrf.mxu2  ;;  %v2839_v19 = vsel %vm2808_vm2, %v853_v52, %v4663_v32 }
 0x44b   : > { %v3524_v5 = vmax.f32 %v3460_v61, 0.0 }
 0x44c   : > { %v3283_v40 = vpop.f32.mrf.mxu1  ;;  %v2999_v17 = vsel %vm2874_vm4, %v2967_v53, %v4628_v63  ;;  %v3000_v9 = vsel %vm2874_vm4, %v2968_v37, %v4629_v0  ;;  %v7840_v63 = vpop.f32.mrf.mxu3  ;;  %v2970_v53 = vsel %vm2841_vm3, %v2938_v60, %v4654_v2  ;;  %v4664_v37 = vunpack.i.h.bf16 %v4662_v14 }
 0x44d   : > { %v3284_v35 = vadd.f32 %v7618_v3, %v3283_v40  ;;  %v3046_v26 = vpack.c.bf16 %v3000_v9, %v2999_v17  ;;  %v4667_v25 = vpop.permute.xlu0 %4666 }
 0x44e   : > { %v4669_v15 = vunpack.i.h.bf16 %v4667_v25  ;;  %v4668_v23 = vunpack.i.l.bf16 %v4667_v25 }
 0x44f   : > { %v3373_v12 = vadd.f32 %v3372_v1, %v3284_v35  ;;  %3414 = vmatmul.bf16.gmra.mxu2 %v3046_v26  ;;  %v8785_v26 = vld [vmem:[#allocation42_spill] sm:$0xff] }
 0x450   : > { %v854_v44 = vmul.f32 %v8785_v26, %v7210_v24  ;;  %v2872_v22 = vsel %vm2841_vm3, %v2839_v19, %v4668_v23 }
 0x451   : > { %v3462_v29 = vadd.f32 %v3461_v36, %v3373_v12  ;;  %v4642_v62 = vpop.permute.xlu1 %4641  ;;  %v3469_v33 = vpop.f32.mrf.mxu0 }
 0x452   : > { %v4644_v42 = vunpack.i.h.bf16 %v4642_v62  ;;  %v4643_v43 = vunpack.i.l.bf16 %v4642_v62  ;;  %v3375_v54 = vpop.f32.mrf.mxu2  ;;  %v2840_v51 = vsel %vm2808_vm2, %v854_v44, %v4664_v37 }
 0x453   : > { %v3525_v28 = vmax.f32 %v3462_v29, 0.0 }
 0x454   : > { %v3286_v27 = vpop.f32.mrf.mxu1  ;;  %v2903_v47 = vsel %vm2874_vm4, %v2870_v21, %v4643_v43  ;;  %v2904_v57 = vsel %vm2874_vm4, %v2871_v56, %v4644_v42  ;;  %v7858_v39 = vpop.f32.mrf.mxu3 }
 0x455   : > { %v3045_v36 = vpack.c.bf16 %v2904_v57, %v2903_v47  ;;  %v3551_v38 = vpack.c.bf16 %v3525_v28, %v3524_v5  ;;  %v3287_v4 = vadd.f32 %v7618_v3, %v3286_v27  ;;  %v2873_v28 = vsel %vm2841_vm3, %v2840_v51, %v4669_v15 }
 0x457   : > { %3325 = vmatmul.bf16.gmra.mxu1 %v3045_v36  ;;  %4046 = vmatmul.msk.bf16.gmra.mxu3 %vm2808_vm2, %v3551_v38  ;;  %v3376_v1 = vadd.f32 %v3375_v54, %v3287_v4 }
 0x459   : > { %v4657_v58 = vpop.permute.xlu1 %4656  ;;  %v3465_v61 = vadd.f32 %v7814_v50, %v3376_v1  ;;  %v3471_v27 = vpop.f32.mrf.mxu0 }
 0x45a   : > { %v4659_v18 = vunpack.i.h.bf16 %v4657_v58  ;;  %v4658_v46 = vunpack.i.l.bf16 %v4657_v58  ;;  %v3377_v0 = vpop.f32.mrf.mxu2 }
 0x45b   : > { %v3526_v54 = vmax.f32 %v3465_v61, 0.0  ;;  %v7877_v61 = vld [vmem:[%s8051_s7] ss:$0 sm:$0xff] }
 0x45c   : > { %v3288_v49 = vpop.f32.mrf.mxu1  ;;  %v3001_v40 = vsel %vm2874_vm4, %v2969_v10, %v4658_v46  ;;  %v3002_v17 = vsel %vm2874_vm4, %v2970_v53, %v4659_v18  ;;  %v7863_v4 = vpop.f32.mrf.mxu3 }
 0x45d   : > { %v3289_v9 = vadd.f32 %v7618_v3, %v3288_v49  ;;  %v3049_v35 = vpack.c.bf16 %v3002_v17, %v3001_v40 }
 0x45f   : > { %v3378_v12 = vadd.f32 %v3377_v0, %v3289_v9  ;;  %3419 = vmatmul.bf16.gmra.mxu2 %v3049_v35 }
 0x461   : > { %v3467_v29 = vadd.f32 %v3466_v31, %v3378_v12  ;;  %v4672_v62 = vpop.permute.xlu1 %4671  ;;  %v3474_v20 = vpop.f32.mrf.mxu0 }
 0x462   : > { %v4674_v42 = vunpack.i.h.bf16 %v4672_v62  ;;  %v4673_v43 = vunpack.i.l.bf16 %v4672_v62  ;;  %v3380_v24 = vpop.f32.mrf.mxu2  ;;  %v4705_v62 = vld [vmem:[%s4988_s20] sm:$0xff] }
 0x463   : > { %v3527_v5 = vmax.f32 %v3467_v29, 0.0 }
 0x464   : > { %v3291_v50 = vpop.f32.mrf.mxu1  ;;  %v2905_v21 = vsel %vm2874_vm4, %v2872_v22, %v4673_v43  ;;  %v2906_v56 = vsel %vm2874_vm4, %v2873_v28, %v4674_v42  ;;  %v7867_v0 = vpop.f32.mrf.mxu3 }
 0x465   : > { %v3552_v41 = vpack.c.bf16 %v3527_v5, %v3526_v54  ;;  %v3048_v34 = vpack.c.bf16 %v2906_v56, %v2905_v21  ;;  %v3292_v31 = vadd.f32 %v7618_v3, %v3291_v50 }
 0x467   : > { %3330 = vmatmul.bf16.gmra.mxu1 %v3048_v34  ;;  %4047 = vmatmul.msk.bf16.gmra.mxu3 %vm2808_vm2, %v3552_v41  ;;  %v3381_v57 = vadd.f32 %v3380_v24, %v3292_v31 }
 0x469   : > { %v3470_v55 = vadd.f32 %v3469_v33, %v3381_v57  ;;  %v3476_v53 = vpop.f32.mrf.mxu0 }
 0x46a   : > { %v3382_v47 = vpop.f32.mrf.mxu2 }
 0x46b   : > { %v3528_v8 = vmax.f32 %v3470_v55, 0.0 }
 0x46c   : > { %v3293_v36 = vpop.f32.mrf.mxu1  ;;  %v7870_v35 = vpop.f32.mrf.mxu3 }
 0x46d   : > { %v3294_v38 = vadd.f32 %v7618_v3, %v3293_v36 }
 0x46f   : > { %v3383_v60 = vadd.f32 %v3382_v47, %v3294_v38 }
 0x471   : > { %v3472_v13 = vadd.f32 %v3471_v27, %v3383_v60  ;;  %v3479_v33 = vpop.f32.mrf.mxu0  ;;  %v4706_v27 = vld [vmem:[%s4988_s20 + $0x8] sm:$0xff] }
 0x472   : > { %v3385_v2 = vpop.f32.mrf.mxu2 }
 0x473   : > { %v3529_v14 = vmax.f32 %v3472_v13, 0.0 }
 0x474   : > { %v3296_v58 = vpop.f32.mrf.mxu1 }
 0x475   : > { %v3553_v18 = vpack.c.bf16 %v3529_v14, %v3528_v8  ;;  %v3297_v46 = vadd.f32 %v7618_v3, %v3296_v58  ;;  %v4707_v8 = vld [vmem:[%s4988_s20 + $0x10] sm:$0xff] }
 0x477   : > { %4048 = vmatmul.msk.bf16.gmra.mxu3 %vm2808_vm2, %v3553_v18  ;;  %v3386_v10 = vadd.f32 %v3385_v2, %v3297_v46 }
 0x479   : > { %v3475_v49 = vadd.f32 %v3474_v20, %v3386_v10  ;;  %v3481_v54 = vpop.f32.mrf.mxu0 }
 0x47a   : > { %v3387_v1 = vpop.f32.mrf.mxu2 }
 0x47b   : > { %v3530_v26 = vmax.f32 %v3475_v49, 0.0 }
 0x47c   : > { %v3298_v37 = vpop.f32.mrf.mxu1 }
 0x47d   : > { %v3299_v32 = vadd.f32 %v7618_v3, %v3298_v37 }
 0x47f   : > { %v3388_v40 = vadd.f32 %v3387_v1, %v3299_v32 }
 0x481   : > { %v3477_v17 = vadd.f32 %v3476_v53, %v3388_v40 }
 0x482   : > { %v3390_v9 = vpop.f32.mrf.mxu2 }
 0x483   : > { %v3531_v44 = vmax.f32 %v3477_v17, 0.0 }
 0x484   : > { %v3301_v11 = vpop.f32.mrf.mxu1 }
 0x485   : > { %v3554_v52 = vpack.c.bf16 %v3531_v44, %v3530_v26  ;;  %v3302_v25 = vadd.f32 %v7618_v3, %v3301_v11 }
 0x487   : > { %4049 = vmatmul.msk.bf16.gmra.mxu3 %vm2808_vm2, %v3554_v52  ;;  %v3391_v51 = vadd.f32 %v3390_v9, %v3302_v25  ;;  %v4708_v9 = vld [vmem:[%s4988_s20 + $0x18] sm:$0xff] }
 0x489   : > { %v3480_v43 = vadd.f32 %v3479_v33, %v3391_v51  ;;  %v4709_v51 = vld [vmem:[%s4988_s20 + $0x20] sm:$0xff] }
 0x48a   : > { %v3392_v12 = vpop.f32.mrf.mxu2  ;;  %v3639_v19 = vpop.f32.mrf.mxu3 }
 0x48b   : > { %v3640_v15 = vadd.f32 %v7877_v61, %v3639_v19  ;;  %v3532_v50 = vmax.f32 %v3480_v43, 0.0 }
 0x48c   : > { %v3303_v23 = vpop.f32.mrf.mxu1 }
 0x48d   : > { %v3304_v29 = vadd.f32 %v7618_v3, %v3303_v23  ;;  %v3719_v42 = vadd.f32 %v4705_v62, %v3640_v15 }
 0x48f   : > { %v3393_v24 = vadd.f32 %v3392_v12, %v3304_v29  ;;  %v3751_v5 = vmax.f32 %v3719_v42, 0.0 }
 0x491   : > { %v3482_v22 = vadd.f32 %v3481_v54, %v3393_v24  ;;  %3783 = vst [vmem:[%s7884_s12] sm:$0xff] %v3751_v5 }
 0x492   : > { %v3395_v28 = vpop.f32.mrf.mxu2  ;;  %v3641_v56 = vpop.f32.mrf.mxu3 }
 0x493   : > { %v3533_v21 = vmax.f32 %v3482_v22, 0.0  ;;  %v3642_v41 = vadd.f32 %v7877_v61, %v3641_v56 }
 0x494   : > { %v3306_v34 = vpop.f32.mrf.mxu1 }
 0x495   : > { %v3555_v31 = vpack.c.bf16 %v3533_v21, %v3532_v50  ;;  %v3720_v47 = vadd.f32 %v4706_v27, %v3642_v41  ;;  %v3307_v57 = vadd.f32 %v7618_v3, %v3306_v34  ;;  %v4710_v50 = vld [vmem:[%s4988_s20 + $0x28] sm:$0xff] }
 0x497   : > { %v3752_v36 = vmax.f32 %v3720_v47, 0.0  ;;  %4050 = vmatmul.msk.bf16.gmra.mxu3 %vm2808_vm2, %v3555_v31  ;;  %v3396_v55 = vadd.f32 %v3395_v28, %v3307_v57  ;;  %v4711_v57 = vld [vmem:[%s4988_s20 + $0x30] sm:$0xff] }
 0x499   : > { %3784 = vst [vmem:[%s7884_s12 + $0x8] sm:$0xff] %v3752_v36  ;;  %v3485_v58 = vadd.f32 %v7703_v45, %v3396_v55 }
 0x49a   : > { %v3397_v38 = vpop.f32.mrf.mxu2  ;;  %v3644_v60 = vpop.f32.mrf.mxu3 }
 0x49b   : > { %v3645_v13 = vadd.f32 %v7877_v61, %v3644_v60  ;;  %v3534_v53 = vmax.f32 %v3485_v58, 0.0 }
 0x49c   : > { %v3308_v20 = vpop.f32.mrf.mxu1 }
 0x49d   : > { %v3309_v2 = vadd.f32 %v7618_v3, %v3308_v20  ;;  %v3721_v14 = vadd.f32 %v4707_v8, %v3645_v13 }
 0x49f   : > { %v3398_v18 = vadd.f32 %v3397_v38, %v3309_v2  ;;  %v3753_v46 = vmax.f32 %v3721_v14, 0.0 }
 0x4a1   : > { %v3487_v1 = vadd.f32 %v7730_v48, %v3398_v18  ;;  %3785 = vst [vmem:[%s7884_s12 + $0x10] sm:$0xff] %v3753_v46 }
 0x4a2   : > { %v3400_v10 = vpop.f32.mrf.mxu2  ;;  %v3646_v32 = vpop.f32.mrf.mxu3 }
 0x4a3   : > { %v3535_v37 = vmax.f32 %v3487_v1, 0.0  ;;  %v3647_v49 = vadd.f32 %v7877_v61, %v3646_v32  ;;  %v4712_v1 = vld [vmem:[%s4988_s20 + $0x38] sm:$0xff] }
 0x4a4   : > { %v3311_v40 = vpop.f32.mrf.mxu1 }
 0x4a5   : > { %v3556_v17 = vpack.c.bf16 %v3535_v37, %v3534_v53  ;;  %v3722_v26 = vadd.f32 %v4708_v9, %v3647_v49  ;;  %v3312_v44 = vadd.f32 %v7618_v3, %v3311_v40  ;;  %v4713_v9 = vld [vmem:[%s4988_s20 + $0x40] sm:$0xff] }
 0x4a7   : > { %v3754_v45 = vmax.f32 %v3722_v26, 0.0  ;;  %4051 = vmatmul.msk.bf16.gmra.mxu3 %vm2808_vm2, %v3556_v17  ;;  %v3401_v11 = vadd.f32 %v3400_v10, %v3312_v44 }
 0x4a9   : > { %3786 = vst [vmem:[%s7884_s12 + $0x18] sm:$0xff] %v3754_v45  ;;  %v3490_v15 = vadd.f32 %v7752_v59, %v3401_v11 }
 0x4aa   : > { %v3402_v48 = vpop.f32.mrf.mxu2  ;;  %v3649_v52 = vpop.f32.mrf.mxu3 }
 0x4ab   : > { %v3650_v33 = vadd.f32 %v7877_v61, %v3649_v52  ;;  %v3536_v43 = vmax.f32 %v3490_v15, 0.0 }
 0x4ac   : > { %v3313_v25 = vpop.f32.mrf.mxu1 }
 0x4ad   : > { %v3314_v12 = vadd.f32 %v7618_v3, %v3313_v25  ;;  %v3723_v19 = vadd.f32 %v4709_v51, %v3650_v33 }
 0x4af   : > { %v3403_v23 = vadd.f32 %v3402_v48, %v3314_v12  ;;  %v3755_v29 = vmax.f32 %v3723_v19, 0.0 }
 0x4b1   : > { %v3492_v62 = vadd.f32 %v7773_v7, %v3403_v23  ;;  %3787 = vst [vmem:[%s7884_s12 + $0x20] sm:$0xff] %v3755_v29 }
 0x4b2   : > { %v3405_v42 = vpop.f32.mrf.mxu2  ;;  %v3651_v54 = vpop.f32.mrf.mxu3 }
 0x4b3   : > { %v3537_v24 = vmax.f32 %v3492_v62, 0.0  ;;  %v3652_v5 = vadd.f32 %v7877_v61, %v3651_v54 }
 0x4b4   : > { %v3316_v22 = vpop.f32.mrf.mxu1 }
 0x4b5   : > { %v3557_v28 = vpack.c.bf16 %v3537_v24, %v3536_v43  ;;  %v3724_v21 = vadd.f32 %v4710_v50, %v3652_v5  ;;  %v3317_v56 = vadd.f32 %v7618_v3, %v3316_v22  ;;  %v4716_v22 = vld [vmem:[%s4988_s20 + $0x50] sm:$0xff] }
 0x4b7   : > { %v3756_v59 = vmax.f32 %v3724_v21, 0.0  ;;  %4052 = vmatmul.msk.bf16.gmra.mxu3 %vm2808_vm2, %v3557_v28  ;;  %v3406_v41 = vadd.f32 %v3405_v42, %v3317_v56 }
 0x4b9   : > { %3788 = vst [vmem:[%s7884_s12 + $0x28] sm:$0xff] %v3756_v59  ;;  %v3495_v38 = vadd.f32 %v7791_v16, %v3406_v41 }
 0x4ba   : > { %v3407_v7 = vpop.f32.mrf.mxu2  ;;  %v3654_v34 = vpop.f32.mrf.mxu3 }
 0x4bb   : > { %v3655_v31 = vadd.f32 %v7877_v61, %v3654_v34  ;;  %v3538_v2 = vmax.f32 %v3495_v38, 0.0 }
 0x4bc   : > { %v3318_v27 = vpop.f32.mrf.mxu1 }
 0x4bd   : > { %v3319_v47 = vadd.f32 %v7618_v3, %v3318_v27  ;;  %v3725_v36 = vadd.f32 %v4711_v57, %v3655_v31 }
 0x4bf   : > { %v3408_v55 = vadd.f32 %v3407_v7, %v3319_v47  ;;  %v3757_v60 = vmax.f32 %v3725_v36, 0.0  ;;  %v4717_v36 = vld [vmem:[%s4988_s20 + $0x58] sm:$0xff] }
 0x4c1   : > { %v3497_v13 = vadd.f32 %v7806_v6, %v3408_v55  ;;  %3789 = vst [vmem:[%s7884_s12 + $0x30] sm:$0xff] %v3757_v60 }
 0x4c2   : > { %v3410_v20 = vpop.f32.mrf.mxu2  ;;  %v3656_v14 = vpop.f32.mrf.mxu3 }
 0x4c3   : > { %v3539_v8 = vmax.f32 %v3497_v13, 0.0  ;;  %v3657_v58 = vadd.f32 %v7877_v61, %v3656_v14  ;;  %v4718_v14 = vld [vmem:[%s4988_s20 + $0x60] sm:$0xff] }
 0x4c4   : > { %v3321_v18 = vpop.f32.mrf.mxu1 }
 0x4c5   : > { %v3558_v46 = vpack.c.bf16 %v3539_v8, %v3538_v2  ;;  %v3726_v10 = vadd.f32 %v4712_v1, %v3657_v58  ;;  %v3322_v53 = vadd.f32 %v7618_v3, %v3321_v18 }
 0x4c7   : > { %v3758_v16 = vmax.f32 %v3726_v10, 0.0  ;;  %4053 = vmatmul.msk.bf16.gmra.mxu3 %vm2808_vm2, %v3558_v46  ;;  %v3411_v37 = vadd.f32 %v3410_v20, %v3322_v53 }
 0x4c9   : > { %3790 = vst [vmem:[%s7884_s12 + $0x38] sm:$0xff] %v3758_v16  ;;  %v3500_v44 = vadd.f32 %v7828_v30, %v3411_v37  ;;  %v4715_v30 = vld [vmem:[%s8049_s5] ss:$0 sm:$0xff] }
 0x4ca   : > { %v3412_v6 = vpop.f32.mrf.mxu2  ;;  %v3659_v32 = vpop.f32.mrf.mxu3 }
 0x4cb   : > { %v3660_v49 = vadd.f32 %v7877_v61, %v3659_v32  ;;  %v3540_v33 = vmax.f32 %v3500_v44, 0.0 }
 0x4cc   : > { %v3323_v40 = vpop.f32.mrf.mxu1 }
 0x4cd   : > { %v3324_v17 = vadd.f32 %v7618_v3, %v3323_v40  ;;  %v3727_v26 = vadd.f32 %v4713_v9, %v3660_v49  ;;  %v4714_v3 = vld [vmem:[%s4988_s20 + $0x48] sm:$0xff]  ;;  %v4720_v9 = vld [vmem:[%s4988_s20 + $0x70] sm:$0xff] }
 0x4ce   : > { %v4719_v49 = vld [vmem:[%s4988_s20 + $0x68] sm:$0xff] }
 0x4cf   : > { %v3413_v45 = vadd.f32 %v3412_v6, %v3324_v17  ;;  %v3759_v48 = vmax.f32 %v3727_v26, 0.0 }
 0x4d1   : > { %v3502_v11 = vadd.f32 %v7840_v63, %v3413_v45  ;;  %3791 = vst [vmem:[%s7884_s12 + $0x40] sm:$0xff] %v3759_v48 }
 0x4d2   : > { %v3415_v52 = vpop.f32.mrf.mxu2  ;;  %v3661_v12 = vpop.f32.mrf.mxu3 }
 0x4d3   : > { %v3541_v25 = vmax.f32 %v3502_v11, 0.0  ;;  %v3662_v51 = vadd.f32 %v7877_v61, %v3661_v12  ;;  %v4721_v11 = vld [vmem:[%s4988_s20 + $0x78] sm:$0xff] }
 0x4d4   : > { %v3326_v19 = vpop.f32.mrf.mxu1 }
 0x4d5   : > { %v3559_v15 = vpack.c.bf16 %v3541_v25, %v3540_v33  ;;  %v3728_v23 = vadd.f32 %v4714_v3, %v3662_v51  ;;  %v3327_v29 = vadd.f32 %v4715_v30, %v3326_v19  ;;  %v4722_v51 = vld [vmem:[%s4988_s20 + $0x80] sm:$0xff] }
 0x4d7   : > { %v3760_v62 = vmax.f32 %v3728_v23, 0.0  ;;  %4054 = vmatmul.msk.bf16.gmra.mxu3 %vm2808_vm2, %v3559_v15  ;;  %v3416_v42 = vadd.f32 %v3415_v52, %v3327_v29 }
 0x4d9   : > { %3792 = vst [vmem:[%s7884_s12 + $0x48] sm:$0xff] %v3760_v62  ;;  %v3505_v50 = vadd.f32 %v7858_v39, %v3416_v42 }
 0x4da   : > { %v3417_v63 = vpop.f32.mrf.mxu2  ;;  %v3664_v43 = vpop.f32.mrf.mxu3 }
 0x4db   : > { %v3665_v24 = vadd.f32 %v7877_v61, %v3664_v43  ;;  %v3542_v7 = vmax.f32 %v3505_v50, 0.0  ;;  %v4724_v43 = vld [vmem:[%s4988_s20 + $0x90] sm:$0xff] }
 0x4dc   : > { %v3328_v54 = vpop.f32.mrf.mxu1 }
 0x4dd   : > { %v3329_v5 = vadd.f32 %v4715_v30, %v3328_v54  ;;  %v3729_v28 = vadd.f32 %v4716_v22, %v3665_v24 }
 0x4df   : > { %v3418_v21 = vadd.f32 %v3417_v63, %v3329_v5  ;;  %v3761_v56 = vmax.f32 %v3729_v28, 0.0  ;;  %v4725_v28 = vld [vmem:[%s4988_s20 + $0x98] sm:$0xff] }
 0x4e1   : > { %v3507_v59 = vadd.f32 %v7863_v4, %v3418_v21  ;;  %3793 = vst [vmem:[%s7884_s12 + $0x50] sm:$0xff] %v3761_v56 }
 0x4e2   : > { %v3666_v34 = vpop.f32.mrf.mxu3  ;;  %v3420_v31 = vpop.f32.mrf.mxu2 }
 0x4e3   : > { %v3543_v41 = vmax.f32 %v3507_v59, 0.0  ;;  %v3667_v27 = vadd.f32 %v7877_v61, %v3666_v34 }
 0x4e4   : > { %v3331_v47 = vpop.f32.mrf.mxu1 }
 0x4e5   : > { %v3560_v57 = vpack.c.bf16 %v3543_v41, %v3542_v7  ;;  %v3730_v38 = vadd.f32 %v4717_v36, %v3667_v27  ;;  %v3332_v55 = vadd.f32 %v4715_v30, %v3331_v47  ;;  %v4726_v7 = vld [vmem:[%s4988_s20 + $0xa0] sm:$0xff]  ;;  %v4727_v47 = vld [vmem:[%s4988_s20 + $0xa8] sm:$0xff] }
 0x4e7   : > { %v3762_v39 = vmax.f32 %v3730_v38, 0.0  ;;  %4055 = vmatmul.msk.bf16.gmra.mxu3 %vm2808_vm2, %v3560_v57  ;;  %v3421_v60 = vadd.f32 %v3420_v31, %v3332_v55 }
 0x4e9   : > { %3794 = vst [vmem:[%s7884_s12 + $0x58] sm:$0xff] %v3762_v39  ;;  %v3510_v18 = vadd.f32 %v7867_v0, %v3421_v60  ;;  %v4728_v39 = vld [vmem:[%s4988_s20 + $0xb0] sm:$0xff] }
 0x4ea   : > { %v3669_v4 = vpop.f32.mrf.mxu3  ;;  %v3422_v8 = vpop.f32.mrf.mxu2 }
 0x4eb   : > { %v3670_v13 = vadd.f32 %v7877_v61, %v3669_v4  ;;  %v3544_v53 = vmax.f32 %v3510_v18, 0.0 }
 0x4ec   : > { %v3333_v20 = vpop.f32.mrf.mxu1 }
 0x4ed   : > { %v3334_v2 = vadd.f32 %v4715_v30, %v3333_v20  ;;  %v3731_v58 = vadd.f32 %v4718_v14, %v3670_v13  ;;  %v4723_v30 = vld [vmem:[%s4988_s20 + $0x88] sm:$0xff] }
 0x4ef   : > { %v3423_v46 = vadd.f32 %v3422_v8, %v3334_v2  ;;  %v3763_v1 = vmax.f32 %v3731_v58, 0.0  ;;  %v4729_v2 = vld [vmem:[%s4988_s20 + $0xb8] sm:$0xff] }
 0x4f1   : > { %v3512_v10 = vadd.f32 %v7870_v35, %v3423_v46  ;;  %3795 = vst [vmem:[%s7884_s12 + $0x60] sm:$0xff] %v3763_v1  ;;  %v4730_v46 = vld [vmem:[%s4988_s20 + $0xc0] sm:$0xff] }
 0x4f2   : > { %v3671_v6 = vpop.f32.mrf.mxu3 }
 0x4f3   : > { %v3545_v16 = vmax.f32 %v3512_v10, 0.0  ;;  %v3672_v37 = vadd.f32 %v7877_v61, %v3671_v6  ;;  %v4731_v6 = vld [vmem:[%s4988_s20 + $0xc8] sm:$0xff] }
 0x4f5   : > { %v3561_v32 = vpack.c.bf16 %v3545_v16, %v3544_v53  ;;  %v3732_v40 = vadd.f32 %v4719_v49, %v3672_v37 }
 0x4f7   : > { %v3764_v17 = vmax.f32 %v3732_v40, 0.0  ;;  %4056 = vmatmul.msk.bf16.gmra.mxu3 %vm2808_vm2, %v3561_v32 }
 0x4f9   : > { %3796 = vst [vmem:[%s7884_s12 + $0x68] sm:$0xff] %v3764_v17  ;;  %v4732_v17 = vld [vmem:[%s4988_s20 + $0xd0] sm:$0xff] }
 0x4fa   : > { %v3674_v0 = vpop.f32.mrf.mxu3 }
 0x4fb   : > { %v3675_v35 = vadd.f32 %v7877_v61, %v3674_v0 }
 0x4fd   : > { %v3733_v26 = vadd.f32 %v4720_v9, %v3675_v35 }
 0x4ff   : > { %v3765_v44 = vmax.f32 %v3733_v26, 0.0 }
 0x501   : > { %3797 = vst [vmem:[%s7884_s12 + $0x70] sm:$0xff] %v3765_v44  ;;  %v4733_v44 = vld [vmem:[%s4988_s20 + $0xd8] sm:$0xff] }
 0x502   : > { %v3676_v45 = vpop.f32.mrf.mxu3 }
 0x503   : > { %v3677_v48 = vadd.f32 %v7877_v61, %v3676_v45 }
 0x505   : > { %v3734_v52 = vadd.f32 %v4721_v11, %v3677_v48 }
 0x507   : > { %v3766_v33 = vmax.f32 %v3734_v52, 0.0 }
 0x509   : > { %3798 = vst [vmem:[%s7884_s12 + $0x78] sm:$0xff] %v3766_v33  ;;  %v4734_v33 = vld [vmem:[%s4988_s20 + $0xe0] sm:$0xff] }
 0x50a   : > { %v3679_v25 = vpop.f32.mrf.mxu3 }
 0x50b   : > { %v3680_v12 = vadd.f32 %v7877_v61, %v3679_v25 }
 0x50d   : > { %v3735_v19 = vadd.f32 %v4722_v51, %v3680_v12 }
 0x50f   : > { %v3767_v15 = vmax.f32 %v3735_v19, 0.0 }
 0x511   : > { %3799 = vst [vmem:[%s7884_s12 + $0x80] sm:$0xff] %v3767_v15  ;;  %v4735_v15 = vld [vmem:[%s4988_s20 + $0xe8] sm:$0xff] }
 0x512   : > { %v3681_v3 = vpop.f32.mrf.mxu3 }
 0x513   : > { %v3682_v23 = vadd.f32 %v7877_v61, %v3681_v3 }
 0x515   : > { %v3736_v29 = vadd.f32 %v4723_v30, %v3682_v23 }
 0x517   : > { %v3768_v62 = vmax.f32 %v3736_v29, 0.0 }
 0x519   : > { %3800 = vst [vmem:[%s7884_s12 + $0x88] sm:$0xff] %v3768_v62  ;;  %v4736_v62 = vld [vmem:[%s4988_s20 + $0xf0] sm:$0xff] }
 0x51a   : > { %v3684_v63 = vpop.f32.mrf.mxu3 }
 0x51b   : > { %v3685_v42 = vadd.f32 %v7877_v61, %v3684_v63 }
 0x51d   : > { %v3737_v24 = vadd.f32 %v4724_v43, %v3685_v42 }
 0x51f   : > { %v3769_v54 = vmax.f32 %v3737_v24, 0.0 }
 0x521   : > { %3801 = vst [vmem:[%s7884_s12 + $0x90] sm:$0xff] %v3769_v54  ;;  %v4737_v54 = vld [vmem:[%s4988_s20 + $0xf8] sm:$0xff] }
 0x522   : > { %v3686_v5 = vpop.f32.mrf.mxu3 }
 0x523   : > { %v3687_v22 = vadd.f32 %v7877_v61, %v3686_v5 }
 0x525   : > { %v3738_v50 = vadd.f32 %v4725_v28, %v3687_v22 }
 0x527   : > { %v3770_v21 = vmax.f32 %v3738_v50, 0.0 }
 0x529   : > { %3802 = vst [vmem:[%s7884_s12 + $0x98] sm:$0xff] %v3770_v21 }
 0x52a   : > { %v3689_v56 = vpop.f32.mrf.mxu3 }
 0x52b   : > { %v3690_v59 = vadd.f32 %v7877_v61, %v3689_v56 }
 0x52d   : > { %v3739_v41 = vadd.f32 %v4726_v7, %v3690_v59 }
 0x52f   : > { %v3771_v34 = vmax.f32 %v3739_v41, 0.0 }
 0x531   : > { %3803 = vst [vmem:[%s7884_s12 + $0xa0] sm:$0xff] %v3771_v34 }
 0x532   : > { %v3691_v31 = vpop.f32.mrf.mxu3 }
 0x533   : > { %v3692_v27 = vadd.f32 %v7877_v61, %v3691_v31 }
 0x535   : > { %v3740_v57 = vadd.f32 %v4727_v47, %v3692_v27 }
 0x537   : > { %v3772_v36 = vmax.f32 %v3740_v57, 0.0 }
 0x539   : > { %3804 = vst [vmem:[%s7884_s12 + $0xa8] sm:$0xff] %v3772_v36 }
 0x53a   : > { %v3694_v38 = vpop.f32.mrf.mxu3 }
 0x53b   : > { %v3695_v55 = vadd.f32 %v7877_v61, %v3694_v38 }
 0x53d   : > { %v3741_v60 = vadd.f32 %v4728_v39, %v3695_v55 }
 0x53f   : > { %v3773_v4 = vmax.f32 %v3741_v60, 0.0 }
 0x541   : > { %3805 = vst [vmem:[%s7884_s12 + $0xb0] sm:$0xff] %v3773_v4 }
 0x542   : > { %v3696_v13 = vpop.f32.mrf.mxu3 }
 0x543   : > { %v3697_v20 = vadd.f32 %v7877_v61, %v3696_v13 }
 0x545   : > { %v3742_v8 = vadd.f32 %v4729_v2, %v3697_v20 }
 0x547   : > { %v3774_v14 = vmax.f32 %v3742_v8, 0.0 }
 0x549   : > { %3806 = vst [vmem:[%s7884_s12 + $0xb8] sm:$0xff] %v3774_v14 }
 0x54a   : > { %v3699_v58 = vpop.f32.mrf.mxu3 }
 0x54b   : > { %v3700_v18 = vadd.f32 %v7877_v61, %v3699_v58 }
 0x54d   : > { %v3743_v1 = vadd.f32 %v4730_v46, %v3700_v18 }
 0x54f   : > { %v3775_v10 = vmax.f32 %v3743_v1, 0.0 }
 0x551   : > { %3807 = vst [vmem:[%s7884_s12 + $0xc0] sm:$0xff] %v3775_v10 }
 0x552   : > { %v3701_v53 = vpop.f32.mrf.mxu3 }
 0x553   : > { %v3702_v16 = vadd.f32 %v7877_v61, %v3701_v53 }
 0x555   : > { %v3744_v37 = vadd.f32 %v4731_v6, %v3702_v16 }
 0x557   : > { %v3776_v32 = vmax.f32 %v3744_v37, 0.0 }
 0x559   : > { %3808 = vst [vmem:[%s7884_s12 + $0xc8] sm:$0xff] %v3776_v32 }
 0x55a   : > { %v3704_v49 = vpop.f32.mrf.mxu3 }
 0x55b   : > { %v3705_v40 = vadd.f32 %v7877_v61, %v3704_v49 }
 0x55d   : > { %v3745_v0 = vadd.f32 %v4732_v17, %v3705_v40 }
 0x55f   : > { %v3777_v35 = vmax.f32 %v3745_v0, 0.0 }
 0x561   : > { %3809 = vst [vmem:[%s7884_s12 + $0xd0] sm:$0xff] %v3777_v35 }
 0x562   : > { %v3706_v9 = vpop.f32.mrf.mxu3 }
 0x563   : > { %v3707_v26 = vadd.f32 %v7877_v61, %v3706_v9 }
 0x565   : > { %v3746_v45 = vadd.f32 %v4733_v44, %v3707_v26 }
 0x567   : > { %v3778_v48 = vmax.f32 %v3746_v45, 0.0 }
 0x569   : > { %3810 = vst [vmem:[%s7884_s12 + $0xd8] sm:$0xff] %v3778_v48 }
 0x56a   : > { %v3709_v11 = vpop.f32.mrf.mxu3 }
 0x56b   : > { %v3710_v52 = vadd.f32 %v7877_v61, %v3709_v11 }
 0x56d   : > { %v3747_v25 = vadd.f32 %v4734_v33, %v3710_v52 }
 0x56f   : > { %v3779_v12 = vmax.f32 %v3747_v25, 0.0 }
 0x571   : > { %3811 = vst [vmem:[%s7884_s12 + $0xe0] sm:$0xff] %v3779_v12 }
 0x572   : > { %v3711_v51 = vpop.f32.mrf.mxu3 }
 0x573   : > { %v3712_v19 = vadd.f32 %v7877_v61, %v3711_v51 }
 0x575   : > { %v3748_v3 = vadd.f32 %v4735_v15, %v3712_v19 }
 0x577   : > { %v3780_v23 = vmax.f32 %v3748_v3, 0.0 }
 0x579   : > { %3812 = vst [vmem:[%s7884_s12 + $0xe8] sm:$0xff] %v3780_v23 }
 0x57a   : > { %v3714_v30 = vpop.f32.mrf.mxu3 }
 0x57b   : > { %v3715_v29 = vadd.f32 %v7877_v61, %v3714_v30 }
 0x57d   : > { %v3749_v63 = vadd.f32 %v4736_v62, %v3715_v29 }
 0x57f   : > { %v3781_v42 = vmax.f32 %v3749_v63, 0.0 }
 0x581   : > { %3813 = vst [vmem:[%s7884_s12 + $0xf0] sm:$0xff] %v3781_v42 }
 0x582   : > { %v3716_v43 = vpop.f32.mrf.mxu3 }
 0x583   : > { %v3717_v24 = vadd.f32 %v7877_v61, %v3716_v43 }
 0x585   : > { %v3750_v5 = vadd.f32 %v4737_v54, %v3717_v24 }
 0x587   : > { %v3782_v22 = vmax.f32 %v3750_v5, 0.0 }
 0x589   : > { %3814 = vst [vmem:[%s7884_s12 + $0xf8] sm:$0xff] %v3782_v22 }
 0x58a   : > { %4795 = shalt.err (!%p4792_p4)
}
 0x58b   : > { %s4849_s26 = smov 128   ;;  %s4850_s20 = smov 8  }
 0x58c   : > { %4112 = dma.vmem_to_hbm [thread:$0]  (%p4946_p11), %s3829_s19, 4096, %s3831_s24, %s3816_s23, %s4849_s26, %s4849_s26, %s4850_s20  }
 0x58d PF: > { %s3845_s12 = sand.u32 1, %s4822_s27   ;;  %p8787_p7 = scmp.ge.s32.totalorder %s4834_s30, 2 }
 0x58e   : > { %s3846_s15 = scalar_lea.sflag [#allocation4], %s3845_s12 }
 0x58f   : > { %p4119_p5 = pnand %p8787_p7, %p4950_p12 }
 0x591   : > { %p4120_p8 = pneg %p4119_p5 }
 0x593   : > { %4817 = dma.done.wait (%p4120_p8), %s3846_s15, 4096  }
 0x594   : > { %4819 = vsyncadd (%p4120_p8), %s3846_s15, 4294963200  ;;  %s8788_s16 = sld [smem:[#allocation8_spill]]  ;;  %p21_p10 = scmp.ge.s32.totalorder %s4921_s11, 4  }
 0x595   : > { %s8789_s29 = sld [smem:[#allocation9_spill]]  ;;  %s8790_s27 = smov %s4826_s28 }
 0x596   : > { %s8792_s30 = smov %s4921_s11  ;;  %23 = sbr.rel (!%p21_p10) target bundleno = 5 (0x5), region = 97 }
 0x59a   : > { %s8791_s28 = smov %s8788_s16 }
 0x59b   :  { %3852 = vsyncpa [#allocation3], 1 }
 0x59c   :  { %3854 = vsyncpa [#allocation3 + $0x1], 1 }
 0x59d   :  { %3855 = vsyncpa [#allocation4], 1 }
 0x59e   :  { %3857 = vsyncpa [#allocation4 + $0x1], 1 }

</bundles_post_ra>
